<compile_context>
chip_gen: v7x
topology: tpu7x:2x2x1
jax: 0.10.0
libtpu: 0.0.40
codegen_flags: <defaults>
</compile_context>

<pallas_src>
import functools

import jax
import jax.numpy as jnp
from jax.experimental import pallas as pl
from jax.experimental.pallas import tpu as pltpu


def _fold_minor2(a):
    """(..., m, n) -> (..., m*n) using sublane slices + lane concatenation
    (avoids relying on tiled-dim reshapes inside Mosaic)."""
    m = a.shape[-2]
    return jnp.concatenate([a[..., i, :] for i in range(m)], axis=-1)


def window_attn_kernel(x_ref, wqkv_ref, bqkv_ref, wp_ref, bp_ref,
                       y_ref, attn_ref, *, num_heads, head_dim, block_windows,
                       window_len):
    Bb, N, H, hd = block_windows, window_len, num_heads, head_dim
    C = H * hd

    x = x_ref[...]                                    # (Bb*N, C)
    wqkv = wqkv_ref[...]                              # (C, 3C)  (q cols pre-scaled)
    wp = wp_ref[...]                                  # (C, C)

    # Fused QKV projection for the whole window block: one big MXU matmul.
    qkv = jnp.dot(x, wqkv, preferred_element_type=jnp.float32) + bqkv_ref[0]  # (Bb*N, 3C)

    y = jnp.zeros((Bb * N, C), dtype=jnp.float32)
    attn_parts = []
    for h in range(H):                                # small static unroll over heads
        qh = qkv[:, h * hd:(h + 1) * hd].reshape(Bb, N, hd)           # scale pre-folded
        kh = qkv[:, C + h * hd:C + (h + 1) * hd].reshape(Bb, N, hd)
        vh = qkv[:, 2 * C + h * hd:2 * C + (h + 1) * hd].reshape(Bb, N, hd)

        # Attention for this head, batched over the Bb windows in the block.
        logits = jnp.einsum("bnd,bmd->bnm", qh, kh,
                            preferred_element_type=jnp.float32)       # (Bb, N, N)
        mx = jnp.max(logits, axis=-1, keepdims=True)
        e = jnp.exp(logits - mx)
        s = jnp.sum(e, axis=-1, keepdims=True)
        p = e * pl.reciprocal(s, approx=True)                         # softmax(dim=-1)

        attn_parts.append(_fold_minor2(p))                            # (Bb, N*N)

        # (attn @ v), folded straight into the output projection via this
        # head's slice of Wp (linear => sum over heads, no lane concat of o).
        oh = jnp.einsum("bnm,bmd->bnd", p, vh,
                        preferred_element_type=jnp.float32)           # (Bb, N, hd)
        y = y + jnp.dot(oh.reshape(Bb * N, hd), wp[h * hd:(h + 1) * hd, :],
                        preferred_element_type=jnp.float32)

    # Single lane-dense stores per grid step.
    attn_ref[...] = jnp.concatenate(attn_parts, axis=-1).astype(attn_ref.dtype)
    y = y + bp_ref[0]                                                  # (Bb*N, C)
    y_ref[...] = _fold_minor2(y.reshape(Bb, N, C)).astype(y_ref.dtype)


def prepare_params(wqkv, bqkv, wp, bp, *, num_heads, qk_scale=None):
    """One-time parameter prep (transposes, bias reshapes, qk-scale folding)."""
    C = wp.shape[0]
    hd = C // num_heads
    scale = qk_scale if qk_scale is not None else hd ** (-0.5)
    wqkv_t = wqkv.T                                   # (C, 3C)
    scale_vec = jnp.concatenate([
        jnp.full((C,), scale, wqkv_t.dtype),
        jnp.ones((2 * C,), wqkv_t.dtype),
    ])
    wqkv_t = wqkv_t * scale_vec[None, :]              # scale q-columns only
    bqkv2 = (bqkv * scale_vec).reshape(1, -1)
    return wqkv_t, bqkv2, wp.T, bp.reshape(1, -1)


def window_attention(x, wqkv_t, bqkv2, wp_t, bp2, *, num_heads, block_windows=8):
    """x: (B_, N, C); wqkv_t: (C, 3C) with q-cols pre-scaled; bqkv2: (1, 3C);
    wp_t: (C, C); bp2: (1, C).  Returns (y, attn) matching the PyTorch module
    forward with mask=None."""
    B_, N, C = x.shape
    H = num_heads
    hd = C // H

    Bb = min(block_windows, B_)
    # Keep the block row count sublane-aligned (or cover the whole array).
    while Bb < B_ and (Bb * N) % 8 != 0:
        Bb += 1
    pad = (-B_) % Bb
    Bp = B_ + pad
    if pad:
        x = jnp.concatenate([x, jnp.zeros((pad, N, C), x.dtype)], axis=0)
    x2 = x.reshape(Bp * N, C)          # rows ordered (window, token)

    kernel = functools.partial(
        window_attn_kernel, num_heads=H, head_dim=hd, block_windows=Bb,
        window_len=N)

    flops = (2 * Bp * N * C * 3 * C          # qkv projection
             + 4 * Bp * H * N * N * hd       # q@k^T and attn@v
             + 2 * Bp * N * C * C)           # output projection
    bytes_accessed = 4 * (x2.size + wqkv_t.size + bqkv2.size + wp_t.size
                          + bp2.size + Bp * N * C + Bp * H * N * N)
    cost = pl.CostEstimate(flops=flops,
                           transcendentals=Bp * H * N * (N + 1),
                           bytes_accessed=bytes_accessed)

    y_flat, attn_flat = pl.pallas_call(
        kernel,
        out_shape=(
            jax.ShapeDtypeStruct((Bp, N * C), x.dtype),            # lane-dense y
            jax.ShapeDtypeStruct((Bp, H * N * N), jnp.float32),    # lane-dense attn
        ),
        grid_spec=pltpu.PrefetchScalarGridSpec(
            num_scalar_prefetch=0,
            grid=(Bp // Bb,),
            in_specs=[
                pl.BlockSpec((Bb * N, C), lambda wb: (wb, 0)),
                pl.BlockSpec((C, 3 * C), lambda wb: (0, 0)),
                pl.BlockSpec((1, 3 * C), lambda wb: (0, 0)),
                pl.BlockSpec((C, C), lambda wb: (0, 0)),
                pl.BlockSpec((1, C), lambda wb: (0, 0)),
            ],
            out_specs=[
                pl.BlockSpec((Bb, N * C), lambda wb: (wb, 0)),
                pl.BlockSpec((Bb, H * N * N), lambda wb: (wb, 0)),
            ],
        ),
        compiler_params=pltpu.CompilerParams(dimension_semantics=("parallel",)),
        cost_estimate=cost,
    )(x2, wqkv_t, bqkv2, wp_t, bp2)

    y = y_flat[:B_].reshape(B_, N, C)
    attn = attn_flat[:B_].reshape(B_, H, N, N)
    return y, attn


def window_attention_ref(x, wqkv, bqkv, wp, bp, *, num_heads, qk_scale=None):
    """Pure-JAX reference mirroring the PyTorch forward (mask=None)."""
    B_, N, C = x.shape
    hd = C // num_heads
    scale = qk_scale if qk_scale is not None else hd ** (-0.5)
    qkv = x @ wqkv.T + bqkv                                  # (B_, N, 3C)
    qkv = qkv.reshape(B_, N, 3, num_heads, hd).transpose(2, 0, 3, 1, 4)
    q, k, v = qkv[0], qkv[1], qkv[2]                         # (B_, H, N, hd)
    q = q * scale
    attn = jnp.einsum("bhnd,bhmd->bhnm", q, k)
    attn = jax.nn.softmax(attn, axis=-1)
    out = jnp.einsum("bhnm,bhmd->bhnd", attn, v)
    out = out.transpose(0, 2, 1, 3).reshape(B_, N, C)
    y = out @ wp.T + bp
    return y, attn


if __name__ == "__main__":
    # dim=32, heads=4, window 4x4 -> N=16; B_ = num_windows*batch = 16
    # (2 window-blocks of 8 -> 2 megacore-parallel grid steps).
    dim = 32
    num_heads = 4
    window_size = (4, 4)
    N = window_size[0] * window_size[1]
    B_ = 16

    key = jax.random.PRNGKey(0)
    kx, kw1, kb1, kw2, kb2 = jax.random.split(key, 5)

    x = jax.random.normal(kx, (B_, N, dim), dtype=jnp.float32)
    wqkv = jax.random.normal(kw1, (3 * dim, dim), dtype=jnp.float32) * 0.05
    bqkv = jax.random.normal(kb1, (3 * dim,), dtype=jnp.float32) * 0.05
    wp = jax.random.normal(kw2, (dim, dim), dtype=jnp.float32) * 0.05
    bp = jax.random.normal(kb2, (dim,), dtype=jnp.float32) * 0.05

    params = prepare_params(wqkv, bqkv, wp, bp, num_heads=num_heads)  # one-time

    fn = jax.jit(functools.partial(window_attention, num_heads=num_heads,
                                   block_windows=8))
    y, attn = fn(x, *params)
    y = jax.block_until_ready(y)
    attn = jax.block_until_ready(attn)

    y_exp, attn_exp = window_attention_ref(x, wqkv, bqkv, wp, bp,
                                           num_heads=num_heads)
    assert jnp.allclose(y, y_exp, atol=3e-3, rtol=3e-3), \
        float(jnp.max(jnp.abs(y - y_exp)))
    assert jnp.allclose(attn, attn_exp, atol=2e-3, rtol=2e-2), \
        float(jnp.max(jnp.abs(attn - attn_exp)))

    print("KERNEL_OK")
</pallas_src>

<mosaic_0001>
module attributes {stable_mosaic.version = 11 : i64} {
  func.func @window_attn_kernel(%arg0: i32, %arg1: memref<128x32xf32, #tpu.memory_space<vmem>>, %arg2: memref<32x96xf32, #tpu.memory_space<vmem>>, %arg3: memref<1x96xf32, #tpu.memory_space<vmem>>, %arg4: memref<32x32xf32, #tpu.memory_space<vmem>>, %arg5: memref<1x32xf32, #tpu.memory_space<vmem>>, %arg6: memref<8x512xf32, #tpu.memory_space<vmem>>, %arg7: memref<8x1024xf32, #tpu.memory_space<vmem>>) attributes {dimension_semantics = [#tpu.dimension_semantics<parallel>], iteration_bounds = array<i64: 2>, scalar_prefetch = 0 : i64, scratch_operands = 0 : i64, tpu.core_type = #tpu.core_type<tc>, window_params = [{transform_indices = @transform_0, window_bounds = array<i64: 128, 32>}, {pipeline_mode = #tpu.pipeline_mode<synchronous>, transform_indices = @transform_1, window_bounds = array<i64: 32, 96>}, {pipeline_mode = #tpu.pipeline_mode<synchronous>, transform_indices = @transform_2, window_bounds = array<i64: 1, 96>}, {pipeline_mode = #tpu.pipeline_mode<synchronous>, transform_indices = @transform_3, window_bounds = array<i64: 32, 32>}, {pipeline_mode = #tpu.pipeline_mode<synchronous>, transform_indices = @transform_4, window_bounds = array<i64: 1, 32>}, {transform_indices = @transform_5, window_bounds = array<i64: 8, 512>}, {transform_indices = @transform_6, window_bounds = array<i64: 8, 1024>}]} {
    %c0 = arith.constant 0 : index
    %c0_0 = arith.constant 0 : index
    %0 = vector.load %arg1[%c0, %c0_0] : memref<128x32xf32, #tpu.memory_space<vmem>>, vector<128x32xf32>
    %c0_1 = arith.constant 0 : index
    %c0_2 = arith.constant 0 : index
    %1 = vector.load %arg2[%c0_1, %c0_2] : memref<32x96xf32, #tpu.memory_space<vmem>>, vector<32x96xf32>
    %c0_3 = arith.constant 0 : index
    %c0_4 = arith.constant 0 : index
    %2 = vector.load %arg4[%c0_3, %c0_4] : memref<32x32xf32, #tpu.memory_space<vmem>>, vector<32x32xf32>
    %cst = arith.constant dense<0.000000e+00> : vector<128x96xf32>
    %3 = tpu.matmul %0, %1, %cst {dimension_numbers = #tpu.dot_dimension_numbers<[1], [0], [0], [1], [0, 0, 1, 1], [], []>} : vector<128x32xf32>, vector<32x96xf32>, vector<128x96xf32> -> vector<128x96xf32>
    %c0_5 = arith.constant 0 : index
    %c0_6 = arith.constant 0 : index
    %4 = vector.load %arg3[%c0_5, %c0_6] : memref<1x96xf32, #tpu.memory_space<vmem>>, vector<1x96xf32>
    %5 = vector.shape_cast %4 : vector<1x96xf32> to vector<96xf32>
    %6 = vector.shape_cast %5 : vector<96xf32> to vector<1x96xf32>
    %7 = vector.broadcast %6 : vector<1x96xf32> to vector<128x96xf32>
    %8 = arith.addf %3, %7 : vector<128x96xf32>
    %cst_7 = arith.constant 0.000000e+00 : f32
    %9 = vector.broadcast %cst_7 : f32 to vector<128x32xf32>
    %10 = vector.extract_strided_slice %8 {offsets = [0, 0], sizes = [128, 8], strides = [1, 1]} : vector<128x96xf32> to vector<128x8xf32>
    %11 = vector.shape_cast %10 : vector<128x8xf32> to vector<8x16x8xf32>
    %12 = vector.extract_strided_slice %8 {offsets = [0, 32], sizes = [128, 8], strides = [1, 1]} : vector<128x96xf32> to vector<128x8xf32>
    %13 = vector.shape_cast %12 : vector<128x8xf32> to vector<8x16x8xf32>
    %14 = vector.extract_strided_slice %8 {offsets = [0, 64], sizes = [128, 8], strides = [1, 1]} : vector<128x96xf32> to vector<128x8xf32>
    %15 = vector.shape_cast %14 : vector<128x8xf32> to vector<8x16x8xf32>
    "tpu.trace_start"() <{level = 10 : i32, message = "bnd,bmd->bnm"}> : () -> ()
    %cst_8 = arith.constant dense<0.000000e+00> : vector<8x16x16xf32>
    %16 = tpu.matmul %11, %13, %cst_8 {dimension_numbers = #tpu.dot_dimension_numbers<[2], [2], [1], [1], [0, 0, 0, 1, 1, 1], [0], [0]>} : vector<8x16x8xf32>, vector<8x16x8xf32>, vector<8x16x16xf32> -> vector<8x16x16xf32>
    "tpu.trace_stop"() : () -> ()
    %cst_9 = arith.constant dense<0xFF800000> : vector<8x16xf32>
    %17 = vector.multi_reduction <maximumf>, %16, %cst_9 [2] : vector<8x16x16xf32> to vector<8x16xf32>
    %18 = vector.shape_cast %17 : vector<8x16xf32> to vector<8x16x1xf32>
    %19 = vector.broadcast %18 : vector<8x16x1xf32> to vector<8x16x16xf32>
    %20 = arith.subf %16, %19 : vector<8x16x16xf32>
    %21 = math.exp %20 : vector<8x16x16xf32>
    %cst_10 = arith.constant dense<0.000000e+00> : vector<8x16xf32>
    %22 = vector.multi_reduction <add>, %21, %cst_10 [2] : vector<8x16x16xf32> to vector<8x16xf32>
    %23 = vector.shape_cast %22 : vector<8x16xf32> to vector<8x16x1xf32>
    %24 = tpu.reciprocal %23 {approx = true} : vector<8x16x1xf32> -> vector<8x16x1xf32>
    %25 = vector.broadcast %24 : vector<8x16x1xf32> to vector<8x16x16xf32>
    %26 = arith.mulf %21, %25 : vector<8x16x16xf32>
    %27 = vector.extract_strided_slice %26 {offsets = [0, 0, 0], sizes = [8, 1, 16], strides = [1, 1, 1]} : vector<8x16x16xf32> to vector<8x1x16xf32>
    %28 = vector.shape_cast %27 : vector<8x1x16xf32> to vector<8x16xf32>
    %29 = vector.extract_strided_slice %26 {offsets = [0, 1, 0], sizes = [8, 1, 16], strides = [1, 1, 1]} : vector<8x16x16xf32> to vector<8x1x16xf32>
    %30 = vector.shape_cast %29 : vector<8x1x16xf32> to vector<8x16xf32>
    %31 = vector.extract_strided_slice %26 {offsets = [0, 2, 0], sizes = [8, 1, 16], strides = [1, 1, 1]} : vector<8x16x16xf32> to vector<8x1x16xf32>
    %32 = vector.shape_cast %31 : vector<8x1x16xf32> to vector<8x16xf32>
    %33 = vector.extract_strided_slice %26 {offsets = [0, 3, 0], sizes = [8, 1, 16], strides = [1, 1, 1]} : vector<8x16x16xf32> to vector<8x1x16xf32>
    %34 = vector.shape_cast %33 : vector<8x1x16xf32> to vector<8x16xf32>
    %35 = vector.extract_strided_slice %26 {offsets = [0, 4, 0], sizes = [8, 1, 16], strides = [1, 1, 1]} : vector<8x16x16xf32> to vector<8x1x16xf32>
    %36 = vector.shape_cast %35 : vector<8x1x16xf32> to vector<8x16xf32>
    %37 = vector.extract_strided_slice %26 {offsets = [0, 5, 0], sizes = [8, 1, 16], strides = [1, 1, 1]} : vector<8x16x16xf32> to vector<8x1x16xf32>
    %38 = vector.shape_cast %37 : vector<8x1x16xf32> to vector<8x16xf32>
    %39 = vector.extract_strided_slice %26 {offsets = [0, 6, 0], sizes = [8, 1, 16], strides = [1, 1, 1]} : vector<8x16x16xf32> to vector<8x1x16xf32>
    %40 = vector.shape_cast %39 : vector<8x1x16xf32> to vector<8x16xf32>
    %41 = vector.extract_strided_slice %26 {offsets = [0, 7, 0], sizes = [8, 1, 16], strides = [1, 1, 1]} : vector<8x16x16xf32> to vector<8x1x16xf32>
    %42 = vector.shape_cast %41 : vector<8x1x16xf32> to vector<8x16xf32>
    %43 = vector.extract_strided_slice %26 {offsets = [0, 8, 0], sizes = [8, 1, 16], strides = [1, 1, 1]} : vector<8x16x16xf32> to vector<8x1x16xf32>
    %44 = vector.shape_cast %43 : vector<8x1x16xf32> to vector<8x16xf32>
    %45 = vector.extract_strided_slice %26 {offsets = [0, 9, 0], sizes = [8, 1, 16], strides = [1, 1, 1]} : vector<8x16x16xf32> to vector<8x1x16xf32>
    %46 = vector.shape_cast %45 : vector<8x1x16xf32> to vector<8x16xf32>
    %47 = vector.extract_strided_slice %26 {offsets = [0, 10, 0], sizes = [8, 1, 16], strides = [1, 1, 1]} : vector<8x16x16xf32> to vector<8x1x16xf32>
    %48 = vector.shape_cast %47 : vector<8x1x16xf32> to vector<8x16xf32>
    %49 = vector.extract_strided_slice %26 {offsets = [0, 11, 0], sizes = [8, 1, 16], strides = [1, 1, 1]} : vector<8x16x16xf32> to vector<8x1x16xf32>
    %50 = vector.shape_cast %49 : vector<8x1x16xf32> to vector<8x16xf32>
    %51 = vector.extract_strided_slice %26 {offsets = [0, 12, 0], sizes = [8, 1, 16], strides = [1, 1, 1]} : vector<8x16x16xf32> to vector<8x1x16xf32>
    %52 = vector.shape_cast %51 : vector<8x1x16xf32> to vector<8x16xf32>
    %53 = vector.extract_strided_slice %26 {offsets = [0, 13, 0], sizes = [8, 1, 16], strides = [1, 1, 1]} : vector<8x16x16xf32> to vector<8x1x16xf32>
    %54 = vector.shape_cast %53 : vector<8x1x16xf32> to vector<8x16xf32>
    %55 = vector.extract_strided_slice %26 {offsets = [0, 14, 0], sizes = [8, 1, 16], strides = [1, 1, 1]} : vector<8x16x16xf32> to vector<8x1x16xf32>
    %56 = vector.shape_cast %55 : vector<8x1x16xf32> to vector<8x16xf32>
    %57 = vector.extract_strided_slice %26 {offsets = [0, 15, 0], sizes = [8, 1, 16], strides = [1, 1, 1]} : vector<8x16x16xf32> to vector<8x1x16xf32>
    %58 = vector.shape_cast %57 : vector<8x1x16xf32> to vector<8x16xf32>
    %59 = tpu.concatenate %28, %30, %32, %34, %36, %38, %40, %42, %44, %46, %48, %50, %52, %54, %56, %58 in 1 : vector<8x16xf32>, vector<8x16xf32>, vector<8x16xf32>, vector<8x16xf32>, vector<8x16xf32>, vector<8x16xf32>, vector<8x16xf32>, vector<8x16xf32>, vector<8x16xf32>, vector<8x16xf32>, vector<8x16xf32>, vector<8x16xf32>, vector<8x16xf32>, vector<8x16xf32>, vector<8x16xf32>, vector<8x16xf32> -> vector<8x256xf32>
    "tpu.trace_start"() <{level = 10 : i32, message = "bnm,bmd->bnd"}> : () -> ()
    %cst_11 = arith.constant dense<0.000000e+00> : vector<8x16x8xf32>
    %60 = tpu.matmul %26, %15, %cst_11 {dimension_numbers = #tpu.dot_dimension_numbers<[2], [1], [1], [2], [0, 0, 0, 1, 1, 2], [0], [0]>} : vector<8x16x16xf32>, vector<8x16x8xf32>, vector<8x16x8xf32> -> vector<8x16x8xf32>
    "tpu.trace_stop"() : () -> ()
    %61 = vector.shape_cast %60 : vector<8x16x8xf32> to vector<128x8xf32>
    %62 = vector.extract_strided_slice %2 {offsets = [0, 0], sizes = [8, 32], strides = [1, 1]} : vector<32x32xf32> to vector<8x32xf32>
    %cst_12 = arith.constant dense<0.000000e+00> : vector<128x32xf32>
    %63 = tpu.matmul %61, %62, %cst_12 {dimension_numbers = #tpu.dot_dimension_numbers<[1], [0], [0], [1], [0, 0, 1, 1], [], []>} : vector<128x8xf32>, vector<8x32xf32>, vector<128x32xf32> -> vector<128x32xf32>
    %64 = arith.addf %9, %63 : vector<128x32xf32>
    %65 = vector.extract_strided_slice %8 {offsets = [0, 8], sizes = [128, 8], strides = [1, 1]} : vector<128x96xf32> to vector<128x8xf32>
    %66 = vector.shape_cast %65 : vector<128x8xf32> to vector<8x16x8xf32>
    %67 = vector.extract_strided_slice %8 {offsets = [0, 40], sizes = [128, 8], strides = [1, 1]} : vector<128x96xf32> to vector<128x8xf32>
    %68 = vector.shape_cast %67 : vector<128x8xf32> to vector<8x16x8xf32>
    %69 = vector.extract_strided_slice %8 {offsets = [0, 72], sizes = [128, 8], strides = [1, 1]} : vector<128x96xf32> to vector<128x8xf32>
    %70 = vector.shape_cast %69 : vector<128x8xf32> to vector<8x16x8xf32>
    "tpu.trace_start"() <{level = 10 : i32, message = "bnd,bmd->bnm"}> : () -> ()
    %cst_13 = arith.constant dense<0.000000e+00> : vector<8x16x16xf32>
    %71 = tpu.matmul %66, %68, %cst_13 {dimension_numbers = #tpu.dot_dimension_numbers<[2], [2], [1], [1], [0, 0, 0, 1, 1, 1], [0], [0]>} : vector<8x16x8xf32>, vector<8x16x8xf32>, vector<8x16x16xf32> -> vector<8x16x16xf32>
    "tpu.trace_stop"() : () -> ()
    %cst_14 = arith.constant dense<0xFF800000> : vector<8x16xf32>
    %72 = vector.multi_reduction <maximumf>, %71, %cst_14 [2] : vector<8x16x16xf32> to vector<8x16xf32>
    %73 = vector.shape_cast %72 : vector<8x16xf32> to vector<8x16x1xf32>
    %74 = vector.broadcast %73 : vector<8x16x1xf32> to vector<8x16x16xf32>
    %75 = arith.subf %71, %74 : vector<8x16x16xf32>
    %76 = math.exp %75 : vector<8x16x16xf32>
    %cst_15 = arith.constant dense<0.000000e+00> : vector<8x16xf32>
    %77 = vector.multi_reduction <add>, %76, %cst_15 [2] : vector<8x16x16xf32> to vector<8x16xf32>
    %78 = vector.shape_cast %77 : vector<8x16xf32> to vector<8x16x1xf32>
    %79 = tpu.reciprocal %78 {approx = true} : vector<8x16x1xf32> -> vector<8x16x1xf32>
    %80 = vector.broadcast %79 : vector<8x16x1xf32> to vector<8x16x16xf32>
    %81 = arith.mulf %76, %80 : vector<8x16x16xf32>
    %82 = vector.extract_strided_slice %81 {offsets = [0, 0, 0], sizes = [8, 1, 16], strides = [1, 1, 1]} : vector<8x16x16xf32> to vector<8x1x16xf32>
    %83 = vector.shape_cast %82 : vector<8x1x16xf32> to vector<8x16xf32>
    %84 = vector.extract_strided_slice %81 {offsets = [0, 1, 0], sizes = [8, 1, 16], strides = [1, 1, 1]} : vector<8x16x16xf32> to vector<8x1x16xf32>
    %85 = vector.shape_cast %84 : vector<8x1x16xf32> to vector<8x16xf32>
    %86 = vector.extract_strided_slice %81 {offsets = [0, 2, 0], sizes = [8, 1, 16], strides = [1, 1, 1]} : vector<8x16x16xf32> to vector<8x1x16xf32>
    %87 = vector.shape_cast %86 : vector<8x1x16xf32> to vector<8x16xf32>
    %88 = vector.extract_strided_slice %81 {offsets = [0, 3, 0], sizes = [8, 1, 16], strides = [1, 1, 1]} : vector<8x16x16xf32> to vector<8x1x16xf32>
    %89 = vector.shape_cast %88 : vector<8x1x16xf32> to vector<8x16xf32>
    %90 = vector.extract_strided_slice %81 {offsets = [0, 4, 0], sizes = [8, 1, 16], strides = [1, 1, 1]} : vector<8x16x16xf32> to vector<8x1x16xf32>
    %91 = vector.shape_cast %90 : vector<8x1x16xf32> to vector<8x16xf32>
    %92 = vector.extract_strided_slice %81 {offsets = [0, 5, 0], sizes = [8, 1, 16], strides = [1, 1, 1]} : vector<8x16x16xf32> to vector<8x1x16xf32>
    %93 = vector.shape_cast %92 : vector<8x1x16xf32> to vector<8x16xf32>
    %94 = vector.extract_strided_slice %81 {offsets = [0, 6, 0], sizes = [8, 1, 16], strides = [1, 1, 1]} : vector<8x16x16xf32> to vector<8x1x16xf32>
    %95 = vector.shape_cast %94 : vector<8x1x16xf32> to vector<8x16xf32>
    %96 = vector.extract_strided_slice %81 {offsets = [0, 7, 0], sizes = [8, 1, 16], strides = [1, 1, 1]} : vector<8x16x16xf32> to vector<8x1x16xf32>
    %97 = vector.shape_cast %96 : vector<8x1x16xf32> to vector<8x16xf32>
    %98 = vector.extract_strided_slice %81 {offsets = [0, 8, 0], sizes = [8, 1, 16], strides = [1, 1, 1]} : vector<8x16x16xf32> to vector<8x1x16xf32>
    %99 = vector.shape_cast %98 : vector<8x1x16xf32> to vector<8x16xf32>
    %100 = vector.extract_strided_slice %81 {offsets = [0, 9, 0], sizes = [8, 1, 16], strides = [1, 1, 1]} : vector<8x16x16xf32> to vector<8x1x16xf32>
    %101 = vector.shape_cast %100 : vector<8x1x16xf32> to vector<8x16xf32>
    %102 = vector.extract_strided_slice %81 {offsets = [0, 10, 0], sizes = [8, 1, 16], strides = [1, 1, 1]} : vector<8x16x16xf32> to vector<8x1x16xf32>
    %103 = vector.shape_cast %102 : vector<8x1x16xf32> to vector<8x16xf32>
    %104 = vector.extract_strided_slice %81 {offsets = [0, 11, 0], sizes = [8, 1, 16], strides = [1, 1, 1]} : vector<8x16x16xf32> to vector<8x1x16xf32>
    %105 = vector.shape_cast %104 : vector<8x1x16xf32> to vector<8x16xf32>
    %106 = vector.extract_strided_slice %81 {offsets = [0, 12, 0], sizes = [8, 1, 16], strides = [1, 1, 1]} : vector<8x16x16xf32> to vector<8x1x16xf32>
    %107 = vector.shape_cast %106 : vector<8x1x16xf32> to vector<8x16xf32>
    %108 = vector.extract_strided_slice %81 {offsets = [0, 13, 0], sizes = [8, 1, 16], strides = [1, 1, 1]} : vector<8x16x16xf32> to vector<8x1x16xf32>
    %109 = vector.shape_cast %108 : vector<8x1x16xf32> to vector<8x16xf32>
    %110 = vector.extract_strided_slice %81 {offsets = [0, 14, 0], sizes = [8, 1, 16], strides = [1, 1, 1]} : vector<8x16x16xf32> to vector<8x1x16xf32>
    %111 = vector.shape_cast %110 : vector<8x1x16xf32> to vector<8x16xf32>
    %112 = vector.extract_strided_slice %81 {offsets = [0, 15, 0], sizes = [8, 1, 16], strides = [1, 1, 1]} : vector<8x16x16xf32> to vector<8x1x16xf32>
    %113 = vector.shape_cast %112 : vector<8x1x16xf32> to vector<8x16xf32>
    %114 = tpu.concatenate %83, %85, %87, %89, %91, %93, %95, %97, %99, %101, %103, %105, %107, %109, %111, %113 in 1 : vector<8x16xf32>, vector<8x16xf32>, vector<8x16xf32>, vector<8x16xf32>, vector<8x16xf32>, vector<8x16xf32>, vector<8x16xf32>, vector<8x16xf32>, vector<8x16xf32>, vector<8x16xf32>, vector<8x16xf32>, vector<8x16xf32>, vector<8x16xf32>, vector<8x16xf32>, vector<8x16xf32>, vector<8x16xf32> -> vector<8x256xf32>
    "tpu.trace_start"() <{level = 10 : i32, message = "bnm,bmd->bnd"}> : () -> ()
    %cst_16 = arith.constant dense<0.000000e+00> : vector<8x16x8xf32>
    %115 = tpu.matmul %81, %70, %cst_16 {dimension_numbers = #tpu.dot_dimension_numbers<[2], [1], [1], [2], [0, 0, 0, 1, 1, 2], [0], [0]>} : vector<8x16x16xf32>, vector<8x16x8xf32>, vector<8x16x8xf32> -> vector<8x16x8xf32>
    "tpu.trace_stop"() : () -> ()
    %116 = vector.shape_cast %115 : vector<8x16x8xf32> to vector<128x8xf32>
    %117 = vector.extract_strided_slice %2 {offsets = [8, 0], sizes = [8, 32], strides = [1, 1]} : vector<32x32xf32> to vector<8x32xf32>
    %cst_17 = arith.constant dense<0.000000e+00> : vector<128x32xf32>
    %118 = tpu.matmul %116, %117, %cst_17 {dimension_numbers = #tpu.dot_dimension_numbers<[1], [0], [0], [1], [0, 0, 1, 1], [], []>} : vector<128x8xf32>, vector<8x32xf32>, vector<128x32xf32> -> vector<128x32xf32>
    %119 = arith.addf %64, %118 : vector<128x32xf32>
    %120 = vector.extract_strided_slice %8 {offsets = [0, 16], sizes = [128, 8], strides = [1, 1]} : vector<128x96xf32> to vector<128x8xf32>
    %121 = vector.shape_cast %120 : vector<128x8xf32> to vector<8x16x8xf32>
    %122 = vector.extract_strided_slice %8 {offsets = [0, 48], sizes = [128, 8], strides = [1, 1]} : vector<128x96xf32> to vector<128x8xf32>
    %123 = vector.shape_cast %122 : vector<128x8xf32> to vector<8x16x8xf32>
    %124 = vector.extract_strided_slice %8 {offsets = [0, 80], sizes = [128, 8], strides = [1, 1]} : vector<128x96xf32> to vector<128x8xf32>
    %125 = vector.shape_cast %124 : vector<128x8xf32> to vector<8x16x8xf32>
    "tpu.trace_start"() <{level = 10 : i32, message = "bnd,bmd->bnm"}> : () -> ()
    %cst_18 = arith.constant dense<0.000000e+00> : vector<8x16x16xf32>
    %126 = tpu.matmul %121, %123, %cst_18 {dimension_numbers = #tpu.dot_dimension_numbers<[2], [2], [1], [1], [0, 0, 0, 1, 1, 1], [0], [0]>} : vector<8x16x8xf32>, vector<8x16x8xf32>, vector<8x16x16xf32> -> vector<8x16x16xf32>
    "tpu.trace_stop"() : () -> ()
    %cst_19 = arith.constant dense<0xFF800000> : vector<8x16xf32>
    %127 = vector.multi_reduction <maximumf>, %126, %cst_19 [2] : vector<8x16x16xf32> to vector<8x16xf32>
    %128 = vector.shape_cast %127 : vector<8x16xf32> to vector<8x16x1xf32>
    %129 = vector.broadcast %128 : vector<8x16x1xf32> to vector<8x16x16xf32>
    %130 = arith.subf %126, %129 : vector<8x16x16xf32>
    %131 = math.exp %130 : vector<8x16x16xf32>
    %cst_20 = arith.constant dense<0.000000e+00> : vector<8x16xf32>
    %132 = vector.multi_reduction <add>, %131, %cst_20 [2] : vector<8x16x16xf32> to vector<8x16xf32>
    %133 = vector.shape_cast %132 : vector<8x16xf32> to vector<8x16x1xf32>
    %134 = tpu.reciprocal %133 {approx = true} : vector<8x16x1xf32> -> vector<8x16x1xf32>
    %135 = vector.broadcast %134 : vector<8x16x1xf32> to vector<8x16x16xf32>
    %136 = arith.mulf %131, %135 : vector<8x16x16xf32>
    %137 = vector.extract_strided_slice %136 {offsets = [0, 0, 0], sizes = [8, 1, 16], strides = [1, 1, 1]} : vector<8x16x16xf32> to vector<8x1x16xf32>
    %138 = vector.shape_cast %137 : vector<8x1x16xf32> to vector<8x16xf32>
    %139 = vector.extract_strided_slice %136 {offsets = [0, 1, 0], sizes = [8, 1, 16], strides = [1, 1, 1]} : vector<8x16x16xf32> to vector<8x1x16xf32>
    %140 = vector.shape_cast %139 : vector<8x1x16xf32> to vector<8x16xf32>
    %141 = vector.extract_strided_slice %136 {offsets = [0, 2, 0], sizes = [8, 1, 16], strides = [1, 1, 1]} : vector<8x16x16xf32> to vector<8x1x16xf32>
    %142 = vector.shape_cast %141 : vector<8x1x16xf32> to vector<8x16xf32>
    %143 = vector.extract_strided_slice %136 {offsets = [0, 3, 0], sizes = [8, 1, 16], strides = [1, 1, 1]} : vector<8x16x16xf32> to vector<8x1x16xf32>
    %144 = vector.shape_cast %143 : vector<8x1x16xf32> to vector<8x16xf32>
    %145 = vector.extract_strided_slice %136 {offsets = [0, 4, 0], sizes = [8, 1, 16], strides = [1, 1, 1]} : vector<8x16x16xf32> to vector<8x1x16xf32>
    %146 = vector.shape_cast %145 : vector<8x1x16xf32> to vector<8x16xf32>
    %147 = vector.extract_strided_slice %136 {offsets = [0, 5, 0], sizes = [8, 1, 16], strides = [1, 1, 1]} : vector<8x16x16xf32> to vector<8x1x16xf32>
    %148 = vector.shape_cast %147 : vector<8x1x16xf32> to vector<8x16xf32>
    %149 = vector.extract_strided_slice %136 {offsets = [0, 6, 0], sizes = [8, 1, 16], strides = [1, 1, 1]} : vector<8x16x16xf32> to vector<8x1x16xf32>
    %150 = vector.shape_cast %149 : vector<8x1x16xf32> to vector<8x16xf32>
    %151 = vector.extract_strided_slice %136 {offsets = [0, 7, 0], sizes = [8, 1, 16], strides = [1, 1, 1]} : vector<8x16x16xf32> to vector<8x1x16xf32>
    %152 = vector.shape_cast %151 : vector<8x1x16xf32> to vector<8x16xf32>
    %153 = vector.extract_strided_slice %136 {offsets = [0, 8, 0], sizes = [8, 1, 16], strides = [1, 1, 1]} : vector<8x16x16xf32> to vector<8x1x16xf32>
    %154 = vector.shape_cast %153 : vector<8x1x16xf32> to vector<8x16xf32>
    %155 = vector.extract_strided_slice %136 {offsets = [0, 9, 0], sizes = [8, 1, 16], strides = [1, 1, 1]} : vector<8x16x16xf32> to vector<8x1x16xf32>
    %156 = vector.shape_cast %155 : vector<8x1x16xf32> to vector<8x16xf32>
    %157 = vector.extract_strided_slice %136 {offsets = [0, 10, 0], sizes = [8, 1, 16], strides = [1, 1, 1]} : vector<8x16x16xf32> to vector<8x1x16xf32>
    %158 = vector.shape_cast %157 : vector<8x1x16xf32> to vector<8x16xf32>
    %159 = vector.extract_strided_slice %136 {offsets = [0, 11, 0], sizes = [8, 1, 16], strides = [1, 1, 1]} : vector<8x16x16xf32> to vector<8x1x16xf32>
    %160 = vector.shape_cast %159 : vector<8x1x16xf32> to vector<8x16xf32>
    %161 = vector.extract_strided_slice %136 {offsets = [0, 12, 0], sizes = [8, 1, 16], strides = [1, 1, 1]} : vector<8x16x16xf32> to vector<8x1x16xf32>
    %162 = vector.shape_cast %161 : vector<8x1x16xf32> to vector<8x16xf32>
    %163 = vector.extract_strided_slice %136 {offsets = [0, 13, 0], sizes = [8, 1, 16], strides = [1, 1, 1]} : vector<8x16x16xf32> to vector<8x1x16xf32>
    %164 = vector.shape_cast %163 : vector<8x1x16xf32> to vector<8x16xf32>
    %165 = vector.extract_strided_slice %136 {offsets = [0, 14, 0], sizes = [8, 1, 16], strides = [1, 1, 1]} : vector<8x16x16xf32> to vector<8x1x16xf32>
    %166 = vector.shape_cast %165 : vector<8x1x16xf32> to vector<8x16xf32>
    %167 = vector.extract_strided_slice %136 {offsets = [0, 15, 0], sizes = [8, 1, 16], strides = [1, 1, 1]} : vector<8x16x16xf32> to vector<8x1x16xf32>
    %168 = vector.shape_cast %167 : vector<8x1x16xf32> to vector<8x16xf32>
    %169 = tpu.concatenate %138, %140, %142, %144, %146, %148, %150, %152, %154, %156, %158, %160, %162, %164, %166, %168 in 1 : vector<8x16xf32>, vector<8x16xf32>, vector<8x16xf32>, vector<8x16xf32>, vector<8x16xf32>, vector<8x16xf32>, vector<8x16xf32>, vector<8x16xf32>, vector<8x16xf32>, vector<8x16xf32>, vector<8x16xf32>, vector<8x16xf32>, vector<8x16xf32>, vector<8x16xf32>, vector<8x16xf32>, vector<8x16xf32> -> vector<8x256xf32>
    "tpu.trace_start"() <{level = 10 : i32, message = "bnm,bmd->bnd"}> : () -> ()
    %cst_21 = arith.constant dense<0.000000e+00> : vector<8x16x8xf32>
    %170 = tpu.matmul %136, %125, %cst_21 {dimension_numbers = #tpu.dot_dimension_numbers<[2], [1], [1], [2], [0, 0, 0, 1, 1, 2], [0], [0]>} : vector<8x16x16xf32>, vector<8x16x8xf32>, vector<8x16x8xf32> -> vector<8x16x8xf32>
    "tpu.trace_stop"() : () -> ()
    %171 = vector.shape_cast %170 : vector<8x16x8xf32> to vector<128x8xf32>
    %172 = vector.extract_strided_slice %2 {offsets = [16, 0], sizes = [8, 32], strides = [1, 1]} : vector<32x32xf32> to vector<8x32xf32>
    %cst_22 = arith.constant dense<0.000000e+00> : vector<128x32xf32>
    %173 = tpu.matmul %171, %172, %cst_22 {dimension_numbers = #tpu.dot_dimension_numbers<[1], [0], [0], [1], [0, 0, 1, 1], [], []>} : vector<128x8xf32>, vector<8x32xf32>, vector<128x32xf32> -> vector<128x32xf32>
    %174 = arith.addf %119, %173 : vector<128x32xf32>
    %175 = vector.extract_strided_slice %8 {offsets = [0, 24], sizes = [128, 8], strides = [1, 1]} : vector<128x96xf32> to vector<128x8xf32>
    %176 = vector.shape_cast %175 : vector<128x8xf32> to vector<8x16x8xf32>
    %177 = vector.extract_strided_slice %8 {offsets = [0, 56], sizes = [128, 8], strides = [1, 1]} : vector<128x96xf32> to vector<128x8xf32>
    %178 = vector.shape_cast %177 : vector<128x8xf32> to vector<8x16x8xf32>
    %179 = vector.extract_strided_slice %8 {offsets = [0, 88], sizes = [128, 8], strides = [1, 1]} : vector<128x96xf32> to vector<128x8xf32>
    %180 = vector.shape_cast %179 : vector<128x8xf32> to vector<8x16x8xf32>
    "tpu.trace_start"() <{level = 10 : i32, message = "bnd,bmd->bnm"}> : () -> ()
    %cst_23 = arith.constant dense<0.000000e+00> : vector<8x16x16xf32>
    %181 = tpu.matmul %176, %178, %cst_23 {dimension_numbers = #tpu.dot_dimension_numbers<[2], [2], [1], [1], [0, 0, 0, 1, 1, 1], [0], [0]>} : vector<8x16x8xf32>, vector<8x16x8xf32>, vector<8x16x16xf32> -> vector<8x16x16xf32>
    "tpu.trace_stop"() : () -> ()
    %cst_24 = arith.constant dense<0xFF800000> : vector<8x16xf32>
    %182 = vector.multi_reduction <maximumf>, %181, %cst_24 [2] : vector<8x16x16xf32> to vector<8x16xf32>
    %183 = vector.shape_cast %182 : vector<8x16xf32> to vector<8x16x1xf32>
    %184 = vector.broadcast %183 : vector<8x16x1xf32> to vector<8x16x16xf32>
    %185 = arith.subf %181, %184 : vector<8x16x16xf32>
    %186 = math.exp %185 : vector<8x16x16xf32>
    %cst_25 = arith.constant dense<0.000000e+00> : vector<8x16xf32>
    %187 = vector.multi_reduction <add>, %186, %cst_25 [2] : vector<8x16x16xf32> to vector<8x16xf32>
    %188 = vector.shape_cast %187 : vector<8x16xf32> to vector<8x16x1xf32>
    %189 = tpu.reciprocal %188 {approx = true} : vector<8x16x1xf32> -> vector<8x16x1xf32>
    %190 = vector.broadcast %189 : vector<8x16x1xf32> to vector<8x16x16xf32>
    %191 = arith.mulf %186, %190 : vector<8x16x16xf32>
    %192 = vector.extract_strided_slice %191 {offsets = [0, 0, 0], sizes = [8, 1, 16], strides = [1, 1, 1]} : vector<8x16x16xf32> to vector<8x1x16xf32>
    %193 = vector.shape_cast %192 : vector<8x1x16xf32> to vector<8x16xf32>
    %194 = vector.extract_strided_slice %191 {offsets = [0, 1, 0], sizes = [8, 1, 16], strides = [1, 1, 1]} : vector<8x16x16xf32> to vector<8x1x16xf32>
    %195 = vector.shape_cast %194 : vector<8x1x16xf32> to vector<8x16xf32>
    %196 = vector.extract_strided_slice %191 {offsets = [0, 2, 0], sizes = [8, 1, 16], strides = [1, 1, 1]} : vector<8x16x16xf32> to vector<8x1x16xf32>
    %197 = vector.shape_cast %196 : vector<8x1x16xf32> to vector<8x16xf32>
    %198 = vector.extract_strided_slice %191 {offsets = [0, 3, 0], sizes = [8, 1, 16], strides = [1, 1, 1]} : vector<8x16x16xf32> to vector<8x1x16xf32>
    %199 = vector.shape_cast %198 : vector<8x1x16xf32> to vector<8x16xf32>
    %200 = vector.extract_strided_slice %191 {offsets = [0, 4, 0], sizes = [8, 1, 16], strides = [1, 1, 1]} : vector<8x16x16xf32> to vector<8x1x16xf32>
    %201 = vector.shape_cast %200 : vector<8x1x16xf32> to vector<8x16xf32>
    %202 = vector.extract_strided_slice %191 {offsets = [0, 5, 0], sizes = [8, 1, 16], strides = [1, 1, 1]} : vector<8x16x16xf32> to vector<8x1x16xf32>
    %203 = vector.shape_cast %202 : vector<8x1x16xf32> to vector<8x16xf32>
    %204 = vector.extract_strided_slice %191 {offsets = [0, 6, 0], sizes = [8, 1, 16], strides = [1, 1, 1]} : vector<8x16x16xf32> to vector<8x1x16xf32>
    %205 = vector.shape_cast %204 : vector<8x1x16xf32> to vector<8x16xf32>
    %206 = vector.extract_strided_slice %191 {offsets = [0, 7, 0], sizes = [8, 1, 16], strides = [1, 1, 1]} : vector<8x16x16xf32> to vector<8x1x16xf32>
    %207 = vector.shape_cast %206 : vector<8x1x16xf32> to vector<8x16xf32>
    %208 = vector.extract_strided_slice %191 {offsets = [0, 8, 0], sizes = [8, 1, 16], strides = [1, 1, 1]} : vector<8x16x16xf32> to vector<8x1x16xf32>
    %209 = vector.shape_cast %208 : vector<8x1x16xf32> to vector<8x16xf32>
    %210 = vector.extract_strided_slice %191 {offsets = [0, 9, 0], sizes = [8, 1, 16], strides = [1, 1, 1]} : vector<8x16x16xf32> to vector<8x1x16xf32>
    %211 = vector.shape_cast %210 : vector<8x1x16xf32> to vector<8x16xf32>
    %212 = vector.extract_strided_slice %191 {offsets = [0, 10, 0], sizes = [8, 1, 16], strides = [1, 1, 1]} : vector<8x16x16xf32> to vector<8x1x16xf32>
    %213 = vector.shape_cast %212 : vector<8x1x16xf32> to vector<8x16xf32>
    %214 = vector.extract_strided_slice %191 {offsets = [0, 11, 0], sizes = [8, 1, 16], strides = [1, 1, 1]} : vector<8x16x16xf32> to vector<8x1x16xf32>
    %215 = vector.shape_cast %214 : vector<8x1x16xf32> to vector<8x16xf32>
    %216 = vector.extract_strided_slice %191 {offsets = [0, 12, 0], sizes = [8, 1, 16], strides = [1, 1, 1]} : vector<8x16x16xf32> to vector<8x1x16xf32>
    %217 = vector.shape_cast %216 : vector<8x1x16xf32> to vector<8x16xf32>
    %218 = vector.extract_strided_slice %191 {offsets = [0, 13, 0], sizes = [8, 1, 16], strides = [1, 1, 1]} : vector<8x16x16xf32> to vector<8x1x16xf32>
    %219 = vector.shape_cast %218 : vector<8x1x16xf32> to vector<8x16xf32>
    %220 = vector.extract_strided_slice %191 {offsets = [0, 14, 0], sizes = [8, 1, 16], strides = [1, 1, 1]} : vector<8x16x16xf32> to vector<8x1x16xf32>
    %221 = vector.shape_cast %220 : vector<8x1x16xf32> to vector<8x16xf32>
    %222 = vector.extract_strided_slice %191 {offsets = [0, 15, 0], sizes = [8, 1, 16], strides = [1, 1, 1]} : vector<8x16x16xf32> to vector<8x1x16xf32>
    %223 = vector.shape_cast %222 : vector<8x1x16xf32> to vector<8x16xf32>
    %224 = tpu.concatenate %193, %195, %197, %199, %201, %203, %205, %207, %209, %211, %213, %215, %217, %219, %221, %223 in 1 : vector<8x16xf32>, vector<8x16xf32>, vector<8x16xf32>, vector<8x16xf32>, vector<8x16xf32>, vector<8x16xf32>, vector<8x16xf32>, vector<8x16xf32>, vector<8x16xf32>, vector<8x16xf32>, vector<8x16xf32>, vector<8x16xf32>, vector<8x16xf32>, vector<8x16xf32>, vector<8x16xf32>, vector<8x16xf32> -> vector<8x256xf32>
    "tpu.trace_start"() <{level = 10 : i32, message = "bnm,bmd->bnd"}> : () -> ()
    %cst_26 = arith.constant dense<0.000000e+00> : vector<8x16x8xf32>
    %225 = tpu.matmul %191, %180, %cst_26 {dimension_numbers = #tpu.dot_dimension_numbers<[2], [1], [1], [2], [0, 0, 0, 1, 1, 2], [0], [0]>} : vector<8x16x16xf32>, vector<8x16x8xf32>, vector<8x16x8xf32> -> vector<8x16x8xf32>
    "tpu.trace_stop"() : () -> ()
    %226 = vector.shape_cast %225 : vector<8x16x8xf32> to vector<128x8xf32>
    %227 = vector.extract_strided_slice %2 {offsets = [24, 0], sizes = [8, 32], strides = [1, 1]} : vector<32x32xf32> to vector<8x32xf32>
    %cst_27 = arith.constant dense<0.000000e+00> : vector<128x32xf32>
    %228 = tpu.matmul %226, %227, %cst_27 {dimension_numbers = #tpu.dot_dimension_numbers<[1], [0], [0], [1], [0, 0, 1, 1], [], []>} : vector<128x8xf32>, vector<8x32xf32>, vector<128x32xf32> -> vector<128x32xf32>
    %229 = arith.addf %174, %228 : vector<128x32xf32>
    %230 = tpu.concatenate %59, %114, %169, %224 in 1 : vector<8x256xf32>, vector<8x256xf32>, vector<8x256xf32>, vector<8x256xf32> -> vector<8x1024xf32>
    %c0_28 = arith.constant 0 : index
    %c0_29 = arith.constant 0 : index
    %231 = vector.load %arg7[%c0_28, %c0_29] : memref<8x1024xf32, #tpu.memory_space<vmem>>, vector<8x1024xf32>
    tpu.vector_store %arg7[%c0_28, %c0_29], %230 {strides = array<i32>} : memref<8x1024xf32, #tpu.memory_space<vmem>>, vector<8x1024xf32>,
    %c0_30 = arith.constant 0 : index
    %c0_31 = arith.constant 0 : index
    %232 = vector.load %arg5[%c0_30, %c0_31] : memref<1x32xf32, #tpu.memory_space<vmem>>, vector<1x32xf32>
    %233 = vector.shape_cast %232 : vector<1x32xf32> to vector<32xf32>
    %234 = vector.shape_cast %233 : vector<32xf32> to vector<1x32xf32>
    %235 = vector.broadcast %234 : vector<1x32xf32> to vector<128x32xf32>
    %236 = arith.addf %229, %235 : vector<128x32xf32>
    %237 = vector.shape_cast %236 : vector<128x32xf32> to vector<8x16x32xf32>
    %238 = vector.extract_strided_slice %237 {offsets = [0, 0, 0], sizes = [8, 1, 32], strides = [1, 1, 1]} : vector<8x16x32xf32> to vector<8x1x32xf32>
    %239 = vector.shape_cast %238 : vector<8x1x32xf32> to vector<8x32xf32>
    %240 = vector.extract_strided_slice %237 {offsets = [0, 1, 0], sizes = [8, 1, 32], strides = [1, 1, 1]} : vector<8x16x32xf32> to vector<8x1x32xf32>
    %241 = vector.shape_cast %240 : vector<8x1x32xf32> to vector<8x32xf32>
    %242 = vector.extract_strided_slice %237 {offsets = [0, 2, 0], sizes = [8, 1, 32], strides = [1, 1, 1]} : vector<8x16x32xf32> to vector<8x1x32xf32>
    %243 = vector.shape_cast %242 : vector<8x1x32xf32> to vector<8x32xf32>
    %244 = vector.extract_strided_slice %237 {offsets = [0, 3, 0], sizes = [8, 1, 32], strides = [1, 1, 1]} : vector<8x16x32xf32> to vector<8x1x32xf32>
    %245 = vector.shape_cast %244 : vector<8x1x32xf32> to vector<8x32xf32>
    %246 = vector.extract_strided_slice %237 {offsets = [0, 4, 0], sizes = [8, 1, 32], strides = [1, 1, 1]} : vector<8x16x32xf32> to vector<8x1x32xf32>
    %247 = vector.shape_cast %246 : vector<8x1x32xf32> to vector<8x32xf32>
    %248 = vector.extract_strided_slice %237 {offsets = [0, 5, 0], sizes = [8, 1, 32], strides = [1, 1, 1]} : vector<8x16x32xf32> to vector<8x1x32xf32>
    %249 = vector.shape_cast %248 : vector<8x1x32xf32> to vector<8x32xf32>
    %250 = vector.extract_strided_slice %237 {offsets = [0, 6, 0], sizes = [8, 1, 32], strides = [1, 1, 1]} : vector<8x16x32xf32> to vector<8x1x32xf32>
    %251 = vector.shape_cast %250 : vector<8x1x32xf32> to vector<8x32xf32>
    %252 = vector.extract_strided_slice %237 {offsets = [0, 7, 0], sizes = [8, 1, 32], strides = [1, 1, 1]} : vector<8x16x32xf32> to vector<8x1x32xf32>
    %253 = vector.shape_cast %252 : vector<8x1x32xf32> to vector<8x32xf32>
    %254 = vector.extract_strided_slice %237 {offsets = [0, 8, 0], sizes = [8, 1, 32], strides = [1, 1, 1]} : vector<8x16x32xf32> to vector<8x1x32xf32>
    %255 = vector.shape_cast %254 : vector<8x1x32xf32> to vector<8x32xf32>
    %256 = vector.extract_strided_slice %237 {offsets = [0, 9, 0], sizes = [8, 1, 32], strides = [1, 1, 1]} : vector<8x16x32xf32> to vector<8x1x32xf32>
    %257 = vector.shape_cast %256 : vector<8x1x32xf32> to vector<8x32xf32>
    %258 = vector.extract_strided_slice %237 {offsets = [0, 10, 0], sizes = [8, 1, 32], strides = [1, 1, 1]} : vector<8x16x32xf32> to vector<8x1x32xf32>
    %259 = vector.shape_cast %258 : vector<8x1x32xf32> to vector<8x32xf32>
    %260 = vector.extract_strided_slice %237 {offsets = [0, 11, 0], sizes = [8, 1, 32], strides = [1, 1, 1]} : vector<8x16x32xf32> to vector<8x1x32xf32>
    %261 = vector.shape_cast %260 : vector<8x1x32xf32> to vector<8x32xf32>
    %262 = vector.extract_strided_slice %237 {offsets = [0, 12, 0], sizes = [8, 1, 32], strides = [1, 1, 1]} : vector<8x16x32xf32> to vector<8x1x32xf32>
    %263 = vector.shape_cast %262 : vector<8x1x32xf32> to vector<8x32xf32>
    %264 = vector.extract_strided_slice %237 {offsets = [0, 13, 0], sizes = [8, 1, 32], strides = [1, 1, 1]} : vector<8x16x32xf32> to vector<8x1x32xf32>
    %265 = vector.shape_cast %264 : vector<8x1x32xf32> to vector<8x32xf32>
    %266 = vector.extract_strided_slice %237 {offsets = [0, 14, 0], sizes = [8, 1, 32], strides = [1, 1, 1]} : vector<8x16x32xf32> to vector<8x1x32xf32>
    %267 = vector.shape_cast %266 : vector<8x1x32xf32> to vector<8x32xf32>
    %268 = vector.extract_strided_slice %237 {offsets = [0, 15, 0], sizes = [8, 1, 32], strides = [1, 1, 1]} : vector<8x16x32xf32> to vector<8x1x32xf32>
    %269 = vector.shape_cast %268 : vector<8x1x32xf32> to vector<8x32xf32>
    %270 = tpu.concatenate %239, %241, %243, %245, %247, %249, %251, %253, %255, %257, %259, %261, %263, %265, %267, %269 in 1 : vector<8x32xf32>, vector<8x32xf32>, vector<8x32xf32>, vector<8x32xf32>, vector<8x32xf32>, vector<8x32xf32>, vector<8x32xf32>, vector<8x32xf32>, vector<8x32xf32>, vector<8x32xf32>, vector<8x32xf32>, vector<8x32xf32>, vector<8x32xf32>, vector<8x32xf32>, vector<8x32xf32>, vector<8x32xf32> -> vector<8x512xf32>
    %c0_32 = arith.constant 0 : index
    %c0_33 = arith.constant 0 : index
    %271 = vector.load %arg6[%c0_32, %c0_33] : memref<8x512xf32, #tpu.memory_space<vmem>>, vector<8x512xf32>
    tpu.vector_store %arg6[%c0_32, %c0_33], %270 {strides = array<i32>} : memref<8x512xf32, #tpu.memory_space<vmem>>, vector<8x512xf32>,
    return
  }
  func.func @transform_0(%arg0: i32) -> (i32, i32) {
    %c0_i32 = arith.constant 0 : i32
    %c0_i32_0 = arith.constant 0 : i32
    return %arg0, %c0_i32 : i32, i32
  }
  func.func @transform_1(%arg0: i32) -> (i32, i32) {
    %c0_i32 = arith.constant 0 : i32
    %c0_i32_0 = arith.constant 0 : i32
    %c0_i32_1 = arith.constant 0 : i32
    return %c0_i32, %c0_i32_0 : i32, i32
  }
  func.func @transform_2(%arg0: i32) -> (i32, i32) {
    %c0_i32 = arith.constant 0 : i32
    %c0_i32_0 = arith.constant 0 : i32
    %c0_i32_1 = arith.constant 0 : i32
    return %c0_i32, %c0_i32_0 : i32, i32
  }
  func.func @transform_3(%arg0: i32) -> (i32, i32) {
    %c0_i32 = arith.constant 0 : i32
    %c0_i32_0 = arith.constant 0 : i32
    %c0_i32_1 = arith.constant 0 : i32
    return %c0_i32, %c0_i32_0 : i32, i32
  }
  func.func @transform_4(%arg0: i32) -> (i32, i32) {
    %c0_i32 = arith.constant 0 : i32
    %c0_i32_0 = arith.constant 0 : i32
    %c0_i32_1 = arith.constant 0 : i32
    return %c0_i32, %c0_i32_0 : i32, i32
  }
  func.func @transform_5(%arg0: i32) -> (i32, i32) {
    %c0_i32 = arith.constant 0 : i32
    %c0_i32_0 = arith.constant 0 : i32
    return %arg0, %c0_i32 : i32, i32
  }
  func.func @transform_6(%arg0: i32) -> (i32, i32) {
    %c0_i32 = arith.constant 0 : i32
    %c0_i32_0 = arith.constant 0 : i32
    return %arg0, %c0_i32 : i32, i32
  }
}

</mosaic_0001>

<bundles_post_ra>
// kernel: window_attention.1
= control target key start
LH: loop header
LB: loop body
LE: loop exit
PB: predicated region body
PF: predicated region fallthrough
CT: control target
= control target key end

     0   :  { %12 = vsyncpa [#allocation3], 0  ;;  %s15428_s0 = inlined_call_operand.hbm [shape: f32[256,32], index: 0, kind: input, shape index: {}]   ;;  %s15429_s1 = inlined_call_operand.hbm [shape: f32[32,96], index: 1, kind: input, shape index: {}]   ;;  %s15430_s2 = inlined_call_operand.vmem [shape: f32[1,96], index: 2, kind: input, shape index: {}]   ;;  %s15431_s3 = inlined_call_operand.hbm [shape: f32[32,32], index: 3, kind: input, shape index: {}]   ;;  %s15432_s4 = inlined_call_operand.vmem [shape: f32[1,32], index: 4, kind: input, shape index: {}]   ;;  %s15433_s5 = inlined_call_operand.vmem [shape: f32[16,512], index: 5, kind: output, shape index: {0}]   ;;  %s15434_s6 = inlined_call_operand.vmem [shape: f32[16,1024], index: 6, kind: output, shape index: {1}]  }
   0x1   :  { %14 = vsyncpa [#allocation3 + $0x1], 0 }
   0x2   :  { %15 = vsyncpa [#allocation5], 0  ;;  %s11747_s21 = smov 0   ;;  %s11749_s22 = smov 0  }
   0x3   :  { %s11751_s23 = smov 0   ;;  %s11753_s24 = smov 0  }
   0x4 LB: > { %s11766_s25 = sadd.s32 4294967295, %s11692_s24   ;;  %p41_p0 = scmp.ne.s32.totalorder %s11684_s22, %s11680_s21  ;;  %s11692_s24 = sphi %s11753_s24, %s15684_s24   ;;  %s11688_s23 = sphi %s11751_s23, %s15683_s23   ;;  %s11684_s22 = sphi %s11749_s22, %s15682_s22   ;;  %s11680_s21 = sphi %s11747_s21, %s15681_s21  }
   0x5   : > { %p15435_p1 = scmp.eq.s32.totalorder %s11766_s25, 0  ;;  %p9317_p2 = scmp.ge.s32.totalorder %s11692_s24, 1 }
   0x6   : > { %p188_p3 = scmp.lt.s32.totalorder %s11692_s24, 3  ;;  %s11694_s28 = smov [#allocation4]  }
   0x7   : > { %p11774_p4 = por %p15435_p1, %p41_p0  ;;  %s200_s29 = sshll.u32 %s11694_s28, 4  ;;  %s201_s29 = int_to_ptr.vmem [resolvable:$true] %s200_s29 }
   0x8   : > { %p11778_p5 = pnand %p9317_p2, %p188_p3  ;;  %s11695_s7 = smov [#allocation6]  }
   0x9   : > { %s15488_s26 = scalar_select %p11774_p4, 1, 0 }
   0xa   : > { %s15489_s27 = scalar_select %p11778_p5, 1, 0 }
   0xb   : > { %p10927_p6 = pneg %p11778_p5  ;;  %s216_s8 = sshll.u32 %s11695_s7, 4  ;;  %s11790_s8 = int_to_ptr.vmem [resolvable:$true] %s216_s8 }
   0xc   : > { %s11568_s11 = scalar_lea.hbm %s15429_s1, 512 }
   0xd   : > { %p11786_p7 = pnand %p10927_p6, %p15435_p1  ;;  %p11569_p8 = scmp.ne.s32.totalorder %s15429_s1, %s11568_s11 }
   0xe   : > { %p11575_p12 = scmp.lt.u32.totalorder %s11568_s11, %s15429_s1 }
   0xf   : > { %p11570_p9 = pneg %p11786_p7 }
  0x11   : > { %p11571_p10 = pnand %p11570_p9, %p11569_p8 }
  0x13   : > { %p11572_p11 = pneg %p11571_p10 }
  0x15   : > { %p11577_p13 = pnand %p11575_p12, %p11572_p11 }
  0x17   : > { %11580 = shalt.err (!%p11577_p13)
}
  0x18   : > { %s11581_s16 = scalar_lea.vmem %s201_s29, 512  ;;  %p11589_p6 = scmp.lt.s32.totalorder %s201_s29, %s201_s29 }
  0x19   : > { %p11582_p0 = scmp.ne.s32.totalorder %s201_s29, %s11581_s16  ;;  %p11590_p1 = scmp.lt.s32.totalorder %s11581_s16, %s11581_s16 }
  0x1b   : > { %p11584_p2 = pnand %p11582_p0, %p11570_p9  ;;  %p11591_p4 = por %p11590_p1, %p11589_p6 }
  0x1d   : > { %p11585_p3 = pneg %p11584_p2 }
  0x1f   : > { %p11592_p5 = pnand %p11591_p4, %p11585_p3 }
  0x21   : > { %11595 = shalt.err (!%p11592_p5)
}
  0x22   : > { %s11696_s17 = smov 128   ;;  %s11697_s18 = smov 8  }
  0x23   : > { %10930 = dma.hbm_to_vmem [thread:$0]  (!%p11786_p7), %s15429_s1, 512, %s201_s29, [#allocation5], %s11696_s17, %s11696_s17, %s11697_s18  }
  0x24   : > { %s11596_s7 = scalar_lea.hbm %s15431_s3, 512 }
  0x25   : > { %p11597_p1 = scmp.ne.s32.totalorder %s15431_s3, %s11596_s7  ;;  %p11603_p8 = scmp.lt.u32.totalorder %s11596_s7, %s15431_s3 }
  0x27   : > { %p11599_p4 = pnand %p11597_p1, %p11570_p9 }
  0x29   : > { %p11600_p5 = pneg %p11599_p4 }
  0x2b   : > { %p11605_p10 = pnand %p11603_p8, %p11600_p5 }
  0x2d   : > { %11608 = shalt.err (!%p11605_p10)
}
  0x2e   : > { %s11609_s29 = scalar_lea.vmem %s11790_s8, 512  ;;  %p11617_p0 = scmp.lt.s32.totalorder %s11790_s8, %s11790_s8 }
  0x2f   : > { %p11610_p11 = scmp.ne.s32.totalorder %s11790_s8, %s11609_s29  ;;  %p11618_p2 = scmp.lt.s32.totalorder %s11609_s29, %s11609_s29 }
  0x31   : > { %p11612_p12 = pnand %p11610_p11, %p11570_p9  ;;  %p11619_p3 = por %p11618_p2, %p11617_p0 }
  0x33   : > { %p11613_p13 = pneg %p11612_p12 }
  0x35   : > { %p11620_p6 = pnand %p11619_p3, %p11613_p13 }
  0x37   : > { %11623 = shalt.err (!%p11620_p6)
}
  0x38   : > { %10933 = dma.hbm_to_vmem [thread:$0]  (!%p11786_p7), %s15431_s3, 512, %s11790_s8, [#allocation5], %s11696_s17, %s11696_s17, %s11697_s18  }
  0x39   : > { %s11846_s15 = sadd.s32 1, %s11692_s24   ;;  %s28_s30 = sadd.s32 1, %s11688_s23 }
  0x3a   : > { %s25_s16 = ssub.s32 %s11692_s24, %s11846_s15  ;;  %p35_p9 = scmp.ne.s32.totalorder %s11688_s23, %s11684_s22 }
  0x3b   : > { %p26_p1 = scmp.eq.s32.totalorder %s25_s16, 0  ;;  %p36_p4 = scmp.eq.s32.totalorder %s11692_s24, 0 }
  0x3c   : > { %p10940_p5 = scmp.lt.s32.totalorder %s11692_s24, 2  ;;  %s233_s19 = sand.u32 1, %s11688_s23  }
  0x3d   : > { %s11857_s20 = scalar_select %p26_p1, %s11688_s23, %s28_s30  }
  0x3e   : > { %p37_p8 = por %p36_p4, %p35_p9  ;;  %s9321_s21 = sshll.u32 %s233_s19, 7 }
  0x3f   : > { %s9608_s28 = sshll.u32 %s11692_s24, 11  ;;  %s237_s8 = scalar_lea.vmem [#allocation2], %s9321_s21 }
  0x40   : > { %s11863_s10 = scalar_lea.hbm %s15428_s0, %s9608_s28  ;;  %s244_s11 = sshll.u32 %s237_s8, 4  ;;  %s11869_s11 = int_to_ptr.vmem [resolvable:$true] %s244_s11 }
  0x41   : > { %p11865_p7 = pnand %p10940_p5, %p37_p8  ;;  %s11871_s24 = scalar_lea.sflag [#allocation3], %s233_s19 }
  0x42   : > { %s11624_s29 = scalar_lea.hbm %s11863_s10, 2048  ;;  %s11629_s30 = scalar_lea.hbm %s15428_s0, 4096 }
  0x43   : > { %p11625_p10 = scmp.ne.s32.totalorder %s11863_s10, %s11624_s29  ;;  %p11626_p11 = pneg %p11865_p7 }
  0x44   : > { %p11630_p0 = scmp.lt.u32.totalorder %s11863_s10, %s15428_s0  ;;  %p11631_p2 = scmp.lt.u32.totalorder %s11629_s30, %s11624_s29 }
  0x45   : > { %p11627_p12 = pnand %p11626_p11, %p11625_p10  ;;  %p11633_p6 = scmp.lt.u32.totalorder %s11624_s29, %s11863_s10 }
  0x46   : > { %p11632_p3 = por %p11631_p2, %p11630_p0 }
  0x47   : > { %p11628_p13 = pneg %p11627_p12 }
  0x48   : > { %p11634_p9 = por %p11633_p6, %p11632_p3 }
  0x4a   : > { %p11635_p1 = pnand %p11634_p9, %p11628_p13 }
  0x4c   : > { %11638 = shalt.err (!%p11635_p1)
}
  0x4d   : > { %s11639_s19 = scalar_lea.vmem %s11869_s11, 2048  ;;  %s11698_s28 = smov [#allocation2]  }
  0x4e   : > { %p11640_p4 = scmp.ne.s32.totalorder %s11869_s11, %s11639_s19  ;;  %s11644_s7 = sshll.u32 %s11698_s28, 4  ;;  %s11645_s7 = int_to_ptr.vmem [resolvable:$false] %s11644_s7 }
  0x4f   : > { %s11646_s9 = scalar_lea.vmem %s11645_s7, 4096  ;;  %p11647_p10 = scmp.lt.s32.totalorder %s11869_s11, %s11645_s7 }
  0x50   : > { %p11642_p5 = pnand %p11640_p4, %p11626_p11  ;;  %p11648_p12 = scmp.lt.s32.totalorder %s11646_s9, %s11639_s19 }
  0x52   : > { %p11643_p8 = pneg %p11642_p5  ;;  %p11649_p0 = por %p11648_p12, %p11647_p10 }
  0x54   : > { %p11650_p2 = pnand %p11649_p0, %p11643_p8 }
  0x56   : > { %11653 = shalt.err (!%p11650_p2)
}
  0x57   : > { %10937 = dma.hbm_to_vmem [thread:$0]  (!%p11865_p7), %s11863_s10, 2048, %s11869_s11, %s11871_s24, %s11696_s17, %s11696_s17, %s11697_s18  }
  0x58   : > { %p15492_p11 = scmp.ne.s32.totalorder %s15489_s27, 0 }
  0x5a   : > { %256 = sbr.rel (%p15492_p11) target bundleno = 3883 (0xf2b), region = 40 }
  0x61   : > { %s258_s8 = sand.u32 1, %s11684_s22   ;;  %p15493_p13 = scmp.ne.s32.totalorder %s15488_s26, 0 }
  0x62   : > { %s9325_s29 = sshll.u32 %s258_s8, 7  ;;  %s259_s13 = scalar_lea.sflag [#allocation3], %s258_s8 }
  0x63   : > { %s11905_s14 = scalar_lea.vmem [#allocation2], %s9325_s29 }
  0x64   : > { %11671 = dma.done.wait (%p15493_p13), %s259_s13, 2048  }
  0x65   : > { %11673 = vsyncadd (%p15493_p13), %s259_s13, 4294965248  ;;  %p15494_p3 = scmp.eq.s32.totalorder %s11766_s25, 0 }
  0x67   : > { %11675 = dma.done.wait (%p15494_p3), [#allocation5], 1024   ;;  %p15495_p7 = pmov %p15494_p3 }
  0x68   : > { %vm346_vm0 = vcmask 261120   ;;  %v331_v0 = vld [vmem:[#allocation4] sm:$0xff]  ;;  %v332_v1 = vld [vmem:[#allocation4 + $0x8] sm:$0xff]  ;;  %v333_v2 = vld [vmem:[#allocation4 + $0x10] sm:$0xff]  ;;  %vm546_vm1 = vcmask 64512   ;;  %s11699_s17 = smov 96  }
  0x69   : > { %11677 = vsyncadd (%p15495_p7), [#allocation5], 4294966272  ;;  %v10539_v3 = vpack.c.bf16 %v332_v1, %v331_v0  ;;  %v334_v4 = vld [vmem:[#allocation4 + $0x18] sm:$0xff]  ;;  %v315_v5 = vld [vmem:[%s11905_s14] sm:$0xff]  ;;  %s11700_s18 = smov 64   ;;  %vm1253_vm3 = vcmask 130048  }
  0x6a   : > { %v10543_v6 = vpack.c.bf16 %v334_v4, %v333_v2  ;;  %9963 = vmatprep.mubr.msk.f32.mxu0 %vm346_vm0, %v315_v5  ;;  %v316_v7 = vld [vmem:[%s11905_s14 + $0x8] sm:$0xff]  ;;  %v317_v8 = vld [vmem:[%s11905_s14 + $0x10] sm:$0xff]  ;;  %v318_v9 = vld [vmem:[%s11905_s14 + $0x18] sm:$0xff]  ;;  %s11701_s10 = smov 88   ;;  %s11702_s11 = smov 120   ;;  %vm1439_vm4 = vcmask 1041409  }
  0x6b   : > { %10540 = vmatprep.subr.bf16.mxu0 %v10539_v3  ;;  %v319_v10 = vld [vmem:[%s11905_s14 + $0x20] sm:$0xff]  ;;  %v320_v11 = vld [vmem:[%s11905_s14 + $0x28] sm:$0xff]  ;;  %v321_v12 = vld [vmem:[%s11905_s14 + $0x30] sm:$0xff]  ;;  %s11703_s12 = smov 56   ;;  %vm1442_vm5 = vcmask 1042434   ;;  %vm1445_vm6 = vcmask 1043459  }
  0x6c   : > { %10542 = vmatpush3.bf16.msra.mxu0 %v10539_v3  ;;  %v322_v13 = vld [vmem:[%s11905_s14 + $0x38] sm:$0xff]  ;;  %v323_v14 = vld [vmem:[%s11905_s14 + $0x40] sm:$0xff]  ;;  %v324_v15 = vld [vmem:[%s11905_s14 + $0x48] sm:$0xff]  ;;  %vm1448_vm7 = vcmask 1044484   ;;  %vm1451_vm8 = vcmask 1045509   ;;  %vm1454_vm9 = vcmask 1046534  }
  0x6d   : > { %10544 = vmatprep.subr.bf16.mxu0 %v10543_v6  ;;  %v325_v16 = vld [vmem:[%s11905_s14 + $0x50] sm:$0xff]  ;;  %v326_v17 = vld [vmem:[%s11905_s14 + $0x58] sm:$0xff]  ;;  %v327_v18 = vld [vmem:[%s11905_s14 + $0x60] sm:$0xff]  ;;  %vm1457_vm10 = vcmask 1047559   ;;  %s11704_s24 = smov 80   ;;  %s11705_s30 = smov 112  }
  0x6e   : > { %v328_v19 = vld [vmem:[%s11905_s14 + $0x68] sm:$0xff]  ;;  %v329_v20 = vld [vmem:[%s11905_s14 + $0x70] sm:$0xff]  ;;  %v330_v21 = vld [vmem:[%s11905_s14 + $0x78] sm:$0xff]  ;;  %s11706_s16 = smov 48   ;;  %s11707_s21 = smov 72   ;;  %vm1723_vm11 = vcmask 392192  }
  0x6f   : > { %v9332_v22 = vld [vmem:[%s15430_s2] ss:$0 sm:$0xff]  ;;  %vm12048_vm2 = vmpackc.low %vm546_vm1, %vm546_vm1  ;;  %s11708_s19 = smov 104   ;;  %s11709_s28 = smov 40   ;;  %vm1725_vm12 = vcmask 523264   ;;  %vm1727_vm13 = vcmask 654336  }
  0x70   : > { %10546 = vmatpush3.bf16.msra.mxu0 %v10543_v6  ;;  %s11710_s7 = smov 16   ;;  %s11711_s9 = smov 32   ;;  %vm1729_vm14 = vcmask 785408   ;;  %vm1731_vm15 = vcmask 916480  }
  0x71   : > { %p305_p6 = scmp.lt.s32.totalorder %s11766_s25, 1 }
  0x73   : > { %9964 = vmatmul.mubr.msk.f32.vlgmr.msra.gmra.mrb[0].mxu0 %vm346_vm0, %v316_v7  ;;  %s15686_s25 = smov (!%p305_p6, %s11766_s25), 1 }
  0x74   : > { %9966 = vmatprep.mubr.msk.f32.mxu0 %vm346_vm0, %v317_v8  ;;  %s9610_s8 = sshll.u32 %s15686_s25, 6 }
  0x75   : > { %s15031_s14 = scalar_lea.vmem %s15434_s6, %s9610_s8 }
  0x77   : > { %9967 = vmatmul.mubr.msk.f32.gmra.mrb[2].mxu0 %vm346_vm0, %v318_v9 }
  0x78   : > { %9969 = vmatprep.mubr.msk.f32.mxu0 %vm346_vm0, %v319_v10 }
  0x7b   : > { %9970 = vmatmul.mubr.msk.f32.gmra.mrb[4].mxu0 %vm346_vm0, %v320_v11 }
  0x7c   : > { %9972 = vmatprep.mubr.msk.f32.mxu0 %vm346_vm0, %v321_v12 }
  0x7f   : > { %9973 = vmatmul.mubr.msk.f32.gmra.mrb[6].mxu0 %vm346_vm0, %v322_v13 }
  0x80   : > { %9975 = vmatprep.mubr.msk.f32.mxu0 %vm346_vm0, %v323_v14 }
  0x83   : > { %9976 = vmatmul.mubr.msk.f32.gmra.mrb[8].mxu0 %vm346_vm0, %v324_v15 }
  0x84   : > { %9978 = vmatprep.mubr.msk.f32.mxu0 %vm346_vm0, %v325_v16 }
  0x87   : > { %9979 = vmatmul.mubr.msk.f32.gmra.mrb[10].mxu0 %vm346_vm0, %v326_v17 }
  0x88   : > { %9981 = vmatprep.mubr.msk.f32.mxu0 %vm346_vm0, %v327_v18 }
  0x8b   : > { %9982 = vmatmul.mubr.msk.f32.gmra.mrb[12].mxu0 %vm346_vm0, %v328_v19 }
  0x8c   : > { %9984 = vmatprep.mubr.msk.f32.mxu0 %vm346_vm0, %v329_v20 }
  0x8f   : > { %9985 = vmatmul.mubr.msk.f32.gmra.mrb[14].mxu0 %vm346_vm0, %v330_v21 }
 0x146   : > { %v9965_v23 = vpop.f32.mrb[0].mxu0 }
 0x147   : > { %v11950_v24 = vadd.f32 %v9965_v23, %v9332_v22  ;;  %v461_v25 = vpop.f32.mrb[1].mxu0 }
 0x148   : > { %v11952_v26 = vadd.f32 %v9332_v22, %v461_v25 }
 0x149   : > { %15496 = vst [vmem:[#allocation9_spill] sm:$0xff] %v11950_v24 }
 0x14a   : > { %15497 = vst [vmem:[#allocation10_spill] sm:$0xff] %v11952_v26  ;;  %v9968_v27 = vpop.f32.mrb[2].mxu0  ;;  %9991 = vmatprep.mubr.msk.f32.mxu1 %vm546_vm1, %v11952_v26  ;;  %v11958_v28 = vpack.i.bf16 %v11950_v24, %v11952_v26 }
 0x14b   : > { %v11960_v29 = vadd.f32 %v9968_v27, %v9332_v22  ;;  %v471_v30 = vpop.f32.mrb[3].mxu0 }
 0x14c   : > { %15498 = vst [vmem:[#allocation11_spill] sm:$0xff] %v11958_v28  ;;  %v11962_v31 = vadd.f32 %v9332_v22, %v471_v30  ;;  %10993 = vrot.lane.b32.xlu0 %v11958_v28, %s11699_s17 }
 0x14d   : > { %15499 = vst [vmem:[#allocation12_spill] sm:$0xff] %v11960_v29 }
 0x14e   : > { %15500 = vst [vmem:[#allocation13_spill] sm:$0xff] %v11962_v31  ;;  %v9971_v32 = vpop.f32.mrb[4].mxu0  ;;  %v11968_v33 = vpack.i.bf16 %v11960_v29, %v11962_v31 }
 0x14f   : > { %v11970_v34 = vadd.f32 %v9971_v32, %v9332_v22  ;;  %v481_v35 = vpop.f32.mrb[5].mxu0 }
 0x150   : > { %15501 = vst [vmem:[#allocation14_spill] sm:$0xff] %v11968_v33  ;;  %v11972_v36 = vadd.f32 %v9332_v22, %v481_v35  ;;  %10998 = vrot.lane.b32.xlu0 %v11968_v33, %s11699_s17 }
 0x151   : > { %15502 = vst [vmem:[#allocation15_spill] sm:$0xff] %v11970_v34 }
 0x152   : > { %15503 = vst [vmem:[#allocation16_spill] sm:$0xff] %v11972_v36  ;;  %v9974_v37 = vpop.f32.mrb[6].mxu0  ;;  %v11978_v38 = vpack.i.bf16 %v11970_v34, %v11972_v36 }
 0x153   : > { %v11980_v39 = vadd.f32 %v9974_v37, %v9332_v22  ;;  %v491_v40 = vpop.f32.mrb[7].mxu0 }
 0x154   : > { %v11982_v41 = vadd.f32 %v9332_v22, %v491_v40  ;;  %11003 = vrot.lane.b32.xlu1 %v11978_v38, %s11699_s17 }
 0x155   : > { %15504 = vst [vmem:[#allocation17_spill] sm:$0xff] %v11980_v39 }
 0x156   : > { %15505 = vst [vmem:[#allocation18_spill] sm:$0xff] %v11982_v41  ;;  %v9977_v42 = vpop.f32.mrb[8].mxu0  ;;  %v11988_v43 = vpack.i.bf16 %v11980_v39, %v11982_v41 }
 0x157   : > { %v11990_v44 = vadd.f32 %v9977_v42, %v9332_v22  ;;  %v501_v45 = vpop.f32.mrb[9].mxu0 }
 0x158   : > { %15506 = vst [vmem:[#allocation19_spill] sm:$0xff] %v11988_v43  ;;  %v11992_v46 = vadd.f32 %v9332_v22, %v501_v45  ;;  %11008 = vrot.lane.b32.xlu1 %v11988_v43, %s11699_s17 }
 0x159   : > { %15507 = vst [vmem:[#allocation20_spill] sm:$0xff] %v11990_v44 }
 0x15a   : > { %15508 = vst [vmem:[#allocation21_spill] sm:$0xff] %v11992_v46  ;;  %10019 = vmatprep.mubr.msk.f32.mxu0 %vm546_vm1, %v11992_v46  ;;  %v9980_v47 = vpop.f32.mrb[10].mxu0  ;;  %v12000_v48 = vpack.i.bf16 %v11990_v44, %v11992_v46 }
 0x15b   : > { %v12002_v49 = vadd.f32 %v9980_v47, %v9332_v22  ;;  %v511_v50 = vpop.f32.mrb[11].mxu0 }
 0x15c   : > { %15509 = vst [vmem:[#allocation22_spill] sm:$0xff] %v12000_v48  ;;  %11013 = vrot.lane.b32.xlu0 %v12000_v48, %s11699_s17  ;;  %v12006_v51 = vadd.f32 %v9332_v22, %v511_v50 }
 0x15d   : > { %15510 = vst [vmem:[#allocation23_spill] sm:$0xff] %v12002_v49 }
 0x15e   : > { %15511 = vst [vmem:[#allocation24_spill] sm:$0xff] %v12006_v51  ;;  %v9983_v52 = vpop.f32.mrb[12].mxu0  ;;  %v12010_v53 = vpack.i.bf16 %v12002_v49, %v12006_v51 }
 0x15f   : > { %v12012_v54 = vadd.f32 %v9983_v52, %v9332_v22  ;;  %v521_v55 = vpop.f32.mrb[13].mxu0 }
 0x160   : > { %15512 = vst [vmem:[#allocation25_spill] sm:$0xff] %v12010_v53  ;;  %v12014_v56 = vadd.f32 %v9332_v22, %v521_v55  ;;  %11018 = vrot.lane.b32.xlu1 %v12010_v53, %s11699_s17 }
 0x161   : > { %15513 = vst [vmem:[#allocation26_spill] sm:$0xff] %v12012_v54 }
 0x162   : > { %15514 = vst [vmem:[#allocation27_spill] sm:$0xff] %v12014_v56  ;;  %v9986_v57 = vpop.f32.mrb[14].mxu0  ;;  %v12020_v58 = vpack.i.bf16 %v12012_v54, %v12014_v56 }
 0x163   : > { %v12022_v59 = vadd.f32 %v9986_v57, %v9332_v22  ;;  %v531_v60 = vpop.f32.mrb[15].mxu0 }
 0x164   : > { %15515 = vst [vmem:[#allocation28_spill] sm:$0xff] %v12020_v58  ;;  %v12024_v61 = vadd.f32 %v9332_v22, %v531_v60  ;;  %11023 = vrot.lane.b32.xlu0 %v12020_v58, %s11699_s17 }
 0x165   : > { %15516 = vst [vmem:[#allocation29_spill] sm:$0xff] %v12022_v59 }
 0x166   : > { %15517 = vst [vmem:[#allocation30_spill] sm:$0xff] %v12024_v61  ;;  %v12030_v62 = vpack.i.bf16 %v12022_v59, %v12024_v61 }
 0x168   : > { %15518 = vst [vmem:[#allocation31_spill] sm:$0xff] %v12030_v62  ;;  %11028 = vrot.lane.b32.xlu1 %v12030_v62, %s11699_s17  ;;  %11033 = vrot.lane.b32.xlu0 %v11958_v28, %s11700_s18 }
 0x16c   : > { %11038 = vrot.lane.b32.xlu1 %v11968_v33, %s11700_s18  ;;  %11043 = vrot.lane.b32.xlu0 %v11978_v38, %s11700_s18 }
 0x170   : > { %11048 = vrot.lane.b32.xlu1 %v11988_v43, %s11700_s18  ;;  %11053 = vrot.lane.b32.xlu0 %v12000_v48, %s11700_s18 }
 0x174   : > { %11058 = vrot.lane.b32.xlu1 %v12010_v53, %s11700_s18 }
 0x1be   : > { %v10994_v63 = vpop.permute.xlu0 %10993 }
 0x1bf   : > { %v10996_v0 = vunpack.i.h.bf16 %v10994_v63  ;;  %v10995_v1 = vunpack.i.l.bf16 %v10994_v63 }
 0x1c1   : > { %v10547_v3 = vpack.c.bf16 %v10996_v0, %v10995_v1 }
 0x1c2   : > { %v10999_v4 = vpop.permute.xlu0 %10998 }
 0x1c3   : > { %v11001_v5 = vunpack.i.h.bf16 %v10999_v4  ;;  %v11000_v6 = vunpack.i.l.bf16 %v10999_v4  ;;  %10549 = vmatprep.subr.msk.bf16.mxu1 %vm12048_vm2, %v10547_v3 }
 0x1c4   : > { %10552 = vmatpush3.bf16.xpose.msk.msra.mxu1 %vm12048_vm2, %v10547_v3 }
 0x1c5   : > { %v10553_v7 = vpack.c.bf16 %v11001_v5, %v11000_v6 }
 0x1c6   : > { %v11004_v8 = vpop.permute.xlu1 %11003 }
 0x1c7   : > { %v11006_v9 = vunpack.i.h.bf16 %v11004_v8  ;;  %v11005_v10 = vunpack.i.l.bf16 %v11004_v8  ;;  %10555 = vmatprep.subr.msk.bf16.mxu1 %vm12048_vm2, %v10553_v7 }
 0x1c9   : > { %v10559_v11 = vpack.c.bf16 %v11006_v9, %v11005_v10 }
 0x1ca   : > { %v11009_v12 = vpop.permute.xlu1 %11008 }
 0x1cb   : > { %9992 = vmatmul.mubr.msk.f32.vlgmr.msra.gmra.mrb[0].mxu1 %vm546_vm1, %v11950_v24  ;;  %v11011_v13 = vunpack.i.h.bf16 %v11009_v12  ;;  %v11010_v14 = vunpack.i.l.bf16 %v11009_v12 }
 0x1cc   : > { %10558 = vmatpush3.bf16.xpose.msk.msra.mxu1 %vm12048_vm2, %v10553_v7  ;;  %9998 = vmatprep.mubr.msk.f32.mxu1 %vm546_vm1, %v11962_v31 }
 0x1cd   : > { %10561 = vmatprep.subr.msk.bf16.mxu1 %vm12048_vm2, %v10559_v11  ;;  %v10565_v18 = vpack.c.bf16 %v11011_v13, %v11010_v14 }
 0x1ce   : > { %v11014_v15 = vpop.permute.xlu0 %11013 }
 0x1cf   : > { %v11016_v16 = vunpack.i.h.bf16 %v11014_v15  ;;  %v11015_v17 = vunpack.i.l.bf16 %v11014_v15 }
 0x1d1   : > { %v10571_v19 = vpack.c.bf16 %v11016_v16, %v11015_v17 }
 0x1d2   : > { %v11019_v20 = vpop.permute.xlu1 %11018 }
 0x1d3   : > { %9999 = vmatmul.mubr.msk.f32.vlgmr.msra.gmra.mrb[2].mxu1 %vm546_vm1, %v11960_v29  ;;  %10573 = vmatprep.subr.msk.bf16.mxu0 %vm12048_vm2, %v10571_v19  ;;  %v11021_v21 = vunpack.i.h.bf16 %v11019_v20  ;;  %v11020_v22 = vunpack.i.l.bf16 %v11019_v20 }
 0x1d4   : > { %10564 = vmatpush3.bf16.xpose.msk.msra.mxu1 %vm12048_vm2, %v10559_v11  ;;  %10005 = vmatprep.mubr.msk.f32.mxu1 %vm546_vm1, %v11972_v36 }
 0x1d5   : > { %10576 = vmatpush3.bf16.xpose.msk.msra.mxu0 %vm12048_vm2, %v10571_v19  ;;  %10567 = vmatprep.subr.msk.bf16.mxu1 %vm12048_vm2, %v10565_v18  ;;  %v10577_v32 = vpack.c.bf16 %v11021_v21, %v11020_v22 }
 0x1d6   : > { %v11024_v23 = vpop.permute.xlu0 %11023 }
 0x1d7   : > { %v11026_v25 = vunpack.i.h.bf16 %v11024_v23  ;;  %v11025_v27 = vunpack.i.l.bf16 %v11024_v23 }
 0x1d9   : > { %v10583_v30 = vpack.c.bf16 %v11026_v25, %v11025_v27 }
 0x1da   : > { %v11034_v35 = vpop.permute.xlu0 %11033  ;;  %v11029_v42 = vpop.permute.xlu1 %11028 }
 0x1db   : > { %v11036_v37 = vunpack.i.h.bf16 %v11034_v35  ;;  %v11035_v40 = vunpack.i.l.bf16 %v11034_v35  ;;  %10006 = vmatmul.mubr.msk.f32.vlgmr.msra.gmra.mrb[4].mxu1 %vm546_vm1, %v11970_v34  ;;  %10585 = vmatprep.subr.msk.bf16.mxu0 %vm12048_vm2, %v10583_v30  ;;  %v11031_v47 = vunpack.i.h.bf16 %v11029_v42  ;;  %v11030_v50 = vunpack.i.l.bf16 %v11029_v42 }
 0x1dc   : > { %10020 = vmatmul.mubr.msk.f32.vlgmr.msra.gmra.mrb[16].mxu0 %vm546_vm1, %v11990_v44  ;;  %10570 = vmatpush3.bf16.xpose.msk.msra.mxu1 %vm12048_vm2, %v10565_v18 }
 0x1dd   : > { %10012 = vmatprep.mubr.msk.f32.mxu1 %vm546_vm1, %v11982_v41  ;;  %10588 = vmatpush3.bf16.xpose.msk.msra.mxu0 %vm12048_vm2, %v10583_v30  ;;  %v10595_v45 = vpack.c.bf16 %v11036_v37, %v11035_v40  ;;  %v10589_v60 = vpack.c.bf16 %v11031_v47, %v11030_v50 }
 0x1de   : > { %10033 = vmatprep.mubr.msk.f32.mxu0 %vm546_vm1, %v12014_v56  ;;  %v11044_v52 = vpop.permute.xlu0 %11043  ;;  %10579 = vmatprep.subr.msk.bf16.mxu1 %vm12048_vm2, %v10577_v32  ;;  %v11039_v63 = vpop.permute.xlu1 %11038 }
 0x1df   : > { %10596 = vmatprep.subr.bf16.mxu0 %v10595_v45  ;;  %v11046_v55 = vunpack.i.h.bf16 %v11044_v52  ;;  %v11045_v57 = vunpack.i.l.bf16 %v11044_v52  ;;  %v11041_v1 = vunpack.i.h.bf16 %v11039_v63  ;;  %v11040_v3 = vunpack.i.l.bf16 %v11039_v63 }
 0x1e1   : > { %v12100_v0 = vpack.c.bf16 %v11046_v55, %v11045_v57  ;;  %v10599_v4 = vpack.c.bf16 %v11041_v1, %v11040_v3 }
 0x1e2   : > { %v11049_v5 = vpop.permute.xlu1 %11048  ;;  %v12188_v3 = vpop.permute.xlu0 %11053 }
 0x1e3   : > { %10013 = vmatmul.mubr.msk.f32.vlgmr.msra.gmra.mrb[6].mxu1 %vm546_vm1, %v11980_v39  ;;  %v11051_v6 = vunpack.i.h.bf16 %v11049_v5  ;;  %v11050_v7 = vunpack.i.l.bf16 %v11049_v5 }
 0x1e4   : > { %10034 = vmatmul.mubr.msk.f32.vlgmr.msra.gmra.mrb[18].mxu0 %vm546_vm1, %v12012_v54  ;;  %10582 = vmatpush3.bf16.xpose.msk.msra.mxu1 %vm12048_vm2, %v10577_v32 }
 0x1e5   : > { %10026 = vmatprep.mubr.msk.f32.mxu1 %vm546_vm1, %v12006_v51  ;;  %10598 = vmatpush3.bf16.msra.mxu0 %v10595_v45  ;;  %v12115_v8 = vpack.c.bf16 %v11051_v6, %v11050_v7 }
 0x1e6   : > { %10604 = vmatprep.subr.bf16.mxu0 %v12100_v0  ;;  %10591 = vmatprep.subr.msk.bf16.mxu1 %vm12048_vm2, %v10589_v60  ;;  %v12186_v1 = vpop.permute.xlu1 %11058 }
 0x1eb   : > { %10027 = vmatmul.mubr.msk.f32.vlgmr.msra.gmra.mrb[8].mxu1 %vm546_vm1, %v12002_v49 }
 0x1ec   : > { %10594 = vmatpush3.bf16.xpose.msk.msra.mxu1 %vm12048_vm2, %v10589_v60  ;;  %10040 = vmatprep.mubr.msk.f32.mxu1 %vm546_vm1, %v12024_v61 }
 0x1ed   : > { %10600 = vmatprep.subr.bf16.mxu1 %v10599_v4 }
 0x1f3   : > { %10041 = vmatmul.mubr.msk.f32.vlgmr.msra.gmra.mrb[10].mxu1 %vm546_vm1, %v12022_v59 }
 0x1f4   : > { %10602 = vmatpush3.bf16.msra.mxu1 %v10599_v4 }
 0x1f5   : > { %10608 = vmatprep.subr.bf16.mxu1 %v12115_v8 }
 0x29e   : > { %v9993_v9 = vpop.f32.mrb[0].mxu1 }
 0x29f   : > { %v621_v10 = vpop.f32.mrb[1].mxu1  ;;  %v1257_v11 = vsel %vm1253_vm3, %v9993_v9, -inf }
 0x2a0   : > { %1258 = vmax.xlane.f32.xlu1 %v1257_v11  ;;  %v1254_v12 = vsel %vm1253_vm3, %v621_v10, -inf }
 0x2a1   : > { %1255 = vmax.xlane.f32.xlu0 %v1254_v12 }
 0x2a6   : > { %v12120_v13 = vpop.f32.mrb[2].mxu1 }
 0x2a7   : > { %v12122_v14 = vpop.f32.mrb[3].mxu1  ;;  %v1263_v15 = vsel %vm1253_vm3, %v12120_v13, -inf }
 0x2a8   : > { %1264 = vmax.xlane.f32.xlu1 %v1263_v15  ;;  %v1260_v16 = vsel %vm1253_vm3, %v12122_v14, -inf }
 0x2a9   : > { %1261 = vmax.xlane.f32.xlu0 %v1260_v16 }
 0x2ae   : > { %v12128_v17 = vpop.f32.mrb[4].mxu1 }
 0x2af   : > { %v12130_v18 = vpop.f32.mrb[16].mxu0  ;;  %v12132_v19 = vpop.f32.mrb[5].mxu1  ;;  %v1269_v20 = vsel %vm1253_vm3, %v12128_v17, -inf }
 0x2b0   : > { %v12136_v21 = vpop.f32.mrb[17].mxu0  ;;  %1270 = vmax.xlane.f32.xlu0 %v1269_v20  ;;  %v1281_v22 = vsel %vm1253_vm3, %v12130_v18, -inf  ;;  %v1266_v30 = vsel %vm1253_vm3, %v12132_v19, -inf }
 0x2b1   : > { %v1278_v37 = vsel %vm1253_vm3, %v12136_v21, -inf }
 0x2b4   : > { %1282 = vmax.xlane.f32.xlu0 %v1281_v22 }
 0x2b6   : > { %v12140_v23 = vpop.f32.mrb[6].mxu1 }
 0x2b7   : > { %v12142_v25 = vpop.f32.mrb[18].mxu0  ;;  %v12144_v27 = vpop.f32.mrb[7].mxu1  ;;  %v1275_v32 = vsel %vm1253_vm3, %v12140_v23, -inf }
 0x2b8   : > { %v12150_v35 = vpop.f32.mrb[19].mxu0  ;;  %1267 = vmax.xlane.f32.xlu0 %v1266_v30  ;;  %1276 = vmax.xlane.f32.xlu1 %v1275_v32  ;;  %v1272_v40 = vsel %vm1253_vm3, %v12144_v27, -inf  ;;  %v1293_v47 = vsel %vm1253_vm3, %v12142_v25, -inf }
 0x2b9   : > { %v1290_v50 = vsel %vm1253_vm3, %v12150_v35, -inf }
 0x2bc   : > { %1279 = vmax.xlane.f32.xlu0 %v1278_v37  ;;  %1273 = vmax.xlane.f32.xlu1 %v1272_v40 }
 0x2be   : > { %v12156_v42 = vpop.f32.mrb[8].mxu1 }
 0x2bf   : > { %v12158_v45 = vpop.f32.mrb[9].mxu1  ;;  %v1287_v52 = vsel %vm1253_vm3, %v12156_v42, -inf }
 0x2c0   : > { %1294 = vmax.xlane.f32.xlu0 %v1293_v47  ;;  %1291 = vmax.xlane.f32.xlu1 %v1290_v50  ;;  %v1284_v60 = vsel %vm1253_vm3, %v12158_v45, -inf }
 0x2c4   : > { %1288 = vmax.xlane.f32.xlu0 %v1287_v52 }
 0x2c6   : > { %v12166_v55 = vpop.f32.mrb[10].mxu1 }
 0x2c7   : > { %v12168_v57 = vpop.f32.mrb[11].mxu1  ;;  %v1299_v63 = vsel %vm1253_vm3, %v12166_v55, -inf }
 0x2c8   : > { %v1296_v5 = vsel %vm1253_vm3, %v12168_v57, -inf }
 0x2d1   : > { %11068 = vrot.lane.b32.xlu1 %v12030_v62, %s11700_s18 }
 0x2da   : > { %11063 = vrot.lane.b32.xlu0 %v12020_v58, %s11700_s18 }
 0x2f5   : > { %1285 = vmax.xlane.f32.xlu1 %v1284_v60 }
 0x2f9   : > { %1300 = vmax.xlane.f32.xlu0 %v1299_v63 }
 0x306   : > { %11078 = vrot.lane.b32.xlu1 %v11968_v33, %s11701_s10 }
 0x30a   : > { %2420 = vrot.lane.b32.xlu1 %v11952_v26, %s11702_s11 }
 0x30f   : > { %11073 = vrot.lane.b32.xlu0 %v11958_v28, %s11701_s10 }
 0x313   : > { %11083 = vrot.lane.b32.xlu0 %v11978_v38, %s11701_s10 }
 0x32d   : > { %v1259_v4 = vpop.xlane.xlu1 %1258 }
 0x32e   : > { %v1303_v6 = vsub.f32 %v9993_v9, %v1259_v4  ;;  %v1256_v7 = vpop.xlane.xlu0 %1255  ;;  %1297 = vmax.xlane.f32.xlu1 %v1296_v5 }
 0x32f   : > { %v1302_v11 = vsub.f32 %v621_v10, %v1256_v7 }
 0x330   : > { %v1320_v12 = vmul.f32 1.442695, %v1303_v6 }
 0x331   : > { %v1318_v15 = vmul.f32 1.442695, %v1302_v11 }
 0x332   : > { %11312 = vpow2.f32 %v1320_v12 }
 0x333   : > { %11314 = vpow2.f32 %v1318_v15 }
 0x335   : > { %v1265_v16 = vpop.xlane.xlu1 %1264 }
 0x336   : > { %v1305_v20 = vsub.f32 %v12120_v13, %v1265_v16  ;;  %v1262_v22 = vpop.xlane.xlu0 %1261 }
 0x337   : > { %v1304_v30 = vsub.f32 %v12122_v14, %v1262_v22 }
 0x338   : > { %v1324_v32 = vmul.f32 1.442695, %v1305_v20 }
 0x339   : > { %v1322_v37 = vmul.f32 1.442695, %v1304_v30 }
 0x33a   : > { %11316 = vpow2.f32 %v1324_v32 }
 0x33b   : > { %11318 = vpow2.f32 %v1322_v37 }
 0x33c   : > { %v12194_v40 = vpop.eup %11312 }
 0x33d   : > { %v12196_v9 = vpop.eup %11314  ;;  %v1271_v47 = vpop.xlane.xlu0 %1270  ;;  %v1353_v10 = vsel %vm1253_vm3, %v12194_v40, 0.0 }
 0x33e   : > { %v1307_v50 = vsub.f32 %v12128_v17, %v1271_v47  ;;  %1354 = vadd.xlane.f32.xlu0 %v1353_v10  ;;  %v1350_v13 = vsel %vm1253_vm3, %v12196_v9, 0.0 }
 0x33f   : > { %1351 = vadd.xlane.f32.xlu1 %v1350_v13 }
 0x340   : > { %v1328_v14 = vmul.f32 1.442695, %v1307_v50 }
 0x341   : > { %v1283_v52 = vpop.xlane.xlu0 %1282 }
 0x342   : > { %11320 = vpow2.f32 %v1328_v14  ;;  %v1311_v60 = vsub.f32 %v12130_v18, %v1283_v52 }
 0x344   : > { %v12204_v63 = vpop.eup %11316  ;;  %v1336_v4 = vmul.f32 1.442695, %v1311_v60 }
 0x345   : > { %v1268_v5 = vpop.xlane.xlu0 %1267  ;;  %v1277_v6 = vpop.xlane.xlu1 %1276  ;;  %v1359_v7 = vsel %vm1253_vm3, %v12204_v63, 0.0 }
 0x346   : > { %v12208_v11 = vpop.eup %11318  ;;  %11322 = vpow2.f32 %v1336_v4  ;;  %v1306_v17 = vsub.f32 %v12132_v19, %v1268_v5  ;;  %v1309_v12 = vsub.f32 %v12140_v23, %v1277_v6  ;;  %1360 = vadd.xlane.f32.xlu1 %v1359_v7 }
 0x347   : > { %v1356_v22 = vsel %vm1253_vm3, %v12208_v11, 0.0 }
 0x348   : > { %v1326_v15 = vmul.f32 1.442695, %v1306_v17  ;;  %v1332_v16 = vmul.f32 1.442695, %v1309_v12 }
 0x349   : > { %v1280_v20 = vpop.xlane.xlu0 %1279  ;;  %v1274_v18 = vpop.xlane.xlu1 %1273 }
 0x34a   : > { %11324 = vpow2.f32 %v1326_v15  ;;  %v1310_v30 = vsub.f32 %v12136_v21, %v1280_v20  ;;  %v1308_v32 = vsub.f32 %v12144_v27, %v1274_v18  ;;  %1357 = vadd.xlane.f32.xlu1 %v1356_v22 }
 0x34b   : > { %11326 = vpow2.f32 %v1332_v16 }
 0x34c   : > { %v12216_v37 = vpop.eup %11320  ;;  %v1334_v19 = vmul.f32 1.442695, %v1310_v30  ;;  %v1330_v47 = vmul.f32 1.442695, %v1308_v32 }
 0x34d   : > { %v1295_v23 = vpop.xlane.xlu0 %1294  ;;  %v1292_v10 = vpop.xlane.xlu1 %1291  ;;  %v1365_v50 = vsel %vm1253_vm3, %v12216_v37, 0.0 }
 0x34e   : > { %11328 = vpow2.f32 %v1334_v19  ;;  %v1315_v13 = vsub.f32 %v12142_v25, %v1295_v23  ;;  %v1314_v14 = vsub.f32 %v12150_v35, %v1292_v10  ;;  %1366 = vadd.xlane.f32.xlu0 %v1365_v50 }
 0x34f   : > { %11330 = vpow2.f32 %v1330_v47 }
 0x350   : > { %v12222_v21 = vpop.eup %11322  ;;  %v1344_v27 = vmul.f32 1.442695, %v1315_v13  ;;  %v1342_v52 = vmul.f32 1.442695, %v1314_v14 }
 0x351   : > { %v1289_v60 = vpop.xlane.xlu0 %1288  ;;  %v1377_v4 = vsel %vm1253_vm3, %v12222_v21, 0.0  ;;  %v12265_v47 = vpop.permute.xlu1 %11068 }
 0x352   : > { %11332 = vpow2.f32 %v1344_v27  ;;  %v1313_v5 = vsub.f32 %v12156_v42, %v1289_v60  ;;  %1378 = vadd.xlane.f32.xlu0 %v1377_v4 }
 0x353   : > { %11334 = vpow2.f32 %v1342_v52 }
 0x354   : > { %v12227_v6 = vpop.eup %11324  ;;  %v1340_v25 = vmul.f32 1.442695, %v1313_v5 }
 0x355   : > { %v12229_v7 = vpop.eup %11326  ;;  %v1362_v35 = vsel %vm1253_vm3, %v12227_v6, 0.0  ;;  %v12269_v23 = vpop.permute.xlu0 %11063 }
 0x356   : > { %11336 = vpow2.f32 %v1340_v25  ;;  %1363 = vadd.xlane.f32.xlu0 %v1362_v35  ;;  %v1371_v17 = vsel %vm1253_vm3, %v12229_v7, 0.0 }
 0x357   : > { %1372 = vadd.xlane.f32.xlu1 %v1371_v17 }
 0x358   : > { %v12235_v12 = vpop.eup %11328 }
 0x359   : > { %v12237_v15 = vpop.eup %11330  ;;  %v1374_v42 = vsel %vm1253_vm3, %v12235_v12, 0.0 }
 0x35a   : > { %1375 = vadd.xlane.f32.xlu0 %v1374_v42  ;;  %v1368_v16 = vsel %vm1253_vm3, %v12237_v15, 0.0 }
 0x35b   : > { %1369 = vadd.xlane.f32.xlu1 %v1368_v16 }
 0x35c   : > { %v12243_v20 = vpop.eup %11332 }
 0x35d   : > { %v12245_v18 = vpop.eup %11334  ;;  %v1389_v22 = vsel %vm1253_vm3, %v12243_v20, 0.0 }
 0x35e   : > { %1390 = vadd.xlane.f32.xlu0 %v1389_v22  ;;  %v1386_v30 = vsel %vm1253_vm3, %v12245_v18, 0.0 }
 0x35f   : > { %1387 = vadd.xlane.f32.xlu1 %v1386_v30 }
 0x360   : > { %v12251_v32 = vpop.eup %11336 }
 0x361   : > { %v1383_v19 = vsel %vm1253_vm3, %v12251_v32, 0.0 }
 0x362   : > { %1384 = vadd.xlane.f32.xlu0 %v1383_v19 }
 0x370   : > { %11088 = vrot.lane.b32.xlu1 %v11988_v43, %s11701_s10 }
 0x374   : > { %2513 = vrot.lane.b32.xlu1 %v11960_v29, %s11702_s11 }
 0x378   : > { %2602 = vrot.lane.b32.xlu1 %v11972_v36, %s11702_s11  ;;  %2422 = vrot.lane.b32.xlu0 %v11950_v24, %s11702_s11 }
 0x37c   : > { %2511 = vrot.lane.b32.xlu0 %v11962_v31, %s11702_s11 }
 0x380   : > { %11093 = vrot.lane.b32.xlu0 %v12000_v48, %s11701_s10 }
 0x382   : > { %v1286_v10 = vpop.xlane.xlu1 %1285 }
 0x383   : > { %v1312_v50 = vsub.f32 %v12158_v45, %v1286_v10 }
 0x384   : > { %2604 = vrot.lane.b32.xlu0 %v11970_v34, %s11702_s11 }
 0x385   : > { %v1338_v14 = vmul.f32 1.442695, %v1312_v50 }
 0x386   : > { %v1301_v13 = vpop.xlane.xlu0 %1300  ;;  %v12297_v5 = vpop.permute.xlu1 %11078 }
 0x387   : > { %v1317_v27 = vsub.f32 %v12166_v55, %v1301_v13  ;;  %11338 = vpow2.f32 %v1338_v14 }
 0x388   : > { %2693 = vrot.lane.b32.xlu0 %v11982_v41, %s11702_s11 }
 0x389   : > { %v1348_v52 = vmul.f32 1.442695, %v1317_v27  ;;  %v11055_v27 = vunpack.i.l.bf16 %v12188_v3 }
 0x38a   : > { %v12299_v25 = vpop.permute.xlu1 %2420  ;;  %v12302_v16 = vpop.permute.xlu0 %11073 }
 0x38b   : > { %11340 = vpow2.f32 %v1348_v52 }
 0x38c   : > { %11103 = vrot.lane.b32.xlu0 %v12020_v58, %s11701_s10 }
 0x38e   : > { %v12304_v22 = vpop.permute.xlu0 %11083 }
 0x390   : > { %2786 = vrot.lane.b32.xlu0 %v11990_v44, %s11702_s11 }
 0x391   : > { %v12283_v45 = vpop.eup %11338 }
 0x392   : > { %v1380_v55 = vsel %vm1253_vm3, %v12283_v45, 0.0 }
 0x394   : > { %2875 = vrot.lane.b32.xlu0 %v12006_v51, %s11702_s11 }
 0x395   : > { %v12289_v60 = vpop.eup %11340 }
 0x396   : > { %v1395_v4 = vsel %vm1253_vm3, %v12289_v60, 0.0 }
 0x398   : > { %2966 = vrot.lane.b32.xlu0 %v12014_v56, %s11702_s11 }
 0x39c   : > { %1381 = vadd.xlane.f32.xlu1 %v1380_v55  ;;  %3057 = vrot.lane.b32.xlu0 %v12024_v61, %s11702_s11  ;;  %v11061_v55 = vunpack.i.h.bf16 %v12186_v1 }
 0x3a0   : > { %1396 = vadd.xlane.f32.xlu1 %v1395_v4  ;;  %11118 = vrot.lane.b32.xlu0 %v11968_v33, %s11703_s12  ;;  %v11060_v4 = vunpack.i.l.bf16 %v12186_v1 }
 0x3bb   : > { %v1298_v35 = vpop.xlane.xlu1 %1297 }
 0x3bc   : > { %v1316_v17 = vsub.f32 %v12168_v57, %v1298_v35  ;;  %v11056_v57 = vunpack.i.h.bf16 %v12188_v3 }
 0x3be   : > { %v1346_v42 = vmul.f32 1.442695, %v1316_v17 }
 0x3c0   : > { %11342 = vpow2.f32 %v1346_v42 }
 0x3ca   : > { %v12306_v30 = vpop.eup %11342 }
 0x3cb   : > { %v1355_v19 = vpop.xlane.xlu0 %1354  ;;  %v1392_v10 = vsel %vm1253_vm3, %v12306_v30, 0.0 }
 0x3cc   : > { %11344 = vrcp.f32 %v1355_v19  ;;  %1393 = vadd.xlane.f32.xlu1 %v1392_v10  ;;  %v1352_v50 = vpop.xlane.xlu1 %1351  ;;  %v12322_v19 = vpack.c.bf16 %v11056_v57, %v11055_v27 }
 0x3cd   : > { %11346 = vrcp.f32 %v1352_v50 }
 0x3d3   : > { %v1361_v13 = vpop.xlane.xlu1 %1360 }
 0x3d4   : > { %11348 = vrcp.f32 %v1361_v13 }
 0x3d6   : > { %v11345_v14 = vpop.eup %11344 }
 0x3d7   : > { %v11347_v52 = vpop.eup %11346  ;;  %v1358_v35 = vpop.xlane.xlu1 %1357  ;;  %v12318_v42 = vmul.f32 %v11345_v14, %v12194_v40 }
 0x3d8   : > { %v12315_v17 = vmul.f32 %v11347_v52, %v12196_v9  ;;  %11350 = vrcp.f32 %v1358_v35  ;;  %v12329_v9 = vpack.c.bf16 %v11061_v55, %v11060_v4 }
 0x3d9   : > { %v1602_v57 = vrot.slane %v12318_v42, 1  ;;  %v1619_v27 = vrot.slane %v12318_v42, 2  ;;  %v1636_v52 = vrot.slane %v12318_v42, 3  ;;  %v1670_v40 = vrot.slane %v12318_v42, 5 }
 0x3da   : > { %10047 = vmatprep.mubr.msk.f32.mxu0 %vm1253_vm3, %v12315_v17  ;;  %v1460_v4 = vrot.slane %v12315_v17, 1  ;;  %v1494_v35 = vrot.slane %v12315_v17, 3  ;;  %v1511_v50 = vrot.slane %v12315_v17, 4  ;;  %v1528_v3 = vrot.slane %v12315_v17, 5 }
 0x3db   : > { %v1367_v1 = vpop.xlane.xlu0 %1366  ;;  %10048 = vmatmul.mubr.msk.f32.vlgmr.msra.gmra.mrb[20].mxu0 %vm1253_vm3, %v12318_v42  ;;  %v1687_v10 = vrot.slane %v12318_v42, 6  ;;  %v1545_v61 = vrot.slane %v12315_v17, 6  ;;  %v1704_v56 = vrot.slane %v12318_v42, 7  ;;  %v1562_v34 = vrot.slane %v12315_v17, 7 }
 0x3dc   : > { %11352 = vrcp.f32 %v1367_v1  ;;  %10606 = vmatpush3.bf16.msra.mxu0 %v12100_v0  ;;  %v1477_v0 = vrot.slane %v12315_v17, 2  ;;  %v1653_v1 = vrot.slane %v12318_v42, 4 }
 0x3dd   : > { %10612 = vmatprep.subr.bf16.mxu0 %v12322_v19  ;;  %11098 = vrot.lane.b32.xlu1 %v12010_v53, %s11701_s10 }
 0x3de   : > { %v11349_v55 = vpop.eup %11348 }
 0x3df   : > { %v12346_v13 = vmul.f32 %v11349_v55, %v12204_v63  ;;  %v1379_v14 = vpop.xlane.xlu0 %1378 }
 0x3e0   : > { %11354 = vrcp.f32 %v1379_v14 }
 0x3e1   : > { %2695 = vrot.lane.b32.xlu1 %v11980_v39, %s11702_s11  ;;  %v1603_v63 = vsel %vm1439_vm4, %v12346_v13, %v1602_v57  ;;  %v1620_v55 = vrot.slane %v12346_v13, 1  ;;  %v1637_v51 = vrot.slane %v12346_v13, 2  ;;  %v1654_v44 = vrot.slane %v12346_v13, 3 }
 0x3e2   : > { %v11351_v36 = vpop.eup %11350  ;;  %v1671_v14 = vrot.slane %v12346_v13, 4  ;;  %v1688_v41 = vrot.slane %v12346_v13, 5  ;;  %v1705_v29 = vrot.slane %v12346_v13, 6 }
 0x3e3   : > { %v12366_v39 = vmul.f32 %v11351_v36, %v12208_v11  ;;  %v1364_v26 = vpop.xlane.xlu0 %1363  ;;  %v1621_v57 = vsel %vm1439_vm4, %v1620_v55, %v1619_v27  ;;  %v1638_v31 = vsel %vm1439_vm4, %v1637_v51, %v1636_v52  ;;  %v1655_v24 = vsel %vm1439_vm4, %v1654_v44, %v1653_v1 }
 0x3e4   : > { %11356 = vrcp.f32 %v1364_v26  ;;  %v1373_v58 = vpop.xlane.xlu1 %1372  ;;  %v1672_v33 = vsel %vm1439_vm4, %v1671_v14, %v1670_v40  ;;  %v1689_v48 = vsel %vm1439_vm4, %v1688_v41, %v1687_v10  ;;  %v1706_v53 = vsel %vm1439_vm4, %v1705_v29, %v1704_v56 }
 0x3e5   : > { %11358 = vrcp.f32 %v1373_v58  ;;  %2784 = vrot.lane.b32.xlu1 %v11992_v46, %s11702_s11  ;;  %10054 = vmatprep.mubr.msk.f32.mxu1 %vm1253_vm3, %v12366_v39  ;;  %v12380_v36 = vsel %vm1439_vm4, %v12366_v39, %v1460_v4  ;;  %v1478_v26 = vrot.slane %v12366_v39, 1  ;;  %v1495_v44 = vrot.slane %v12366_v39, 2 }
 0x3e6   : > { %v11353_v51 = vpop.eup %11352  ;;  %10055 = vmatmul.mubr.msk.f32.vlgmr.msra.gmra.mrb[12].mxu1 %vm1253_vm3, %v12346_v13  ;;  %v1512_v29 = vrot.slane %v12366_v39, 3  ;;  %v1529_v41 = vrot.slane %v12366_v39, 4  ;;  %v1546_v56 = vrot.slane %v12366_v39, 5  ;;  %v1587_v58 = vrot.slane %v12346_v13, 7 }
 0x3e7   : > { %v12391_v11 = vmul.f32 %v11353_v51, %v12216_v37  ;;  %10610 = vmatpush3.bf16.msra.mxu1 %v12115_v8  ;;  %v1376_v10 = vpop.xlane.xlu0 %1375  ;;  %v1479_v40 = vsel %vm1439_vm4, %v1478_v26, %v1477_v0  ;;  %v12396_v27 = vsel %vm1439_vm4, %v1495_v44, %v1494_v35  ;;  %v1563_v52 = vrot.slane %v12366_v39, 6 }
 0x3e8   : > { %11360 = vrcp.f32 %v1376_v10  ;;  %10616 = vmatprep.subr.bf16.mxu1 %v12329_v9  ;;  %v1370_v4 = vpop.xlane.xlu1 %1369  ;;  %v12401_v1 = vsel %vm1439_vm4, %v1512_v29, %v1511_v50  ;;  %v12404_v37 = vsel %vm1439_vm4, %v1529_v41, %v1528_v3  ;;  %v12407_v8 = vsel %vm1439_vm4, %v1546_v56, %v1545_v61 }
 0x3e9   : > { %11362 = vrcp.f32 %v1370_v4  ;;  %11108 = vrot.lane.b32.xlu1 %v12030_v62, %s11701_s10  ;;  %v1604_v13 = vrot.slane %v12391_v11, 7  ;;  %v1622_v0 = vsel %vm1442_vm5, %v12391_v11, %v1621_v57  ;;  %v1639_v35 = vrot.slane %v12391_v11, 1 }
 0x3ea   : > { %v11355_v55 = vpop.eup %11354  ;;  %v1656_v50 = vrot.slane %v12391_v11, 2  ;;  %v1673_v3 = vrot.slane %v12391_v11, 3  ;;  %v1690_v14 = vrot.slane %v12391_v11, 4  ;;  %v1707_v61 = vrot.slane %v12391_v11, 5 }
 0x3eb   : > { %v1391_v26 = vpop.xlane.xlu0 %1390  ;;  %v1605_v44 = vsel %vm1442_vm5, %v1604_v13, %v1603_v63  ;;  %v1640_v51 = vsel %vm1442_vm5, %v1639_v35, %v1638_v31  ;;  %v12422_v29 = vsel %vm1439_vm4, %v1563_v52, %v1562_v34  ;;  %v1438_v57 = vrot.slane %v12366_v39, 7 }
 0x3ec   : > { %11364 = vrcp.f32 %v1391_v26  ;;  %v1388_v41 = vpop.xlane.xlu1 %1387  ;;  %v12426_v56 = vsel %vm1442_vm5, %v1656_v50, %v1655_v24  ;;  %v12429_v10 = vsel %vm1442_vm5, %v1673_v3, %v1672_v33  ;;  %v12432_v4 = vsel %vm1442_vm5, %v1690_v14, %v1689_v48 }
 0x3ed   : > { %v12435_v63 = vmul.f32 %v11355_v55, %v12222_v21  ;;  %11366 = vrcp.f32 %v1388_v41  ;;  %2877 = vrot.lane.b32.xlu1 %v12002_v49, %s11702_s11  ;;  %v15521_v31 = vunpack.i.l.bf16 %v12265_v47  ;;  %v15522_v34 = vunpack.i.h.bf16 %v12265_v47 }
 0x3ee   : > { %v11357_v24 = vpop.eup %11356  ;;  %v15523_v33 = vunpack.i.l.bf16 %v12269_v23  ;;  %v15524_v52 = vunpack.i.h.bf16 %v12269_v23  ;;  %v12450_v21 = vsel %vm1442_vm5, %v1707_v61, %v1706_v53  ;;  %v15525_v35 = vunpack.i.l.bf16 %v12302_v16 }
 0x3ef   : > { %v12443_v39 = vpack.c.bf16 %v15522_v34, %v15521_v31  ;;  %v11359_v13 = vpop.eup %11358  ;;  %v15526_v55 = vunpack.i.h.bf16 %v12302_v16  ;;  %v12459_v47 = vmul.f32 %v11357_v24, %v12227_v6  ;;  %v1385_v3 = vpop.xlane.xlu0 %1384  ;;  %v12463_v23 = vsel %vm1439_vm4, %v1438_v57, %v12315_v17 }
 0x3f0   : > { %v10619_v48 = vpack.c.bf16 %v15524_v52, %v15523_v33  ;;  %v12467_v14 = vsel %vm1439_vm4, %v1587_v58, %v12318_v42  ;;  %v11086_v53 = vunpack.i.h.bf16 %v12304_v22  ;;  %v11085_v61 = vunpack.i.l.bf16 %v12304_v22 }
 0x3f1   : > { %v12456_v50 = vpack.c.bf16 %v15526_v55, %v15525_v35  ;;  %v12472_v16 = vmul.f32 %v11359_v13, %v12229_v7  ;;  %11368 = vrcp.f32 %v1385_v3  ;;  %2968 = vrot.lane.b32.xlu1 %v12012_v54, %s11702_s11  ;;  %10061 = vmatprep.mubr.msk.f32.mxu0 %vm1253_vm3, %v12459_v47  ;;  %v1608_v6 = vrot.slane %v12435_v63, 5 }
 0x3f2   : > { %v1462_v17 = vrot.slane %v12459_v47, 7  ;;  %v1480_v42 = vsel %vm1442_vm5, %v12459_v47, %v1479_v40  ;;  %v1642_v58 = vrot.slane %v12435_v63, 7  ;;  %v11361_v22 = vpop.eup %11360  ;;  %10062 = vmatmul.mubr.msk.f32.vlgmr.msra.gmra.mrb[22].mxu0 %vm1253_vm3, %v12391_v11  ;;  %v1497_v41 = vrot.slane %v12459_v47, 1 }
 0x3f3   : > { %v1606_v7 = vrot.slane %v12472_v16, 6  ;;  %v1623_v26 = vrot.slane %v12472_v16, 7  ;;  %v1641_v57 = vsel %vm1445_vm6, %v12472_v16, %v1640_v51  ;;  %v11363_v31 = vpop.eup %11362  ;;  %v12491_v34 = vmul.f32 %v11361_v22, %v12235_v12  ;;  %10614 = vmatpush3.bf16.msra.mxu0 %v12322_v19  ;;  %v12494_v40 = vpop.permute.xlu0 %2422 }
 0x3f4   : > { %v1463_v24 = vsel %vm1442_vm5, %v1462_v17, %v12380_v36  ;;  %v1625_v33 = vrot.slane %v12435_v63, 6  ;;  %v12500_v52 = vsel %vm1448_vm7, %v1642_v58, %v1641_v57  ;;  %v12503_v51 = vmul.f32 %v11363_v31, %v12237_v15  ;;  %10620 = vmatprep.subr.bf16.mxu0 %v10619_v48 }
 0x3f5   : > { %v1607_v13 = vsel %vm1445_vm6, %v1606_v7, %v1605_v44  ;;  %v1624_v12 = vsel %vm1445_vm6, %v1623_v26, %v1622_v0  ;;  %v1498_v19 = vsel %vm1442_vm5, %v1497_v41, %v12396_v27  ;;  %3059 = vrot.lane.b32.xlu1 %v12022_v59, %s11702_s11  ;;  %10075 = vmatprep.mubr.msk.f32.mxu0 %vm1253_vm3, %v12491_v34  ;;  %v1466_v35 = vrot.slane %v12491_v34, 5 }
 0x3f6   : > { %v1609_v36 = vsel %vm1448_vm7, %v1608_v6, %v1607_v13  ;;  %v1626_v15 = vsel %vm1448_vm7, %v1625_v33, %v1624_v12  ;;  %v1483_v55 = vrot.slane %v12491_v34, 6  ;;  %v11365_v44 = vpop.eup %11364  ;;  %10068 = vmatprep.mubr.msk.f32.mxu1 %vm1253_vm3, %v12503_v51  ;;  %10076 = vmatmul.mubr.msk.f32.vlgmr.msra.gmra.mrb[24].mxu0 %vm1253_vm3, %v12435_v63  ;;  %v1464_v27 = vrot.slane %v12503_v51, 6  ;;  %v12567_v12 = vpop.permute.xlu1 %11088 }
 0x3f7   : > { %v1481_v0 = vrot.slane %v12503_v51, 7  ;;  %v1499_v3 = vsel %vm1445_vm6, %v12503_v51, %v1498_v19  ;;  %v1500_v6 = vrot.slane %v12491_v34, 7  ;;  %v11367_v17 = vpop.eup %11366  ;;  %v12527_v58 = vmul.f32 %v11365_v44, %v12243_v20  ;;  %10069 = vmatmul.mubr.msk.f32.vlgmr.msra.gmra.mrb[14].mxu1 %vm1253_vm3, %v12472_v16  ;;  %10622 = vmatpush3.bf16.msra.mxu0 %v10619_v48  ;;  %v12531_v22 = vpop.permute.xlu0 %2511 }
 0x3f8   : > { %v1658_v7 = vrot.slane %v12472_v16, 1  ;;  %v12535_v26 = vmul.f32 %v11367_v17, %v12245_v18  ;;  %10618 = vmatpush3.bf16.msra.mxu1 %v12329_v9  ;;  %10629 = vmatprep.subr.msk.bf16.mxu0 %vm12048_vm2, %v12456_v50  ;;  %v1465_v20 = vsel %vm1445_vm6, %v1464_v27, %v1463_v24  ;;  %v1514_v48 = vrot.slane %v12459_v47, 2 }
 0x3f9   : > { %v1482_v57 = vsel %vm1445_vm6, %v1481_v0, %v1480_v42  ;;  %v12544_v41 = vpack.c.bf16 %v11086_v53, %v11085_v61  ;;  %10624 = vmatprep.subr.bf16.mxu1 %v12443_v39  ;;  %11113 = vrot.lane.b32.xlu1 %v11958_v28, %s11703_s12  ;;  %v12550_v18 = vsel %vm1448_vm7, %v1466_v35, %v1465_v20  ;;  %v1677_v31 = vrot.slane %v12435_v63, 1 }
 0x3fa   : > { %v12553_v9 = vsel %vm1448_vm7, %v1483_v55, %v1482_v57  ;;  %10089 = vmatprep.mubr.msk.f32.mxu0 %vm1253_vm3, %v12535_v26  ;;  %v12559_v53 = vsel %vm1448_vm7, %v1500_v6, %v1499_v3  ;;  %v1516_v61 = vrot.slane %v12503_v51, 1  ;;  %v1675_v42 = vrot.slane %v12472_v16, 2 }
 0x3fb   : > { %v11369_v24 = vpop.eup %11368  ;;  %v1694_v33 = vrot.slane %v12435_v63, 2  ;;  %10090 = vmatmul.mubr.msk.f32.vlgmr.msra.gmra.mrb[26].mxu0 %vm1253_vm3, %v12527_v58  ;;  %v11094_v19 = vpop.permute.xlu0 %11093  ;;  %v1612_v35 = vrot.slane %v12527_v58, 3  ;;  %v1629_v55 = vrot.slane %v12527_v58, 4  ;;  %v1659_v44 = vsel %vm1445_vm6, %v1658_v7, %v12426_v56 }
 0x3fc   : > { %v12565_v13 = vmul.f32 %v11369_v24, %v12251_v32  ;;  %10103 = vmatprep.mubr.msk.f32.mxu0 %vm546_vm1, %v12299_v25  ;;  %v1646_v27 = vrot.slane %v12527_v58, 5  ;;  %v1660_v32 = vsel %vm1448_vm7, %v12435_v63, %v1659_v44  ;;  %v1663_v0 = vrot.slane %v12527_v58, 6 }
 0x3fd   : > { %v1515_v3 = vsel %vm1442_vm5, %v1514_v48, %v12401_v1  ;;  %11123 = vrot.lane.b32.xlu1 %v11978_v38, %s11703_s12  ;;  %v11096_v7 = vunpack.i.h.bf16 %v11094_v19  ;;  %v11095_v20 = vunpack.i.l.bf16 %v11094_v19  ;;  %v1676_v24 = vsel %vm1445_vm6, %v1675_v42, %v12429_v10 }
 0x3fe   : > { %v1610_v6 = vrot.slane %v12565_v13, 4  ;;  %v1627_v56 = vrot.slane %v12565_v13, 5  ;;  %v1644_v17 = vrot.slane %v12565_v13, 6  ;;  %v1661_v25 = vrot.slane %v12565_v13, 7 }
 0x3ff   : > { %v1517_v57 = vsel %vm1445_vm6, %v1516_v61, %v1515_v3  ;;  %v12592_v44 = vpop.permute.xlu0 %2604  ;;  %v1692_v3 = vrot.slane %v12472_v16, 3 }
 0x400   : > { %v1611_v1 = vsel %vm1451_vm8, %v1610_v6, %v1609_v36  ;;  %v1628_v48 = vsel %vm1451_vm8, %v1627_v56, %v1626_v15  ;;  %v1645_v59 = vsel %vm1451_vm8, %v1644_v17, %v12500_v52  ;;  %v1662_v49 = vsel %vm1451_vm8, %v1661_v25, %v1660_v32  ;;  %10632 = vmatpush3.bf16.xpose.msk.msra.mxu0 %vm12048_vm2, %v12456_v50  ;;  %v12614_v15 = vpop.permute.xlu1 %2513 }
 0x401   : > { %v12603_v61 = vsel %vm1454_vm9, %v1612_v35, %v1611_v1  ;;  %v12606_v10 = vsel %vm1454_vm9, %v1629_v55, %v1628_v48  ;;  %v12609_v42 = vsel %vm1454_vm9, %v1646_v27, %v1645_v59  ;;  %v12612_v36 = vsel %vm1454_vm9, %v1663_v0, %v1662_v49  ;;  %10641 = vmatprep.subr.msk.bf16.mxu0 %vm12048_vm2, %v12544_v41 }
 0x402   : > { %11128 = vrot.lane.b32.xlu1 %v11988_v43, %s11703_s12  ;;  %v12623_v50 = vsel %vm1448_vm7, %v12491_v34, %v1517_v57  ;;  %v1678_v52 = vsel %vm1448_vm7, %v1677_v31, %v1676_v24  ;;  %v1680_v59 = vrot.slane %v12527_v58, 7  ;;  %v1531_v49 = vrot.slane %v12459_v47, 3 }
 0x403   : > { %v1679_v19 = vsel %vm1451_vm8, %v12565_v13, %v1678_v52  ;;  %v1533_v35 = vrot.slane %v12503_v51, 2  ;;  %v1535_v55 = vrot.slane %v12491_v34, 1  ;;  %v1711_v27 = vrot.slane %v12435_v63, 3  ;;  %v12633_v32 = vpop.permute.xlu0 %2693 }
 0x404   : > { %v12636_v0 = vsel %vm1454_vm9, %v1680_v59, %v1679_v19  ;;  %v1532_v31 = vsel %vm1442_vm5, %v1531_v49, %v12404_v37  ;;  %v1696_v6 = vrot.slane %v12565_v13, 1  ;;  %v1548_v17 = vrot.slane %v12459_v47, 4 }
 0x405   : > { %v1534_v56 = vsel %vm1445_vm6, %v1533_v35, %v1532_v31  ;;  %v1550_v25 = vrot.slane %v12503_v51, 3  ;;  %v1552_v57 = vrot.slane %v12491_v34, 2  ;;  %v10651_v24 = vpack.c.bf16 %v11096_v7, %v11095_v20  ;;  %v2603_v35 = vpop.permute.xlu1 %2602 }
 0x406   : > { %v12647_v1 = vsel %vm1448_vm7, %v1535_v55, %v1534_v56  ;;  %v1693_v48 = vsel %vm1445_vm6, %v1692_v3, %v12432_v4  ;;  %v1709_v37 = vrot.slane %v12472_v16, 4  ;;  %v1549_v59 = vsel %vm1442_vm5, %v1548_v17, %v12407_v8 }
 0x407   : > { %v1695_v52 = vsel %vm1448_vm7, %v1694_v33, %v1693_v48  ;;  %v1713_v49 = vrot.slane %v12565_v13, 2  ;;  %v1565_v19 = vrot.slane %v12459_v47, 5  ;;  %10104 = vmatmul.mubr.msk.f32.vlgmr.msra.gmra.mrb[28].mxu0 %vm546_vm1, %v12494_v40  ;;  %v11104_v7 = vpop.permute.xlu0 %11103  ;;  %v1551_v4 = vsel %vm1445_vm6, %v1550_v25, %v1549_v59 }
 0x408   : > { %v1697_v20 = vsel %vm1451_vm8, %v1696_v6, %v1695_v52  ;;  %v1710_v55 = vsel %vm1445_vm6, %v1709_v37, %v12450_v21  ;;  %v1567_v33 = vrot.slane %v12503_v51, 4  ;;  %10644 = vmatpush3.bf16.xpose.msk.msra.mxu0 %vm12048_vm2, %v12544_v41  ;;  %10117 = vmatprep.mubr.msk.f32.mxu0 %vm546_vm1, %v2603_v35  ;;  %v12673_v40 = vsel %vm1448_vm7, %v1552_v57, %v1551_v4 }
 0x409   : > { %v12670_v8 = vsel %vm1454_vm9, %v12527_v58, %v1697_v20  ;;  %v1715_v31 = vrot.slane %v12527_v58, 1  ;;  %v1589_v3 = vrot.slane %v12391_v11, 6  ;;  %v11106_v21 = vunpack.i.h.bf16 %v11104_v7  ;;  %10653 = vmatprep.subr.msk.bf16.mxu0 %vm12048_vm2, %v10651_v24 }
 0x40a   : > { %v1712_v6 = vsel %vm1448_vm7, %v1711_v27, %v1710_v55  ;;  %v1566_v41 = vsel %vm1442_vm5, %v1565_v19, %v12422_v29  ;;  %v1569_v56 = vrot.slane %v12491_v34, 3  ;;  %v11105_v17 = vunpack.i.l.bf16 %v11104_v7 }
 0x40b   : > { %v1714_v25 = vsel %vm1451_vm8, %v1713_v49, %v1712_v6  ;;  %v1568_v57 = vsel %vm1445_vm6, %v1567_v33, %v1566_v41  ;;  %v1441_v48 = vrot.slane %v12459_v47, 6  ;;  %v1444_v52 = vrot.slane %v12503_v51, 5 }
 0x40c   : > { %v1716_v11 = vsel %vm1454_vm9, %v1715_v31, %v1714_v25  ;;  %v1570_v37 = vsel %vm1448_vm7, %v1569_v56, %v1568_v57  ;;  %v1447_v27 = vrot.slane %v12491_v34, 4  ;;  %v1590_v59 = vsel %vm1442_vm5, %v1589_v3, %v12467_v14 }
 0x40d   : > { %v1443_v29 = vsel %vm1442_vm5, %v1441_v48, %v12463_v23  ;;  %v1591_v49 = vrot.slane %v12472_v16, 5  ;;  %v1593_v47 = vrot.slane %v12435_v63, 4  ;;  %v1595_v35 = vrot.slane %v12565_v13, 3 }
 0x40e   : > { %v1446_v19 = vsel %vm1445_vm6, %v1444_v52, %v1443_v29  ;;  %v12700_v20 = vpack.c.bf16 %v11106_v21, %v11105_v17  ;;  %v1597_v14 = vrot.slane %v12527_v58, 2  ;;  %v11081_v55 = vunpack.i.h.bf16 %v12297_v5 }
 0x40f   : > { %v1449_v7 = vsel %vm1448_vm7, %v1447_v27, %v1446_v19  ;;  %v1592_v51 = vsel %vm1445_vm6, %v1591_v49, %v1590_v59  ;;  %10118 = vmatmul.mubr.msk.f32.vlgmr.msra.gmra.mrb[30].mxu0 %vm546_vm1, %v12592_v44  ;;  %v11080_v58 = vunpack.i.l.bf16 %v12297_v5 }
 0x410   : > { %v1594_v23 = vsel %vm1448_vm7, %v1593_v47, %v1592_v51  ;;  %10656 = vmatpush3.bf16.xpose.msk.msra.mxu0 %vm12048_vm2, %v10651_v24 }
 0x411   : > { %v1596_v63 = vsel %vm1451_vm8, %v1595_v35, %v1594_v23  ;;  %10665 = vmatprep.subr.msk.bf16.mxu0 %vm12048_vm2, %v12700_v20  ;;  %v12717_v41 = vpack.c.bf16 %v11081_v55, %v11080_v58  ;;  %v11091_v23 = vunpack.i.h.bf16 %v12567_v12  ;;  %v1573_v55 = vrot.slane %v12535_v26, 1 }
 0x412   : > { %v1598_v16 = vsel %vm1454_vm9, %v1597_v14, %v1596_v63  ;;  %v1453_v58 = vrot.slane %v12535_v26, 2 }
 0x429   : > { %v1382_v34 = vpop.xlane.xlu1 %1381 }
 0x42a   : > { %11370 = vrcp.f32 %v1382_v34  ;;  %v1504_v34 = vrot.slane %v12535_v26, 5 }
 0x42d   : > { %v1397_v4 = vpop.xlane.xlu1 %1396 }
 0x42e   : > { %11372 = vrcp.f32 %v1397_v4  ;;  %v1521_v4 = vrot.slane %v12535_v26, 6 }
 0x434   : > { %v11371_v44 = vpop.eup %11370 }
 0x435   : > { %v1424_v33 = vmul.f32 %v11371_v44, %v12283_v45  ;;  %v1538_v44 = vrot.slane %v12535_v26, 7 }
 0x437   : > { %10082 = vmatprep.mubr.msk.f32.mxu1 %vm1253_vm3, %v1424_v33  ;;  %v1468_v24 = vrot.slane %v1424_v33, 4  ;;  %v1485_v31 = vrot.slane %v1424_v33, 5  ;;  %v1502_v3 = vrot.slane %v1424_v33, 6  ;;  %v1519_v21 = vrot.slane %v1424_v33, 7 }
 0x438   : > { %v11373_v6 = vpop.eup %11372  ;;  %10083 = vmatmul.mubr.msk.f32.vlgmr.msra.gmra.mrb[16].mxu1 %vm1253_vm3, %v12565_v13  ;;  %v1537_v56 = vsel %vm1451_vm8, %v1424_v33, %v12647_v1  ;;  %v1571_v1 = vrot.slane %v1424_v33, 2  ;;  %v1450_v57 = vrot.slane %v1424_v33, 3 }
 0x439   : > { %v12724_v5 = vmul.f32 %v11373_v6, %v12289_v60  ;;  %10626 = vmatpush3.bf16.msra.mxu1 %v12443_v39  ;;  %v1469_v45 = vsel %vm1451_vm8, %v1468_v24, %v12550_v18  ;;  %v1486_v17 = vsel %vm1451_vm8, %v1485_v31, %v12553_v9  ;;  %v1503_v25 = vsel %vm1451_vm8, %v1502_v3, %v12559_v53 }
 0x43a   : > { %10635 = vmatprep.subr.msk.bf16.mxu1 %vm12048_vm2, %v12717_v41  ;;  %v1520_v13 = vsel %vm1451_vm8, %v1519_v21, %v12623_v50  ;;  %v1554_v60 = vrot.slane %v1424_v33, 1  ;;  %v1505_v3 = vsel %vm1454_vm9, %v1504_v34, %v1503_v25  ;;  %v1539_v6 = vsel %vm1454_vm9, %v1538_v44, %v1537_v56 }
 0x43b   : > { %v1614_v39 = vrot.slane %v12724_v5, 2  ;;  %v1631_v18 = vrot.slane %v12724_v5, 3  ;;  %v1648_v48 = vrot.slane %v12724_v5, 4  ;;  %v1665_v9 = vrot.slane %v12724_v5, 5 }
 0x43c   : > { %v1682_v53 = vrot.slane %v12724_v5, 6  ;;  %v1699_v52 = vrot.slane %v12724_v5, 7  ;;  %v12772_v19 = vsel %vm1457_vm10, %v12724_v5, %v1716_v11  ;;  %v1599_v47 = vrot.slane %v12724_v5, 1 }
 0x43d   : > { %v12746_v27 = vsel %vm1457_vm10, %v1614_v39, %v12603_v61  ;;  %v12750_v50 = vsel %vm1457_vm10, %v1631_v18, %v12606_v10  ;;  %v12754_v29 = vsel %vm1457_vm10, %v1648_v48, %v12609_v42  ;;  %v12758_v59 = vsel %vm1457_vm10, %v1665_v9, %v12612_v36  ;;  %15533 = vst [vmem:[#allocation38_spill] sm:$0xff] %v12772_v19 }
 0x43e   : > { %15527 = vst [vmem:[#allocation32_spill] sm:$0xff] %v12746_v27  ;;  %15528 = vst [vmem:[#allocation33_spill] sm:$0xff] %v12750_v50  ;;  %v12762_v49 = vsel %vm1457_vm10, %v1682_v53, %v12636_v0  ;;  %v12766_v61 = vsel %vm1457_vm10, %v1699_v52, %v12670_v8  ;;  %v1555_v10 = vsel %vm1451_vm8, %v1554_v60, %v12673_v40  ;;  %v2787_v8 = vpop.permute.xlu0 %2786  ;;  %v11090_v40 = vunpack.i.l.bf16 %v12567_v12 }
 0x43f   : > { %15529 = vst [vmem:[#allocation34_spill] sm:$0xff] %v12754_v29  ;;  %15530 = vst [vmem:[#allocation35_spill] sm:$0xff] %v12758_v59  ;;  %v1572_v42 = vsel %vm1451_vm8, %v1571_v1, %v1570_v37  ;;  %v1452_v36 = vsel %vm1451_vm8, %v1450_v57, %v1449_v7  ;;  %v12778_v0 = vsel %vm1457_vm10, %v1599_v47, %v1598_v16  ;;  %v1470_v37 = vrot.slane %v12535_v26, 3 }
 0x440   : > { %15531 = vst [vmem:[#allocation36_spill] sm:$0xff] %v12762_v49  ;;  %15532 = vst [vmem:[#allocation37_spill] sm:$0xff] %v12766_v61  ;;  %v10645_v63 = vpack.c.bf16 %v11091_v23, %v11090_v40  ;;  %v1487_v7 = vrot.slane %v12535_v26, 4  ;;  %v1522_v21 = vsel %vm1454_vm9, %v1521_v4, %v1520_v13  ;;  %v1556_v60 = vsel %vm1454_vm9, %v12535_v26, %v1555_v10 }
 0x441   : > { %15534 = vst [vmem:[#allocation39_spill] sm:$0xff] %v12778_v0  ;;  %v1471_v24 = vsel %vm1454_vm9, %v1470_v37, %v1469_v45  ;;  %v1574_v1 = vsel %vm1454_vm9, %v1573_v55, %v1572_v42  ;;  %v1455_v53 = vsel %vm1454_vm9, %v1453_v58, %v1452_v36 }
 0x442   : > { %v12782_v11 = vpop.permute.xlu0 %2875  ;;  %v1488_v31 = vsel %vm1454_vm9, %v1487_v7, %v1486_v17 }
 0x446   : > { %v2967_v25 = vpop.permute.xlu0 %2966 }
 0x459   : > { %v1394_v35 = vpop.xlane.xlu1 %1393 }
 0x45a   : > { %11374 = vrcp.f32 %v1394_v35 }
 0x45d   : > { %v11099_v51 = vpop.permute.xlu1 %11098 }
 0x45e   : > { %v11101_v42 = vunpack.i.h.bf16 %v11099_v51  ;;  %v11100_v47 = vunpack.i.l.bf16 %v11099_v51 }
 0x460   : > { %v10657_v35 = vpack.c.bf16 %v11101_v42, %v11100_v47 }
 0x461   : > { %v2696_v14 = vpop.permute.xlu1 %2695 }
 0x464   : > { %v11375_v16 = vpop.eup %11374 }
 0x465   : > { %v1428_v12 = vmul.f32 %v11375_v16, %v12306_v30  ;;  %v2785_v33 = vpop.permute.xlu1 %2784 }
 0x466   : > { %10131 = vmatprep.mubr.msk.f32.mxu0 %vm546_vm1, %v2785_v33 }
 0x467   : > { %10096 = vmatprep.mubr.msk.f32.mxu1 %vm1253_vm3, %v1428_v12  ;;  %10132 = vmatmul.mubr.msk.f32.vlgmr.msra.gmra.mrb[32].mxu0 %vm546_vm1, %v2787_v8  ;;  %v1472_v30 = vrot.slane %v1428_v12, 2  ;;  %v1489_v45 = vrot.slane %v1428_v12, 3  ;;  %v1506_v17 = vrot.slane %v1428_v12, 4  ;;  %v1523_v57 = vrot.slane %v1428_v12, 5  ;;  %v3058_v8 = vpop.permute.xlu0 %3057 }
 0x468   : > { %10668 = vmatpush3.bf16.xpose.msk.msra.mxu0 %vm12048_vm2, %v12700_v20  ;;  %10097 = vmatmul.mubr.msk.f32.vlgmr.msra.gmra.mrb[18].mxu1 %vm1253_vm3, %v12724_v5  ;;  %v1540_v56 = vrot.slane %v1428_v12, 6  ;;  %v1557_v26 = vrot.slane %v1428_v12, 7  ;;  %v12809_v13 = vsel %vm1457_vm10, %v1428_v12, %v1574_v1  ;;  %v1456_v39 = vrot.slane %v1428_v12, 1 }
 0x469   : > { %15535 = vst [vmem:[#allocation40_spill] sm:$0xff] %v12809_v13  ;;  %10638 = vmatpush3.bf16.xpose.msk.msra.mxu1 %vm12048_vm2, %v12717_v41  ;;  %10145 = vmatprep.mubr.msk.f32.mxu0 %vm546_vm1, %v2967_v25  ;;  %v11109_v18 = vpop.permute.xlu1 %11108  ;;  %v12816_v48 = vsel %vm1457_vm10, %v1472_v30, %v1471_v24  ;;  %v12819_v20 = vsel %vm1457_vm10, %v1489_v45, %v1488_v31 }
 0x46a   : > { %15536 = vst [vmem:[#allocation41_spill] sm:$0xff] %v12816_v48  ;;  %15537 = vst [vmem:[#allocation42_spill] sm:$0xff] %v12819_v20  ;;  %v12822_v5 = vsel %vm1457_vm10, %v1506_v17, %v1505_v3  ;;  %10110 = vmatprep.mubr.msk.f32.mxu1 %vm546_vm1, %v12531_v22  ;;  %10647 = vmatprep.subr.msk.bf16.mxu1 %vm12048_vm2, %v10645_v63  ;;  %v12829_v41 = vsel %vm1457_vm10, %v1523_v57, %v1522_v21  ;;  %v11111_v23 = vunpack.i.h.bf16 %v11109_v18 }
 0x46b   : > { %15538 = vst [vmem:[#allocation43_spill] sm:$0xff] %v12822_v5  ;;  %15539 = vst [vmem:[#allocation44_spill] sm:$0xff] %v12829_v41  ;;  %v12832_v9 = vsel %vm1457_vm10, %v1540_v56, %v1539_v6  ;;  %v12836_v52 = vsel %vm1457_vm10, %v1557_v26, %v1556_v60  ;;  %v12839_v10 = vsel %vm1457_vm10, %v1456_v39, %v1455_v53  ;;  %v11110_v51 = vunpack.i.l.bf16 %v11109_v18 }
 0x46c   : > { %15540 = vst [vmem:[#allocation45_spill] sm:$0xff] %v12832_v9  ;;  %15541 = vst [vmem:[#allocation46_spill] sm:$0xff] %v12836_v52 }
 0x46d   : > { %15542 = vst [vmem:[#allocation47_spill] sm:$0xff] %v12839_v10  ;;  %v2878_v22 = vpop.permute.xlu1 %2877  ;;  %v10669_v37 = vpack.c.bf16 %v11111_v23, %v11110_v51 }
 0x470   : > { %10111 = vmatmul.mubr.msk.f32.vlgmr.msra.gmra.mrb[20].mxu1 %vm546_vm1, %v12614_v15  ;;  %v11119_v15 = vpop.permute.xlu0 %11118 }
 0x471   : > { %10650 = vmatpush3.bf16.xpose.msk.msra.mxu1 %vm12048_vm2, %v10645_v63  ;;  %10124 = vmatprep.mubr.msk.f32.mxu1 %vm546_vm1, %v12633_v32  ;;  %v2969_v36 = vpop.permute.xlu1 %2968  ;;  %v11121_v34 = vunpack.i.h.bf16 %v11119_v15  ;;  %v11120_v16 = vunpack.i.l.bf16 %v11119_v15 }
 0x472   : > { %10659 = vmatprep.subr.msk.bf16.mxu1 %vm12048_vm2, %v10657_v35  ;;  %10146 = vmatmul.mubr.msk.f32.vlgmr.msra.gmra.mrb[34].mxu0 %vm546_vm1, %v2969_v36 }
 0x475   : > { %v3060_v40 = vpop.permute.xlu1 %3059 }
 0x478   : > { %10125 = vmatmul.mubr.msk.f32.vlgmr.msra.gmra.mrb[22].mxu1 %vm546_vm1, %v2696_v14  ;;  %v10679_v14 = vpack.c.bf16 %v11121_v34, %v11120_v16 }
 0x479   : > { %10662 = vmatpush3.bf16.xpose.msk.msra.mxu1 %vm12048_vm2, %v10657_v35  ;;  %10138 = vmatprep.mubr.msk.f32.mxu1 %vm546_vm1, %v12782_v11  ;;  %v11114_v32 = vpop.permute.xlu1 %11113 }
 0x47a   : > { %v11116_v63 = vunpack.i.h.bf16 %v11114_v32  ;;  %v11115_v7 = vunpack.i.l.bf16 %v11114_v32  ;;  %10671 = vmatprep.subr.msk.bf16.mxu1 %vm12048_vm2, %v10669_v37 }
 0x47c   : > { %v10675_v4 = vpack.c.bf16 %v11116_v63, %v11115_v7 }
 0x47d   : > { %v11124_v44 = vpop.permute.xlu1 %11123 }
 0x47e   : > { %v11126_v55 = vunpack.i.h.bf16 %v11124_v44  ;;  %v11125_v58 = vunpack.i.l.bf16 %v11124_v44  ;;  %10676 = vmatprep.subr.bf16.mxu0 %v10675_v4 }
 0x47f   : > { %10678 = vmatpush3.bf16.msra.mxu0 %v10675_v4 }
 0x480   : > { %10139 = vmatmul.mubr.msk.f32.vlgmr.msra.gmra.mrb[24].mxu1 %vm546_vm1, %v2878_v22  ;;  %v12858_v12 = vpack.c.bf16 %v11126_v55, %v11125_v58 }
 0x481   : > { %10674 = vmatpush3.bf16.xpose.msk.msra.mxu1 %vm12048_vm2, %v10669_v37  ;;  %10152 = vmatprep.mubr.msk.f32.mxu1 %vm546_vm1, %v3058_v8  ;;  %v11129_v11 = vpop.permute.xlu1 %11128 }
 0x482   : > { %10680 = vmatprep.subr.bf16.mxu1 %v10679_v14  ;;  %10684 = vmatprep.subr.bf16.mxu0 %v12858_v12  ;;  %v11131_v33 = vunpack.i.h.bf16 %v11129_v11  ;;  %v11130_v24 = vunpack.i.l.bf16 %v11129_v11 }
 0x484   : > { %v12865_v31 = vpack.c.bf16 %v11131_v33, %v11130_v24 }
 0x488   : > { %10153 = vmatmul.mubr.msk.f32.vlgmr.msra.gmra.mrb[26].mxu1 %vm546_vm1, %v3060_v40 }
 0x489   : > { %10682 = vmatpush3.bf16.msra.mxu1 %v10679_v14 }
 0x48a   : > { %10688 = vmatprep.subr.bf16.mxu1 %v12865_v31 }
 0x4ae   : > { %v12868_v3 = vpop.f32.mrb[20].mxu0 }
 0x4af   : > { %v12870_v21 = vpop.f32.mrb[21].mxu0 }
 0x4b9   : > { %v12872_v6 = vpop.f32.mrb[12].mxu1 }
 0x4ba   : > { %v12874_v60 = vpop.f32.mrb[13].mxu1 }
 0x4c5   : > { %v12876_v1 = vpop.f32.mrb[22].mxu0 }
 0x4c6   : > { %v12878_v30 = vpop.f32.mrb[23].mxu0 }
 0x4c9   : > { %v12880_v45 = vpop.f32.mrb[24].mxu0 }
 0x4ca   : > { %v12882_v17 = vpop.f32.mrb[14].mxu1  ;;  %v12884_v57 = vpop.f32.mrb[25].mxu0 }
 0x4cb   : > { %v12886_v25 = vpop.f32.mrb[15].mxu1 }
 0x4ce   : > { %v12888_v56 = vpop.f32.mrb[26].mxu0 }
 0x4cf   : > { %v12890_v26 = vpop.f32.mrb[27].mxu0 }
 0x4da   : > { %v10105_v39 = vpop.f32.mrb[28].mxu0 }
 0x4db   : > { %v2502_v18 = vpop.f32.mrb[29].mxu0  ;;  %v3151_v53 = vsel %vm1253_vm3, %v10105_v39, -inf }
 0x4dc   : > { %3152 = vmax.xlane.f32.xlu0 %v3151_v53  ;;  %v3148_v42 = vsel %vm1253_vm3, %v2502_v18, -inf }
 0x4e0   : > { %3149 = vmax.xlane.f32.xlu0 %v3148_v42 }
 0x4e2   : > { %v10119_v47 = vpop.f32.mrb[30].mxu0 }
 0x4e3   : > { %v2684_v22 = vpop.f32.mrb[31].mxu0  ;;  %v3163_v35 = vsel %vm1253_vm3, %v10119_v47, -inf }
 0x4e4   : > { %3164 = vmax.xlane.f32.xlu1 %v3163_v35  ;;  %v3160_v36 = vsel %vm1253_vm3, %v2684_v22, -inf }
 0x4e8   : > { %3161 = vmax.xlane.f32.xlu1 %v3160_v36 }
 0x50b   : > { %v12896_v8 = vpop.f32.mrb[16].mxu1 }
 0x50c   : > { %v12898_v23 = vpop.f32.mrb[17].mxu1 }
 0x53a   : > { %v12900_v51 = vpop.f32.mrb[32].mxu0 }
 0x53b   : > { %v12902_v40 = vpop.f32.mrb[18].mxu1  ;;  %v12904_v37 = vpop.f32.mrb[33].mxu0  ;;  %v3175_v44 = vsel %vm1253_vm3, %v12900_v51, -inf }
 0x53c   : > { %v12906_v15 = vpop.f32.mrb[19].mxu1  ;;  %v3172_v55 = vsel %vm1253_vm3, %v12904_v37, -inf }
 0x543   : > { %v12908_v32 = vpop.f32.mrb[20].mxu1 }
 0x544   : > { %v12910_v63 = vpop.f32.mrb[21].mxu1  ;;  %v3157_v7 = vsel %vm1253_vm3, %v12908_v32, -inf }
 0x545   : > { %3158 = vmax.xlane.f32.xlu0 %v3157_v7  ;;  %v3154_v34 = vsel %vm1253_vm3, %v12910_v63, -inf  ;;  %v12916_v16 = vpop.f32.mrb[34].mxu0 }
 0x546   : > { %3155 = vmax.xlane.f32.xlu1 %v3154_v34  ;;  %v12918_v4 = vpop.f32.mrb[35].mxu0  ;;  %v3187_v35 = vsel %vm1253_vm3, %v12916_v16, -inf }
 0x547   : > { %v3184_v33 = vsel %vm1253_vm3, %v12918_v4, -inf }
 0x549   : > { %3176 = vmax.xlane.f32.xlu0 %v3175_v44 }
 0x54a   : > { %3173 = vmax.xlane.f32.xlu1 %v3172_v55 }
 0x54b   : > { %v12924_v58 = vpop.f32.mrb[22].mxu1 }
 0x54c   : > { %v12926_v14 = vpop.f32.mrb[23].mxu1  ;;  %v3169_v11 = vsel %vm1253_vm3, %v12924_v58, -inf }
 0x54d   : > { %3170 = vmax.xlane.f32.xlu0 %v3169_v11  ;;  %v3166_v24 = vsel %vm1253_vm3, %v12926_v14, -inf }
 0x54e   : > { %3185 = vmax.xlane.f32.xlu1 %v3184_v33  ;;  %v15543_v33 = vld [vmem:[#allocation25_spill] sm:$0xff] }
 0x551   : > { %3167 = vmax.xlane.f32.xlu0 %v3166_v24  ;;  %v15544_v24 = vld [vmem:[#allocation22_spill] sm:$0xff] }
 0x553   : > { %v12934_v53 = vpop.f32.mrb[24].mxu1 }
 0x554   : > { %v12936_v42 = vpop.f32.mrb[25].mxu1  ;;  %v3181_v7 = vsel %vm1253_vm3, %v12934_v53, -inf }
 0x555   : > { %3188 = vmax.xlane.f32.xlu0 %v3187_v35  ;;  %v3178_v36 = vsel %vm1253_vm3, %v12936_v42, -inf }
 0x556   : > { %3179 = vmax.xlane.f32.xlu1 %v3178_v36 }
 0x559   : > { %3182 = vmax.xlane.f32.xlu0 %v3181_v7 }
 0x55b   : > { %v12944_v34 = vpop.f32.mrb[26].mxu1 }
 0x55c   : > { %v12946_v44 = vpop.f32.mrb[27].mxu1  ;;  %v3193_v55 = vsel %vm1253_vm3, %v12944_v34, -inf }
 0x55d   : > { %3194 = vmax.xlane.f32.xlu0 %v3193_v55  ;;  %v3190_v11 = vsel %vm1253_vm3, %v12946_v44, -inf }
 0x55e   : > { %3191 = vmax.xlane.f32.xlu1 %v3190_v11 }
 0x569   : > { %v3153_v35 = vpop.xlane.xlu0 %3152 }
 0x56a   : > { %v3197_v36 = vsub.f32 %v10105_v39, %v3153_v35 }
 0x56c   : > { %v3214_v10 = vmul.f32 1.442695, %v3197_v36 }
 0x56d   : > { %v3150_v7 = vpop.xlane.xlu0 %3149 }
 0x56e   : > { %v3196_v13 = vsub.f32 %v2502_v18, %v3150_v7  ;;  %11376 = vpow2.f32 %v3214_v10 }
 0x56f   : > { %11138 = vrot.lane.b32.xlu1 %v15543_v33, %s11703_s12 }
 0x570   : > { %v3212_v19 = vmul.f32 1.442695, %v3196_v13 }
 0x571   : > { %v3165_v0 = vpop.xlane.xlu1 %3164 }
 0x572   : > { %v3201_v52 = vsub.f32 %v10119_v47, %v3165_v0  ;;  %11378 = vpow2.f32 %v3212_v19 }
 0x573   : > { %11133 = vrot.lane.b32.xlu0 %v15544_v24, %s11703_s12 }
 0x574   : > { %v3222_v61 = vmul.f32 1.442695, %v3201_v52 }
 0x575   : > { %v3162_v55 = vpop.xlane.xlu1 %3161 }
 0x576   : > { %v3200_v9 = vsub.f32 %v2684_v22, %v3162_v55  ;;  %11380 = vpow2.f32 %v3222_v61 }
 0x578   : > { %v3220_v11 = vmul.f32 1.442695, %v3200_v9  ;;  %v12956_v49 = vpop.eup %11376 }
 0x579   : > { %v3247_v41 = vsel %vm1253_vm3, %v12956_v49, 0.0 }
 0x57a   : > { %11382 = vpow2.f32 %v3220_v11 }
 0x57c   : > { %v12960_v39 = vpop.eup %11378 }
 0x57d   : > { %v3244_v10 = vsel %vm1253_vm3, %v12960_v39, 0.0 }
 0x580   : > { %v12964_v13 = vpop.eup %11380 }
 0x581   : > { %v3259_v19 = vsel %vm1253_vm3, %v12964_v13, 0.0 }
 0x584   : > { %v12968_v61 = vpop.eup %11382 }
 0x585   : > { %v3256_v0 = vsel %vm1253_vm3, %v12968_v61, 0.0 }
 0x593   : > { %3248 = vadd.xlane.f32.xlu1 %v3247_v41 }
 0x597   : > { %3245 = vadd.xlane.f32.xlu1 %v3244_v10 }
 0x59b   : > { %3260 = vadd.xlane.f32.xlu1 %v3259_v19 }
 0x59f   : > { %3257 = vadd.xlane.f32.xlu1 %v3256_v0 }
 0x5d2   : > { %v3159_v9 = vpop.xlane.xlu0 %3158 }
 0x5d3   : > { %v3199_v52 = vsub.f32 %v12908_v32, %v3159_v9  ;;  %v3156_v41 = vpop.xlane.xlu1 %3155 }
 0x5d4   : > { %v3198_v18 = vsub.f32 %v12910_v63, %v3156_v41 }
 0x5d5   : > { %v3218_v47 = vmul.f32 1.442695, %v3199_v52 }
 0x5d6   : > { %v3216_v22 = vmul.f32 1.442695, %v3198_v18  ;;  %v3177_v35 = vpop.xlane.xlu0 %3176 }
 0x5d7   : > { %11384 = vpow2.f32 %v3218_v47  ;;  %v3205_v36 = vsub.f32 %v12900_v51, %v3177_v35  ;;  %v3174_v7 = vpop.xlane.xlu1 %3173 }
 0x5d8   : > { %v3204_v55 = vsub.f32 %v12904_v37, %v3174_v7  ;;  %11386 = vpow2.f32 %v3216_v22 }
 0x5d9   : > { %v3230_v11 = vmul.f32 1.442695, %v3205_v36 }
 0x5da   : > { %v3228_v10 = vmul.f32 1.442695, %v3204_v55  ;;  %v3171_v19 = vpop.xlane.xlu0 %3170 }
 0x5db   : > { %v3203_v0 = vsub.f32 %v12924_v58, %v3171_v19  ;;  %v3186_v59 = vpop.xlane.xlu1 %3185 }
 0x5dc   : > { %11388 = vpow2.f32 %v3228_v10  ;;  %v3208_v32 = vsub.f32 %v12918_v4, %v3186_v59 }
 0x5dd   : > { %11390 = vpow2.f32 %v3230_v11  ;;  %v3226_v63 = vmul.f32 1.442695, %v3203_v0 }
 0x5de   : > { %v3236_v9 = vmul.f32 1.442695, %v3208_v32  ;;  %v3168_v52 = vpop.xlane.xlu0 %3167 }
 0x5df   : > { %v3202_v41 = vsub.f32 %v12926_v14, %v3168_v52 }
 0x5e0   : > { %11392 = vpow2.f32 %v3236_v9 }
 0x5e1   : > { %v12979_v51 = vpop.eup %11384  ;;  %11394 = vpow2.f32 %v3226_v63  ;;  %v3224_v37 = vmul.f32 1.442695, %v3202_v41 }
 0x5e2   : > { %v3189_v18 = vpop.xlane.xlu0 %3188  ;;  %v3253_v47 = vsel %vm1253_vm3, %v12979_v51, 0.0  ;;  %v12983_v58 = vpop.eup %11386 }
 0x5e3   : > { %v3209_v22 = vsub.f32 %v12916_v16, %v3189_v18  ;;  %v3180_v59 = vpop.xlane.xlu1 %3179  ;;  %3254 = vadd.xlane.f32.xlu0 %v3253_v47  ;;  %11396 = vpow2.f32 %v3224_v37  ;;  %v3250_v55 = vsel %vm1253_vm3, %v12983_v58, 0.0 }
 0x5e4   : > { %v3206_v4 = vsub.f32 %v12936_v42, %v3180_v59 }
 0x5e5   : > { %v3238_v35 = vmul.f32 1.442695, %v3209_v22 }
 0x5e6   : > { %v12987_v14 = vpop.eup %11388  ;;  %v3232_v36 = vmul.f32 1.442695, %v3206_v4  ;;  %v3183_v7 = vpop.xlane.xlu0 %3182 }
 0x5e7   : > { %v12991_v11 = vpop.eup %11390  ;;  %v3207_v10 = vsub.f32 %v12934_v53, %v3183_v7  ;;  %3251 = vadd.xlane.f32.xlu0 %v3250_v55  ;;  %v3268_v16 = vsel %vm1253_vm3, %v12987_v14, 0.0 }
 0x5e8   : > { %11398 = vpow2.f32 %v3232_v36  ;;  %3269 = vadd.xlane.f32.xlu1 %v3268_v16  ;;  %v3271_v32 = vsel %vm1253_vm3, %v12991_v11, 0.0 }
 0x5e9   : > { %11400 = vpow2.f32 %v3238_v35  ;;  %v3234_v42 = vmul.f32 1.442695, %v3207_v10 }
 0x5ea   : > { %v12996_v19 = vpop.eup %11392  ;;  %v3195_v0 = vpop.xlane.xlu0 %3194 }
 0x5eb   : > { %v13000_v63 = vpop.eup %11394  ;;  %v3211_v9 = vsub.f32 %v12944_v34, %v3195_v0  ;;  %3272 = vadd.xlane.f32.xlu0 %v3271_v32  ;;  %v3192_v53 = vpop.xlane.xlu1 %3191  ;;  %v3280_v52 = vsel %vm1253_vm3, %v12996_v19, 0.0  ;;  %11402 = vpow2.f32 %v3234_v42  ;;  %v15545_v0 = vld [vmem:[#allocation14_spill] sm:$0xff]  ;;  %v15546_v32 = vld [vmem:[#allocation28_spill] sm:$0xff] }
 0x5ec   : > { %v3210_v41 = vsub.f32 %v12946_v44, %v3192_v53  ;;  %3281 = vadd.xlane.f32.xlu1 %v3280_v52  ;;  %v3265_v47 = vsel %vm1253_vm3, %v13000_v63, 0.0  ;;  %v15548_v53 = vld [vmem:[#allocation13_spill] sm:$0xff] }
 0x5ed   : > { %v3242_v37 = vmul.f32 1.442695, %v3211_v9  ;;  %v13008_v22 = vpop.eup %11396  ;;  %v15547_v9 = vld [vmem:[#allocation9_spill] sm:$0xff] }
 0x5ee   : > { %v3240_v18 = vmul.f32 1.442695, %v3210_v41  ;;  %v3262_v59 = vsel %vm1253_vm3, %v13008_v22, 0.0  ;;  %v15549_v41 = vld [vmem:[#allocation10_spill] sm:$0xff] }
 0x5ef   : > { %3266 = vadd.xlane.f32.xlu0 %v3265_v47  ;;  %v13044_v52 = vpop.permute.xlu1 %11138 }
 0x5f0   : > { %11404 = vpow2.f32 %v3240_v18  ;;  %v15550_v18 = vld [vmem:[#allocation15_spill] sm:$0xff] }
 0x5f1   : > { %11406 = vpow2.f32 %v3242_v37 }
 0x5f2   : > { %v13010_v34 = vpop.eup %11398 }
 0x5f3   : > { %v13014_v4 = vpop.eup %11400  ;;  %3263 = vadd.xlane.f32.xlu0 %v3262_v59  ;;  %v3274_v44 = vsel %vm1253_vm3, %v13010_v34, 0.0  ;;  %v15551_v59 = vld [vmem:[#allocation12_spill] sm:$0xff] }
 0x5f4   : > { %3275 = vadd.xlane.f32.xlu1 %v3274_v44  ;;  %v3283_v35 = vsel %vm1253_vm3, %v13014_v4, 0.0  ;;  %v15552_v44 = vld [vmem:[#allocation18_spill] sm:$0xff] }
 0x5f5   : > { %v13020_v36 = vpop.eup %11402 }
 0x5f6   : > { %v3277_v55 = vsel %vm1253_vm3, %v13020_v36, 0.0 }
 0x5f7   : > { %3284 = vadd.xlane.f32.xlu0 %v3283_v35 }
 0x5fa   : > { %v13022_v7 = vpop.eup %11404 }
 0x5fb   : > { %v13026_v10 = vpop.eup %11406  ;;  %3278 = vadd.xlane.f32.xlu0 %v3277_v55  ;;  %v3286_v16 = vsel %vm1253_vm3, %v13022_v7, 0.0  ;;  %v15553_v55 = vld [vmem:[#allocation16_spill] sm:$0xff] }
 0x5fc   : > { %3287 = vadd.xlane.f32.xlu1 %v3286_v16  ;;  %v3289_v42 = vsel %vm1253_vm3, %v13026_v10, 0.0  ;;  %v11134_v16 = vpop.permute.xlu0 %11133 }
 0x5fd   : > { %v11136_v29 = vunpack.i.h.bf16 %v11134_v16  ;;  %v11135_v20 = vunpack.i.l.bf16 %v11134_v16 }
 0x5ff   : > { %3290 = vadd.xlane.f32.xlu0 %v3289_v42  ;;  %v10691_v27 = vpack.c.bf16 %v11136_v29, %v11135_v20  ;;  %v15557_v29 = vld [vmem:[#allocation23_spill] sm:$0xff]  ;;  %v15558_v20 = vld [vmem:[#allocation29_spill] sm:$0xff] }
 0x60d   : > { %11148 = vrot.lane.b32.xlu1 %v12030_v62, %s11703_s12 }
 0x611   : > { %11158 = vrot.lane.b32.xlu1 %v15545_v0, %s11704_s24  ;;  %v13293_v0 = vld [vmem:[#allocation6] sm:$0xff] }
 0x615   : > { %11143 = vrot.lane.b32.xlu0 %v15546_v32, %s11703_s12  ;;  %4690 = vrot.lane.b32.xlu1 %v15547_v9, %s11705_s30 }
 0x619   : > { %11153 = vrot.lane.b32.xlu0 %v11958_v28, %s11704_s24  ;;  %4779 = vrot.lane.b32.xlu1 %v15548_v53, %s11705_s30 }
 0x61d   : > { %4688 = vrot.lane.b32.xlu0 %v15549_v41, %s11705_s30  ;;  %11168 = vrot.lane.b32.xlu1 %v11988_v43, %s11704_s24 }
 0x620   : > { %v3249_v37 = vpop.xlane.xlu1 %3248 }
 0x621   : > { %11163 = vrot.lane.b32.xlu0 %v11978_v38, %s11704_s24  ;;  %4872 = vrot.lane.b32.xlu1 %v15550_v18, %s11705_s30  ;;  %11408 = vrcp.f32 %v3249_v37  ;;  %v15554_v37 = vld [vmem:[#allocation20_spill] sm:$0xff] }
 0x624   : > { %v3246_v47 = vpop.xlane.xlu1 %3245 }
 0x625   : > { %11410 = vrcp.f32 %v3246_v47  ;;  %4781 = vrot.lane.b32.xlu0 %v15551_v59, %s11705_s30  ;;  %4961 = vrot.lane.b32.xlu1 %v15552_v44, %s11705_s30 }
 0x628   : > { %v3261_v35 = vpop.xlane.xlu1 %3260 }
 0x629   : > { %4870 = vrot.lane.b32.xlu0 %v15553_v55, %s11705_s30  ;;  %11178 = vrot.lane.b32.xlu1 %v15543_v33, %s11704_s24  ;;  %11412 = vrcp.f32 %v3261_v35  ;;  %v15555_v35 = vld [vmem:[#allocation17_spill] sm:$0xff] }
 0x62b   : > { %v11409_v47 = vpop.eup %11408 }
 0x62c   : > { %v3258_v42 = vpop.xlane.xlu1 %3257  ;;  %v13070_v48 = vmul.f32 %v11409_v47, %v12956_v49 }
 0x62d   : > { %11414 = vrcp.f32 %v3258_v42  ;;  %11173 = vrot.lane.b32.xlu0 %v15544_v24, %s11704_s24  ;;  %5054 = vrot.lane.b32.xlu1 %v15554_v37, %s11705_s30  ;;  %v15556_v42 = vld [vmem:[#allocation24_spill] sm:$0xff] }
 0x62f   : > { %v11411_v5 = vpop.eup %11410 }
 0x630   : > { %v13067_v50 = vmul.f32 %v11411_v5, %v12960_v39 }
 0x631   : > { %4963 = vrot.lane.b32.xlu0 %v15555_v35, %s11705_s30  ;;  %5143 = vrot.lane.b32.xlu1 %v15556_v42, %s11705_s30  ;;  %v3506_v35 = vrot.slane %v13070_v48, 2 }
 0x632   : > { %10159 = vmatprep.mubr.msk.f32.mxu0 %vm1253_vm3, %v13067_v50 }
 0x633   : > { %10160 = vmatmul.mubr.msk.f32.vlgmr.msra.gmra.mrb[36].mxu0 %vm1253_vm3, %v13070_v48  ;;  %v11413_v49 = vpop.eup %11412 }
 0x634   : > { %10686 = vmatpush3.bf16.msra.mxu0 %v12858_v12  ;;  %v13089_v16 = vmul.f32 %v11413_v49, %v12964_v13  ;;  %v15559_v12 = vld [vmem:[#allocation27_spill] sm:$0xff]  ;;  %v15560_v13 = vld [vmem:[#allocation30_spill] sm:$0xff]  ;;  %v11141_v49 = vunpack.i.h.bf16 %v13044_v52 }
 0x635   : > { %10692 = vmatprep.subr.bf16.mxu0 %v10691_v27  ;;  %5052 = vrot.lane.b32.xlu0 %v11992_v46, %s11705_s30  ;;  %v3489_v46 = vrot.slane %v13070_v48, 1 }
 0x636   : > { %11188 = vrot.lane.b32.xlu1 %v12030_v62, %s11704_s24  ;;  %v3491_v53 = vrot.slane %v13089_v16, 7 }
 0x637   : > { %v11415_v5 = vpop.eup %11414 }
 0x638   : > { %v13086_v39 = vmul.f32 %v11415_v5, %v12968_v61  ;;  %v11140_v5 = vunpack.i.l.bf16 %v13044_v52  ;;  %v3526_v52 = vrot.slane %v13089_v16, 1 }
 0x639   : > { %11183 = vrot.lane.b32.xlu0 %v15546_v32, %s11704_s24 }
 0x63a   : > { %5236 = vrot.lane.b32.xlu1 %v12012_v54, %s11705_s30  ;;  %10173 = vmatprep.mubr.msk.f32.mxu0 %vm1253_vm3, %v13086_v39  ;;  %v3349_v55 = vrot.slane %v13086_v39, 7  ;;  %v3384_v59 = vrot.slane %v13086_v39, 1 }
 0x63b   : > { %10174 = vmatmul.mubr.msk.f32.vlgmr.msra.gmra.mrb[38].mxu0 %vm1253_vm3, %v13089_v16 }
 0x63c   : > { %10694 = vmatpush3.bf16.msra.mxu0 %v10691_v27 }
 0x63d   : > { %5145 = vrot.lane.b32.xlu0 %v15557_v29, %s11705_s30  ;;  %v13111_v29 = vpack.c.bf16 %v11141_v49, %v11140_v5  ;;  %v3364_v49 = vrot.slane %v13067_v50, 2  ;;  %v3381_v5 = vrot.slane %v13067_v50, 3 }
 0x63e   : > { %5327 = vrot.lane.b32.xlu1 %v15558_v20, %s11705_s30 }
 0x641   : > { %5234 = vrot.lane.b32.xlu0 %v15559_v12, %s11705_s30 }
 0x642   : > { %11193 = vrot.lane.b32.xlu1 %v11958_v28, %s11706_s16 }
 0x645   : > { %5325 = vrot.lane.b32.xlu0 %v15560_v13, %s11705_s30 }
 0x670   : > { %v3255_v61 = vpop.xlane.xlu0 %3254 }
 0x671   : > { %11416 = vrcp.f32 %v3255_v61  ;;  %v3523_v61 = vrot.slane %v13070_v48, 3 }
 0x674   : > { %v3252_v47 = vpop.xlane.xlu0 %3251 }
 0x675   : > { %11418 = vrcp.f32 %v3252_v47  ;;  %v3270_v27 = vpop.xlane.xlu1 %3269  ;;  %v3540_v47 = vrot.slane %v13070_v48, 4 }
 0x676   : > { %11420 = vrcp.f32 %v3270_v27 }
 0x678   : > { %v3273_v20 = vpop.xlane.xlu0 %3272 }
 0x679   : > { %11422 = vrcp.f32 %v3273_v20  ;;  %v3282_v54 = vpop.xlane.xlu1 %3281 }
 0x67a   : > { %11424 = vrcp.f32 %v3282_v54  ;;  %v3347_v54 = vrot.slane %v13067_v50, 1 }
 0x67b   : > { %v11417_v18 = vpop.eup %11416 }
 0x67c   : > { %v13120_v27 = vmul.f32 %v11417_v18, %v12979_v51  ;;  %v3267_v20 = vpop.xlane.xlu0 %3266  ;;  %v3543_v51 = vrot.slane %v13089_v16, 2 }
 0x67d   : > { %11426 = vrcp.f32 %v3267_v20 }
 0x67e   : > { %v3490_v42 = vsel %vm1439_vm4, %v13120_v27, %v3489_v46  ;;  %v3507_v20 = vrot.slane %v13120_v27, 1  ;;  %v3524_v9 = vrot.slane %v13120_v27, 2  ;;  %v3541_v18 = vrot.slane %v13120_v27, 3 }
 0x67f   : > { %v11419_v62 = vpop.eup %11418 }
 0x680   : > { %v11421_v37 = vpop.eup %11420  ;;  %v13138_v12 = vmul.f32 %v11419_v62, %v12983_v58  ;;  %v3264_v44 = vpop.xlane.xlu0 %3263  ;;  %v3492_v62 = vsel %vm1442_vm5, %v3491_v53, %v3490_v42  ;;  %v3558_v53 = vrot.slane %v13120_v27, 4  ;;  %v3542_v33 = vsel %vm1439_vm4, %v3541_v18, %v3540_v47 }
 0x681   : > { %v13144_v41 = vmul.f32 %v11421_v37, %v12987_v14  ;;  %11428 = vrcp.f32 %v3264_v44  ;;  %v3276_v46 = vpop.xlane.xlu1 %3275  ;;  %v3508_v44 = vsel %vm1439_vm4, %v3507_v20, %v3506_v35  ;;  %v3525_v37 = vsel %vm1439_vm4, %v3524_v9, %v3523_v61 }
 0x682   : > { %11430 = vrcp.f32 %v3276_v46  ;;  %10166 = vmatprep.mubr.msk.f32.mxu1 %vm1253_vm3, %v13138_v12  ;;  %v3365_v58 = vrot.slane %v13138_v12, 1  ;;  %v3382_v43 = vrot.slane %v13138_v12, 2  ;;  %v3348_v14 = vsel %vm1439_vm4, %v13138_v12, %v3347_v54 }
 0x683   : > { %v11423_v32 = vpop.eup %11422  ;;  %10167 = vmatmul.mubr.msk.f32.vlgmr.msra.gmra.mrb[28].mxu1 %vm1253_vm3, %v13120_v27  ;;  %10187 = vmatprep.mubr.msk.f32.mxu0 %vm1253_vm3, %v13144_v41  ;;  %v3509_v35 = vsel %vm1442_vm5, %v13089_v16, %v3508_v44  ;;  %v3399_v20 = vrot.slane %v13138_v12, 3 }
 0x684   : > { %v11425_v42 = vpop.eup %11424  ;;  %v13163_v46 = vmul.f32 %v11423_v32, %v12991_v11  ;;  %10690 = vmatpush3.bf16.msra.mxu1 %v12865_v31  ;;  %v3285_v13 = vpop.xlane.xlu0 %3284  ;;  %v3366_v28 = vsel %vm1439_vm4, %v3365_v58, %v3364_v49  ;;  %v3383_v9 = vsel %vm1439_vm4, %v3382_v43, %v3381_v5  ;;  %v3350_v31 = vsel %vm1442_vm5, %v3349_v55, %v3348_v14 }
 0x685   : > { %v13170_v54 = vmul.f32 %v11425_v42, %v12996_v19  ;;  %11432 = vrcp.f32 %v3285_v13  ;;  %10696 = vmatprep.subr.bf16.mxu1 %v13111_v29  ;;  %v3353_v32 = vrot.slane %v13144_v41, 5  ;;  %v3527_v19 = vsel %vm1442_vm5, %v3526_v52, %v3525_v37 }
 0x686   : > { %10188 = vmatmul.mubr.msk.f32.vlgmr.msra.gmra.mrb[40].mxu0 %vm1253_vm3, %v13163_v46  ;;  %v3367_v43 = vsel %vm1442_vm5, %v13086_v39, %v3366_v28  ;;  %v13189_v55 = vsel %vm1442_vm5, %v3543_v51, %v3542_v33  ;;  %v3495_v52 = vrot.slane %v13163_v46, 5  ;;  %v3385_v18 = vsel %vm1442_vm5, %v3384_v59, %v3383_v9 }
 0x687   : > { %v11427_v61 = vpop.eup %11426  ;;  %10201 = vmatprep.mubr.msk.f32.mxu0 %vm1253_vm3, %v13170_v54  ;;  %v3357_v28 = vrot.slane %v13170_v54, 3  ;;  %v3512_v14 = vrot.slane %v13163_v46, 6  ;;  %v3529_v44 = vrot.slane %v13163_v46, 7  ;;  %v3374_v59 = vrot.slane %v13170_v54, 4 }
 0x688   : > { %v13192_v49 = vmul.f32 %v11427_v61, %v13000_v63  ;;  %v3279_v5 = vpop.xlane.xlu0 %3278 }
 0x689   : > { %11434 = vrcp.f32 %v3279_v5  ;;  %v3288_v58 = vpop.xlane.xlu1 %3287 }
 0x68a   : > { %11436 = vrcp.f32 %v3288_v58  ;;  %v3493_v33 = vrot.slane %v13192_v49, 6  ;;  %v3510_v63 = vrot.slane %v13192_v49, 7  ;;  %v3528_v51 = vsel %vm1445_vm6, %v13192_v49, %v3527_v19 }
 0x68b   : > { %v11429_v37 = vpop.eup %11428  ;;  %v13206_v42 = vsel %vm1448_vm7, %v3529_v44, %v3528_v51  ;;  %v15561_v19 = vrot.slane %v13067_v50, 4 }
 0x68c   : > { %v11431_v5 = vpop.eup %11430  ;;  %v13211_v58 = vmul.f32 %v11429_v37, %v13008_v22  ;;  %v3291_v11 = vpop.xlane.xlu0 %3290  ;;  %v3494_v24 = vsel %vm1445_vm6, %v3493_v33, %v3492_v62  ;;  %v3511_v47 = vsel %vm1445_vm6, %v3510_v63, %v3509_v35 }
 0x68d   : > { %v13218_v13 = vsel %vm1439_vm4, %v3399_v20, %v15561_v19  ;;  %v13221_v44 = vmul.f32 %v11431_v5, %v13010_v34  ;;  %11438 = vrcp.f32 %v3291_v11  ;;  %v11149_v51 = vpop.permute.xlu1 %11148  ;;  %v13224_v61 = vsel %vm1448_vm7, %v3495_v52, %v3494_v24 }
 0x68e   : > { %v13227_v22 = vsel %vm1448_vm7, %v3512_v14, %v3511_v47  ;;  %v11151_v37 = vunpack.i.h.bf16 %v11149_v51  ;;  %v11150_v62 = vunpack.i.l.bf16 %v11149_v51  ;;  %10180 = vmatprep.mubr.msk.f32.mxu1 %vm1253_vm3, %v13211_v58  ;;  %v3351_v35 = vrot.slane %v13211_v58, 6 }
 0x68f   : > { %v3368_v20 = vrot.slane %v13211_v58, 7  ;;  %v11433_v33 = vpop.eup %11432  ;;  %10181 = vmatmul.mubr.msk.f32.vlgmr.msra.gmra.mrb[30].mxu1 %vm1253_vm3, %v13192_v49  ;;  %v3355_v34 = vrot.slane %v13221_v44, 4  ;;  %v3386_v24 = vsel %vm1445_vm6, %v13211_v58, %v3385_v18  ;;  %v15562_v11 = vrot.slane %v13070_v48, 5 }
 0x690   : > { %v13247_v14 = vmul.f32 %v11433_v33, %v13014_v4  ;;  %10698 = vmatpush3.bf16.msra.mxu1 %v13111_v29  ;;  %v11144_v63 = vpop.permute.xlu0 %11143  ;;  %10194 = vmatprep.mubr.msk.f32.mxu1 %vm1253_vm3, %v13221_v44  ;;  %v10703_v5 = vpack.c.bf16 %v11151_v37, %v11150_v62  ;;  %v3352_v18 = vsel %vm1445_vm6, %v3351_v35, %v3350_v31  ;;  %v3372_v19 = vrot.slane %v13221_v44, 5 }
 0x691   : > { %v13243_v47 = vsel %vm1439_vm4, %v3558_v53, %v15562_v11  ;;  %v11146_v51 = vunpack.i.h.bf16 %v11144_v63  ;;  %v11145_v9 = vunpack.i.l.bf16 %v11144_v63  ;;  %v3354_v53 = vsel %vm1448_vm7, %v3353_v32, %v3352_v18 }
 0x692   : > { %v3369_v11 = vsel %vm1445_vm6, %v3368_v20, %v3367_v43  ;;  %10704 = vmatprep.subr.bf16.mxu1 %v10703_v5  ;;  %v3356_v4 = vsel %vm1451_vm8, %v3355_v34, %v3354_v53  ;;  %v3389_v29 = vrot.slane %v13221_v44, 6  ;;  %v3545_v33 = vrot.slane %v13192_v49, 1 }
 0x693   : > { %v11435_v37 = vpop.eup %11434  ;;  %v10699_v62 = vpack.c.bf16 %v11146_v51, %v11145_v9  ;;  %v3499_v31 = vrot.slane %v13247_v14, 3  ;;  %v3358_v35 = vsel %vm1454_vm9, %v3357_v28, %v3356_v4  ;;  %v15563_v63 = vrot.slane %v13144_v41, 6  ;;  %v336_v4 = vld [vmem:[#allocation6 + $0x8] sm:$0xff] }
 0x694   : > { %v11437_v43 = vpop.eup %11436  ;;  %v13266_v20 = vmul.f32 %v11435_v37, %v13020_v36  ;;  %v11154_v34 = vpop.permute.xlu0 %11153  ;;  %v3516_v18 = vrot.slane %v13247_v14, 4  ;;  %v3533_v52 = vrot.slane %v13247_v14, 5 }
 0x695   : > { %v3371_v32 = vsel %vm1448_vm7, %v15563_v63, %v3369_v11  ;;  %v13272_v9 = vmul.f32 %v11437_v43, %v13022_v7  ;;  %v11156_v51 = vunpack.i.h.bf16 %v11154_v34  ;;  %v11155_v28 = vunpack.i.l.bf16 %v11154_v34  ;;  %10700 = vmatprep.subr.bf16.mxu0 %v10699_v62 }
 0x696   : > { %v3373_v53 = vsel %vm1451_vm8, %v3372_v19, %v3371_v32  ;;  %10195 = vmatmul.mubr.msk.f32.vlgmr.msra.gmra.mrb[32].mxu1 %vm1253_vm3, %v13266_v20  ;;  %10702 = vmatpush3.bf16.msra.mxu0 %v10699_v62  ;;  %v3497_v36 = vrot.slane %v13266_v20, 4  ;;  %v3514_v37 = vrot.slane %v13266_v20, 5  ;;  %v3531_v19 = vrot.slane %v13266_v20, 6 }
 0x697   : > { %v3375_v11 = vsel %vm1454_vm9, %v3374_v59, %v3373_v53  ;;  %v15564_v63 = vrot.slane %v13144_v41, 7  ;;  %v11439_v32 = vpop.eup %11438  ;;  %v13283_v43 = vpack.c.bf16 %v11156_v51, %v11155_v28  ;;  %10706 = vmatpush3.bf16.msra.mxu1 %v10703_v5  ;;  %10208 = vmatprep.mubr.msk.f32.mxu1 %vm1253_vm3, %v13272_v9  ;;  %v3359_v59 = vrot.slane %v13272_v9, 2 }
 0x698   : > { %v3376_v62 = vrot.slane %v13272_v9, 3  ;;  %v13291_v53 = vmul.f32 %v11439_v32, %v13026_v10  ;;  %10867 = vmatprep.subr.mxu1 %v336_v4  ;;  %10211 = vmatprep.subr.mxu0 %v336_v4  ;;  %v3515_v5 = vsel %vm1451_vm8, %v3514_v37, %v13227_v22  ;;  %v3393_v51 = vrot.slane %v13272_v9, 4 }
 0x699   : > { %v3388_v7 = vsel %vm1448_vm7, %v15564_v63, %v3386_v24  ;;  %v3498_v24 = vsel %vm1451_vm8, %v3497_v36, %v13224_v61  ;;  %10202 = vmatmul.mubr.msk.f32.vlgmr.msra.gmra.mrb[42].mxu0 %vm1253_vm3, %v13247_v14  ;;  %v13304_v10 = vsel %vm1457_vm10, %v3359_v59, %v3358_v35  ;;  %v3517_v28 = vsel %vm1454_vm9, %v3516_v18, %v3515_v5 }
 0x69a   : > { %v3390_v34 = vsel %vm1451_vm8, %v3389_v29, %v3388_v7  ;;  %v3500_v29 = vsel %vm1454_vm9, %v3499_v31, %v3498_v24  ;;  %v13308_v63 = vsel %vm1457_vm10, %v3376_v62, %v3375_v11  ;;  %10209 = vmatmul.mubr.msk.f32.vlgmr.msra.gmra.mrb[34].mxu1 %vm1253_vm3, %v13291_v53  ;;  %10212 = vmatpush3.msra.mxu0 %v336_v4  ;;  %v3501_v61 = vrot.slane %v13291_v53, 2 }
 0x69b   : > { %15565 = vst [vmem:[#allocation48_spill] sm:$0xff] %v13308_v63  ;;  %v3518_v22 = vrot.slane %v13291_v53, 3  ;;  %v3532_v36 = vsel %vm1451_vm8, %v3531_v19, %v13206_v42  ;;  %v3535_v31 = vrot.slane %v13291_v53, 4  ;;  %10868 = vmatpush3.msra.mxu1 %v336_v4  ;;  %10237 = vmatprep.subr.mxu0 %v13293_v0  ;;  %v15566_v18 = vrot.slane %v13170_v54, 5 }
 0x69c   : > { %v3534_v35 = vsel %vm1454_vm9, %v3533_v52, %v3532_v36  ;;  %v3546_v37 = vsel %vm1445_vm6, %v3545_v33, %v13189_v55  ;;  %v3548_v7 = vrot.slane %v13266_v20, 7  ;;  %10709 = vmatprep.subr.msk.bf16.mxu1 %vm12048_vm2, %v13283_v43  ;;  %v13329_v42 = vsel %vm1457_vm10, %v3501_v61, %v3500_v29 }
 0x69d   : > { %v3392_v11 = vsel %vm1454_vm9, %v15566_v18, %v3390_v34  ;;  %v13332_v4 = vsel %vm1457_vm10, %v3518_v22, %v3517_v28  ;;  %v13335_v52 = vsel %vm1457_vm10, %v3535_v31, %v3534_v35  ;;  %v3547_v55 = vsel %vm1448_vm7, %v13163_v46, %v3546_v37 }
 0x69e   : > { %15567 = vst [vmem:[#allocation49_spill] sm:$0xff] %v13335_v52  ;;  %v13338_v19 = vsel %vm1457_vm10, %v3393_v51, %v3392_v11  ;;  %v3550_v33 = vrot.slane %v13247_v14, 6  ;;  %v3562_v32 = vrot.slane %v13192_v49, 2  ;;  %v15569_v59 = vrot.slane %v13067_v50, 5 }
 0x69f   : > { %15568 = vst [vmem:[#allocation50_spill] sm:$0xff] %v13338_v19  ;;  %v15570_v62 = vrot.slane %v13138_v12, 4  ;;  %v3549_v24 = vsel %vm1451_vm8, %v3548_v7, %v3547_v55  ;;  %v3552_v5 = vrot.slane %v13291_v53, 5  ;;  %v15571_v51 = vrot.slane %v13086_v39, 2 }
 0x6a0   : > { %v3564_v28 = vrot.slane %v13163_v46, 1  ;;  %v3551_v61 = vsel %vm1454_vm9, %v3550_v33, %v3549_v24  ;;  %v15572_v22 = vrot.slane %v13211_v58, 1  ;;  %v3406_v31 = vrot.slane %v13221_v44, 7 }
 0x6a1   : > { %v3417_v34 = vsel %vm1439_vm4, %v15570_v62, %v15569_v59  ;;  %v3402_v29 = vsel %vm1442_vm5, %v15571_v51, %v13218_v13  ;;  %v15573_v35 = vrot.slane %v13089_v16, 3  ;;  %v13366_v11 = vsel %vm1457_vm10, %v3552_v5, %v3551_v61 }
 0x6a2   : > { %v3404_v36 = vsel %vm1445_vm6, %v15572_v22, %v3402_v29  ;;  %15574 = vst [vmem:[#allocation51_spill] sm:$0xff] %v13366_v11  ;;  %v3410_v37 = vrot.slane %v13272_v9, 5  ;;  %v15575_v7 = vrot.slane %v13086_v39, 3  ;;  %v3567_v62 = vrot.slane %v13247_v14, 7 }
 0x6a3   : > { %v3561_v18 = vsel %vm1442_vm5, %v15573_v35, %v13243_v47  ;;  %v3405_v13 = vsel %vm1448_vm7, %v13144_v41, %v3404_v36  ;;  %v3569_v47 = vrot.slane %v13291_v53, 6  ;;  %v15576_v24 = vrot.slane %v13170_v54, 6 }
 0x6a4   : > { %v3419_v55 = vsel %vm1442_vm5, %v15575_v7, %v3417_v34  ;;  %v3407_v33 = vsel %vm1451_vm8, %v3406_v31, %v3405_v13  ;;  %v3563_v59 = vsel %vm1445_vm6, %v3562_v32, %v3561_v18  ;;  %v3420_v29 = vrot.slane %v13211_v58, 2 }
 0x6a5   : > { %v3409_v5 = vsel %vm1454_vm9, %v15576_v24, %v3407_v33  ;;  %v3565_v51 = vsel %vm1448_vm7, %v3564_v28, %v3563_v59  ;;  %v3422_v61 = vrot.slane %v13144_v41, 1  ;;  %v3425_v22 = vrot.slane %v13170_v54, 7 }
 0x6a6   : > { %v13385_v34 = vsel %vm1457_vm10, %v3410_v37, %v3409_v5  ;;  %v3566_v32 = vsel %vm1451_vm8, %v13266_v20, %v3565_v51  ;;  %v3427_v36 = vrot.slane %v13272_v9, 6  ;;  %v3421_v35 = vsel %vm1445_vm6, %v3420_v29, %v3419_v55 }
 0x6a7   : > { %15577 = vst [vmem:[#allocation52_spill] sm:$0xff] %v13385_v34  ;;  %v3568_v31 = vsel %vm1454_vm9, %v3567_v62, %v3566_v32  ;;  %v15578_v28 = vrot.slane %v13070_v48, 6  ;;  %v15579_v18 = vrot.slane %v13120_v27, 5  ;;  %v3579_v37 = vrot.slane %v13192_v49, 3 }
 0x6a8   : > { %v13400_v7 = vsel %vm1457_vm10, %v3569_v47, %v3568_v31  ;;  %v3423_v33 = vsel %vm1448_vm7, %v3422_v61, %v3421_v35  ;;  %v15581_v59 = vrot.slane %v13089_v16, 4  ;;  %v3581_v62 = vrot.slane %v13163_v46, 2 }
 0x6a9   : > { %v3576_v13 = vsel %vm1439_vm4, %v15579_v18, %v15578_v28  ;;  %15580 = vst [vmem:[#allocation53_spill] sm:$0xff] %v13400_v7  ;;  %v3424_v55 = vsel %vm1451_vm8, %v13221_v44, %v3423_v33  ;;  %v3583_v51 = vrot.slane %v13266_v20, 1  ;;  %v3586_v29 = vrot.slane %v13291_v53, 7  ;;  %v15623_v7 = vld [vmem:[#allocation29_spill] sm:$0xff] }
 0x6aa   : > { %v3578_v24 = vsel %vm1442_vm5, %v15581_v59, %v3576_v13  ;;  %v3426_v47 = vsel %vm1454_vm9, %v3425_v22, %v3424_v55  ;;  %v3433_v61 = vrot.slane %v13138_v12, 5  ;;  %v3437_v31 = vrot.slane %v13211_v58, 3 }
 0x6ab   : > { %v3580_v5 = vsel %vm1445_vm6, %v3579_v37, %v3578_v24  ;;  %v13417_v35 = vsel %vm1457_vm10, %v3427_v36, %v3426_v47  ;;  %v3435_v18 = vrot.slane %v13086_v39, 4  ;;  %v15583_v37 = vrot.slane %v13067_v50, 6 }
 0x6ac   : > { %v3582_v32 = vsel %vm1448_vm7, %v3581_v62, %v3580_v5  ;;  %15582 = vst [vmem:[#allocation54_spill] sm:$0xff] %v13417_v35  ;;  %v3441_v33 = vrot.slane %v13221_v44, 1  ;;  %v3591_v59 = vrot.slane %v13070_v48, 7  ;;  %v3439_v62 = vrot.slane %v13144_v41, 2 }
 0x6ad   : > { %v3584_v28 = vsel %vm1451_vm8, %v3583_v51, %v3582_v32  ;;  %v3434_v22 = vsel %vm1439_vm4, %v3433_v61, %v15583_v37  ;;  %v3444_v5 = vrot.slane %v13272_v9, 7  ;;  %v15585_v51 = vrot.slane %v13120_v27, 6 }
 0x6ae   : > { %v3585_v13 = vsel %vm1454_vm9, %v13247_v14, %v3584_v28  ;;  %v3436_v36 = vsel %vm1442_vm5, %v3435_v18, %v3434_v22  ;;  %v3594_v32 = vrot.slane %v13089_v16, 5  ;;  %v3596_v28 = vrot.slane %v13192_v49, 4 }
 0x6af   : > { %v13429_v24 = vsel %vm1457_vm10, %v3586_v29, %v3585_v13  ;;  %v3438_v55 = vsel %vm1445_vm6, %v3437_v31, %v3436_v36  ;;  %v3593_v47 = vsel %vm1439_vm4, %v15585_v51, %v3591_v59  ;;  %v3449_v29 = vrot.slane %v13067_v50, 7 }
 0x6b0   : > { %15584 = vst [vmem:[#allocation55_spill] sm:$0xff] %v13429_v24  ;;  %v3440_v61 = vsel %vm1448_vm7, %v3439_v62, %v3438_v55  ;;  %v3452_v18 = vrot.slane %v13086_v39, 5  ;;  %v3595_v31 = vsel %vm1442_vm5, %v3594_v32, %v3593_v47  ;;  %v3598_v37 = vrot.slane %v13163_v46, 3 }
 0x6b1   : > { %v3442_v13 = vsel %vm1451_vm8, %v3441_v33, %v3440_v61  ;;  %v3600_v22 = vrot.slane %v13266_v20, 2  ;;  %v3597_v36 = vsel %vm1445_vm6, %v3596_v28, %v3595_v31  ;;  %v3450_v62 = vrot.slane %v13138_v12, 6 }
 0x6b2   : > { %v3443_v59 = vsel %vm1454_vm9, %v13170_v54, %v3442_v13  ;;  %v3454_v55 = vrot.slane %v13211_v58, 4  ;;  %v3599_v33 = vsel %vm1448_vm7, %v3598_v37, %v3597_v36  ;;  %v3602_v47 = vrot.slane %v13247_v14, 1 }
 0x6b3   : > { %v13453_v51 = vsel %vm1457_vm10, %v3444_v5, %v3443_v59  ;;  %v3334_v32 = vrot.slane %v13086_v39, 6  ;;  %v3601_v61 = vsel %vm1451_vm8, %v3600_v22, %v3599_v33  ;;  %v3451_v24 = vsel %vm1439_vm4, %v3450_v62, %v3449_v29 }
 0x6b4   : > { %15586 = vst [vmem:[#allocation56_spill] sm:$0xff] %v13453_v51  ;;  %v3458_v13 = vrot.slane %v13221_v44, 2  ;;  %v3332_v28 = vrot.slane %v13138_v12, 7  ;;  %v3603_v31 = vsel %vm1454_vm9, %v3602_v47, %v3601_v61  ;;  %v3453_v35 = vsel %vm1442_vm5, %v3452_v18, %v3451_v24 }
 0x6b5   : > { %v3456_v5 = vrot.slane %v13144_v41, 3  ;;  %v3336_v37 = vrot.slane %v13211_v58, 5  ;;  %v13468_v59 = vsel %vm1457_vm10, %v13291_v53, %v3603_v31  ;;  %v3455_v39 = vsel %vm1445_vm6, %v3454_v55, %v3453_v35 }
 0x6b6   : > { %15587 = vst [vmem:[#allocation57_spill] sm:$0xff] %v13468_v59  ;;  %v3333_v29 = vsel %vm1439_vm4, %v3332_v28, %v13067_v50  ;;  %v3340_v22 = vrot.slane %v13221_v44, 3  ;;  %v3460_v36 = vrot.slane %v13170_v54, 1  ;;  %v3338_v18 = vrot.slane %v13144_v41, 4 }
 0x6b7   : > { %v3457_v12 = vsel %vm1448_vm7, %v3456_v5, %v3455_v39  ;;  %v3335_v24 = vsel %vm1442_vm5, %v3334_v32, %v3333_v29  ;;  %v3344_v33 = vrot.slane %v13272_v9, 1  ;;  %v3474_v35 = vrot.slane %v13120_v27, 7 }
 0x6b8   : > { %v3459_v58 = vsel %vm1451_vm8, %v3458_v13, %v3457_v12  ;;  %v3337_v62 = vsel %vm1445_vm6, %v3336_v37, %v3335_v24  ;;  %v3342_v55 = vrot.slane %v13170_v54, 2  ;;  %v3478_v47 = vrot.slane %v13192_v49, 5  ;;  %v11159_v37 = vpop.permute.xlu1 %11158 }
 0x6b9   : > { %v3461_v50 = vsel %vm1454_vm9, %v3460_v36, %v3459_v58  ;;  %v3339_v44 = vsel %vm1448_vm7, %v3338_v18, %v3337_v62  ;;  %v3476_v61 = vrot.slane %v13089_v16, 6  ;;  %v3475_v27 = vsel %vm1439_vm4, %v3474_v35, %v13070_v48 }
 0x6ba   : > { %v13488_v32 = vsel %vm1457_vm10, %v13272_v9, %v3461_v50  ;;  %v3341_v41 = vsel %vm1451_vm8, %v3340_v22, %v3339_v44  ;;  %v3480_v49 = vrot.slane %v13163_v46, 4  ;;  %v3482_v31 = vrot.slane %v13266_v20, 3 }
 0x6bb   : > { %15588 = vst [vmem:[#allocation58_spill] sm:$0xff] %v13488_v32  ;;  %v3343_v13 = vsel %vm1454_vm9, %v3342_v55, %v3341_v41  ;;  %v3477_v54 = vsel %vm1442_vm5, %v3476_v61, %v3475_v27  ;;  %v3486_v5 = vrot.slane %v13291_v53, 1  ;;  %v3484_v39 = vrot.slane %v13247_v14, 2 }
 0x6bc   : > { %v13496_v28 = vsel %vm1457_vm10, %v3344_v33, %v3343_v13  ;;  %v3479_v9 = vsel %vm1445_vm6, %v3478_v47, %v3477_v54  ;;  %v13510_v12 = vpop.permute.xlu1 %4690 }
 0x6bd   : > { %15589 = vst [vmem:[#allocation59_spill] sm:$0xff] %v13496_v28  ;;  %v3481_v16 = vsel %vm1448_vm7, %v3480_v49, %v3479_v9  ;;  %v11161_v9 = vunpack.i.h.bf16 %v11159_v37 }
 0x6be   : > { %v3483_v48 = vsel %vm1451_vm8, %v3482_v31, %v3481_v16 }
 0x6bf   : > { %v3485_v29 = vsel %vm1454_vm9, %v3484_v39, %v3483_v48 }
 0x6c0   : > { %v13508_v22 = vsel %vm1457_vm10, %v3486_v5, %v3485_v29  ;;  %v13512_v46 = vpop.permute.xlu1 %4779 }
 0x6c1   : > { %15590 = vst [vmem:[#allocation60_spill] sm:$0xff] %v13508_v22 }
 0x6c4   : > { %v13514_v20 = vpop.permute.xlu1 %11168 }
 0x6c8   : > { %v13516_v36 = vpop.permute.xlu1 %4872 }
 0x6cc   : > { %v13518_v53 = vpop.permute.xlu1 %4961 }
 0x6d0   : > { %v13520_v24 = vpop.permute.xlu1 %11178 }
 0x6d4   : > { %v13522_v14 = vpop.permute.xlu1 %5054 }
 0x6d8   : > { %v13524_v18 = vpop.permute.xlu1 %5143 }
 0x6dc   : > { %v13526_v58 = vpop.permute.xlu1 %11188 }
 0x6e0   : > { %v13528_v62 = vpop.permute.xlu1 %5236 }
 0x6e4   : > { %v13530_v33 = vpop.permute.xlu1 %5327 }
 0x6e8   : > { %v11194_v35 = vpop.permute.xlu1 %11193 }
 0x6e9   : > { %v11196_v50 = vunpack.i.h.bf16 %v11194_v35  ;;  %v11195_v44 = vunpack.i.l.bf16 %v11194_v35  ;;  %v11180_v35 = vunpack.i.l.bf16 %v13520_v24 }
 0x6eb   : > { %v10755_v41 = vpack.c.bf16 %v11196_v50, %v11195_v44 }
 0x706   : > { %v10161_v55 = vpop.f32.mrb[36].mxu0 }
 0x707   : > { %v3698_v47 = vpop.f32.mrb[37].mxu0 }
 0x708   : > { %10213 = vmatprep.mubr.msk.f32.mxu0 %vm546_vm1, %v3698_v47  ;;  %v11191_v47 = vunpack.i.h.bf16 %v13526_v58 }
 0x709   : > { %10214 = vmatmul.mubr.msk.f32.vlgmr.msra.gmra.mrb[44].mxu0 %vm546_vm1, %v10161_v55 }
 0x70a   : > { %10238 = vmatpush3.msra.mxu0 %v13293_v0  ;;  %v11160_v0 = vunpack.i.l.bf16 %v11159_v37 }
 0x70b   : > { %10756 = vmatprep.subr.bf16.mxu0 %v10755_v41 }
 0x70c   : > { %v10713_v39 = vpack.c.bf16 %v11161_v9, %v11160_v0 }
 0x70e   : > { %v10175_v61 = vpop.f32.mrb[38].mxu0 }
 0x70f   : > { %v3868_v13 = vpop.f32.mrb[39].mxu0 }
 0x756   : > { %v10168_v27 = vpop.f32.mrb[28].mxu1 }
 0x757   : > { %v3783_v54 = vpop.f32.mrb[29].mxu1 }
 0x758   : > { %10216 = vmatprep.mubr.msk.f32.mxu0 %vm546_vm1, %v3783_v54 }
 0x759   : > { %v10189_v49 = vpop.f32.mrb[40].mxu0  ;;  %10217 = vmatmul.mubr.msk.f32.gmra.mrb[46].mxu0 %vm546_vm1, %v10168_v27 }
 0x75a   : > { %v4038_v31 = vpop.f32.mrb[41].mxu0  ;;  %10219 = vmatprep.mubr.msk.f32.mxu0 %vm546_vm1, %v3868_v13 }
 0x75d   : > { %10220 = vmatmul.mubr.msk.f32.gmra.mrb[48].mxu0 %vm546_vm1, %v10175_v61 }
 0x75e   : > { %10239 = vmatprep.mubr.msk.f32.mxu0 %vm546_vm1, %v12870_v21 }
 0x761   : > { %10240 = vmatmul.mubr.msk.f32.vlgmr.msra.gmra.mrb[44].mxu0 %vm546_vm1, %v12868_v3  ;;  %v4689_v3 = vpop.permute.xlu0 %4688 }
 0x762   : > { %10758 = vmatpush3.bf16.msra.mxu0 %v10755_v41  ;;  %v10182_v5 = vpop.f32.mrb[30].mxu1  ;;  %10242 = vmatprep.mubr.msk.f32.mxu0 %vm546_vm1, %v12874_v60  ;;  %v11190_v41 = vunpack.i.l.bf16 %v13526_v58 }
 0x763   : > { %v3953_v16 = vpop.f32.mrb[31].mxu1 }
 0x764   : > { %10222 = vmatprep.mubr.msk.f32.mxu1 %vm546_vm1, %v3953_v16  ;;  %v10749_v61 = vpack.c.bf16 %v11191_v47, %v11190_v41 }
 0x765   : > { %10223 = vmatmul.mubr.msk.f32.vlgmr.msra.gmra.mrb[36].mxu1 %vm546_vm1, %v10182_v5  ;;  %10243 = vmatmul.mubr.msk.f32.gmra.mrb[46].mxu0 %vm546_vm1, %v12872_v6 }
 0x766   : > { %10712 = vmatpush3.bf16.xpose.msk.msra.mxu1 %vm12048_vm2, %v13283_v43  ;;  %10225 = vmatprep.mubr.msk.f32.mxu1 %vm546_vm1, %v4038_v31 }
 0x767   : > { %10245 = vmatprep.mubr.msk.f32.mxu0 %vm546_vm1, %v12878_v30  ;;  %10715 = vmatprep.subr.msk.bf16.mxu1 %vm12048_vm2, %v10713_v39  ;;  %v11164_v30 = vpop.permute.xlu0 %11163 }
 0x769   : > { %v10196_v21 = vpop.f32.mrb[32].mxu1  ;;  %10226 = vmatmul.mubr.msk.f32.gmra.mrb[38].mxu1 %vm546_vm1, %v10189_v49  ;;  %10246 = vmatmul.mubr.msk.f32.gmra.mrb[48].mxu0 %vm546_vm1, %v12876_v1 }
 0x76a   : > { %v4123_v6 = vpop.f32.mrb[33].mxu1  ;;  %10248 = vmatprep.mubr.msk.f32.mxu0 %vm546_vm1, %v12886_v25  ;;  %v11166_v25 = vunpack.i.h.bf16 %v11164_v30 }
 0x76b   : > { %10228 = vmatprep.mubr.msk.f32.mxu1 %vm546_vm1, %v4123_v6  ;;  %v4782_v1 = vpop.permute.xlu0 %4781 }
 0x76c   : > { %v10203_v60 = vpop.f32.mrb[42].mxu0 }
 0x76d   : > { %v4208_v43 = vpop.f32.mrb[43].mxu0  ;;  %v10210_v37 = vpop.f32.mrb[34].mxu1  ;;  %10229 = vmatmul.mubr.msk.f32.gmra.mrb[40].mxu1 %vm546_vm1, %v10196_v21  ;;  %10249 = vmatmul.mubr.msk.f32.gmra.mrb[50].mxu0 %vm546_vm1, %v12882_v17  ;;  %v11165_v17 = vunpack.i.l.bf16 %v11164_v30 }
 0x76e   : > { %v4293_v48 = vpop.f32.mrb[35].mxu1  ;;  %10231 = vmatprep.mubr.msk.f32.mxu1 %vm546_vm1, %v4208_v43  ;;  %10251 = vmatprep.mubr.msk.f32.mxu0 %vm546_vm1, %v12884_v57 }
 0x76f   : > { %v10719_v57 = vpack.c.bf16 %v11166_v25, %v11165_v17 }
 0x771   : > { %10232 = vmatmul.mubr.msk.f32.gmra.mrb[42].mxu1 %vm546_vm1, %v10203_v60  ;;  %10252 = vmatmul.mubr.msk.f32.gmra.mrb[52].mxu0 %vm546_vm1, %v12880_v45  ;;  %v4871_v45 = vpop.permute.xlu0 %4870 }
 0x772   : > { %10234 = vmatprep.mubr.msk.f32.mxu1 %vm546_vm1, %v4293_v48  ;;  %10254 = vmatprep.mubr.msk.f32.mxu0 %vm546_vm1, %v12898_v23 }
 0x775   : > { %10235 = vmatmul.mubr.msk.f32.gmra.mrb[44].mxu1 %vm546_vm1, %v10210_v37  ;;  %10255 = vmatmul.mubr.msk.f32.gmra.mrb[54].mxu0 %vm546_vm1, %v12896_v8  ;;  %v11174_v8 = vpop.permute.xlu0 %11173 }
 0x776   : > { %10257 = vmatprep.mubr.msk.f32.mxu0 %vm546_vm1, %v12890_v26  ;;  %10267 = vmatprep.mubr.msk.f32.mxu1 %vm546_vm1, %v4689_v3  ;;  %v11171_v26 = vunpack.i.h.bf16 %v13514_v20  ;;  %v11175_v29 = vunpack.i.l.bf16 %v11174_v8 }
 0x779   : > { %10258 = vmatmul.mubr.msk.f32.gmra.mrb[56].mxu0 %vm546_vm1, %v12888_v56  ;;  %10268 = vmatmul.mubr.msk.f32.vlgmr.msra.gmra.mrb[46].mxu1 %vm546_vm1, %v13510_v12  ;;  %v11170_v56 = vunpack.i.l.bf16 %v13514_v20  ;;  %v4964_v12 = vpop.permute.xlu0 %4963  ;;  %v11181_v20 = vunpack.i.h.bf16 %v13520_v24 }
 0x77a   : > { %10718 = vmatpush3.bf16.xpose.msk.msra.mxu1 %vm12048_vm2, %v10713_v39  ;;  %10260 = vmatprep.mubr.msk.f32.mxu0 %vm546_vm1, %v12906_v15  ;;  %v11176_v15 = vunpack.i.h.bf16 %v11174_v8 }
 0x77b   : > { %10274 = vmatprep.mubr.msk.f32.mxu1 %vm546_vm1, %v13512_v46  ;;  %10721 = vmatprep.subr.msk.bf16.mxu1 %vm12048_vm2, %v10719_v57  ;;  %v10725_v23 = vpack.c.bf16 %v11171_v26, %v11170_v56  ;;  %v10737_v50 = vpack.c.bf16 %v11181_v20, %v11180_v35 }
 0x77c   : > { %v10731_v46 = vpack.c.bf16 %v11176_v15, %v11175_v29 }
 0x77d   : > { %10261 = vmatmul.mubr.msk.f32.gmra.mrb[58].mxu0 %vm546_vm1, %v12902_v40  ;;  %v5053_v40 = vpop.permute.xlu0 %5052 }
 0x781   : > { %10275 = vmatmul.mubr.msk.f32.vlgmr.msra.gmra.mrb[48].mxu1 %vm546_vm1, %v4782_v1  ;;  %v11184_v44 = vpop.permute.xlu0 %11183 }
 0x782   : > { %10724 = vmatpush3.bf16.xpose.msk.msra.mxu1 %vm12048_vm2, %v10719_v57  ;;  %10281 = vmatprep.mubr.msk.f32.mxu1 %vm546_vm1, %v4871_v45 }
 0x783   : > { %10727 = vmatprep.subr.msk.bf16.mxu1 %vm12048_vm2, %v10725_v23 }
 0x785   : > { %v5146_v24 = vpop.permute.xlu0 %5145 }
 0x789   : > { %10282 = vmatmul.mubr.msk.f32.vlgmr.msra.gmra.mrb[50].mxu1 %vm546_vm1, %v13516_v36  ;;  %v11186_v36 = vunpack.i.h.bf16 %v11184_v44  ;;  %v5235_v13 = vpop.permute.xlu0 %5234 }
 0x78a   : > { %10730 = vmatpush3.bf16.xpose.msk.msra.mxu1 %vm12048_vm2, %v10725_v23  ;;  %10288 = vmatprep.mubr.msk.f32.mxu1 %vm546_vm1, %v13518_v53  ;;  %v11185_v53 = vunpack.i.l.bf16 %v11184_v44 }
 0x78b   : > { %10733 = vmatprep.subr.msk.bf16.mxu1 %vm12048_vm2, %v10731_v46 }
 0x78c   : > { %v10743_v55 = vpack.c.bf16 %v11186_v36, %v11185_v53 }
 0x791   : > { %10289 = vmatmul.mubr.msk.f32.vlgmr.msra.gmra.mrb[52].mxu1 %vm546_vm1, %v4964_v12 }
 0x792   : > { %10736 = vmatpush3.bf16.xpose.msk.msra.mxu1 %vm12048_vm2, %v10731_v46  ;;  %10295 = vmatprep.mubr.msk.f32.mxu1 %vm546_vm1, %v5053_v40 }
 0x793   : > { %10739 = vmatprep.subr.msk.bf16.mxu1 %vm12048_vm2, %v10737_v50 }
 0x799   : > { %10296 = vmatmul.mubr.msk.f32.vlgmr.msra.gmra.mrb[54].mxu1 %vm546_vm1, %v13522_v14  ;;  %v5326_v14 = vpop.permute.xlu0 %5325 }
 0x79a   : > { %10742 = vmatpush3.bf16.xpose.msk.msra.mxu1 %vm12048_vm2, %v10737_v50  ;;  %10302 = vmatprep.mubr.msk.f32.mxu1 %vm546_vm1, %v13524_v18 }
 0x79b   : > { %10745 = vmatprep.subr.msk.bf16.mxu1 %vm12048_vm2, %v10743_v55 }
 0x7a1   : > { %10303 = vmatmul.mubr.msk.f32.vlgmr.msra.gmra.mrb[56].mxu1 %vm546_vm1, %v5146_v24 }
 0x7a2   : > { %10748 = vmatpush3.bf16.xpose.msk.msra.mxu1 %vm12048_vm2, %v10743_v55  ;;  %10309 = vmatprep.mubr.msk.f32.mxu1 %vm546_vm1, %v5235_v13  ;;  %v15601_v55 = vld [vmem:[#allocation14_spill] sm:$0xff] }
 0x7a3   : > { %10751 = vmatprep.subr.msk.bf16.mxu1 %vm12048_vm2, %v10749_v61 }
 0x7a9   : > { %10310 = vmatmul.mubr.msk.f32.vlgmr.msra.gmra.mrb[58].mxu1 %vm546_vm1, %v13528_v62 }
 0x7aa   : > { %10754 = vmatpush3.bf16.xpose.msk.msra.mxu1 %vm12048_vm2, %v10749_v61  ;;  %10316 = vmatprep.mubr.msk.f32.mxu1 %vm546_vm1, %v5326_v14 }
 0x7b1   : > { %10317 = vmatmul.mubr.msk.f32.vlgmr.msra.gmra.mrb[60].mxu1 %vm546_vm1, %v13530_v33 }
 0x838   : > { %v13642_v18 = vpop.f32.mrb[36].mxu1 }
 0x839   : > { %15591 = vst [vmem:[#allocation61_spill] sm:$0xff] %v13642_v18  ;;  %v13644_v58 = vpop.f32.mrb[37].mxu1 }
 0x83a   : > { %15592 = vst [vmem:[#allocation62_spill] sm:$0xff] %v13644_v58 }
 0x83c   : > { %v13646_v27 = vpop.f32.mrb[38].mxu1 }
 0x83d   : > { %15593 = vst [vmem:[#allocation63_spill] sm:$0xff] %v13646_v27  ;;  %v13648_v54 = vpop.f32.mrb[39].mxu1 }
 0x83e   : > { %15594 = vst [vmem:[#allocation64_spill] sm:$0xff] %v13648_v54 }
 0x840   : > { %v13650_v49 = vpop.f32.mrb[40].mxu1 }
 0x841   : > { %15595 = vst [vmem:[#allocation65_spill] sm:$0xff] %v13650_v49  ;;  %v13652_v31 = vpop.f32.mrb[41].mxu1 }
 0x842   : > { %15596 = vst [vmem:[#allocation66_spill] sm:$0xff] %v13652_v31 }
 0x844   : > { %v13654_v62 = vpop.f32.mrb[42].mxu1 }
 0x845   : > { %15597 = vst [vmem:[#allocation67_spill] sm:$0xff] %v13654_v62  ;;  %v13656_v9 = vpop.f32.mrb[43].mxu1 }
 0x846   : > { %15598 = vst [vmem:[#allocation68_spill] sm:$0xff] %v13656_v9 }
 0x848   : > { %v13658_v0 = vpop.f32.mrb[44].mxu1 }
 0x849   : > { %15599 = vst [vmem:[#allocation69_spill] sm:$0xff] %v13658_v0  ;;  %v13660_v5 = vpop.f32.mrb[45].mxu1 }
 0x84a   : > { %15600 = vst [vmem:[#allocation70_spill] sm:$0xff] %v13660_v5  ;;  %v15622_v5 = vld [vmem:[#allocation26_spill] sm:$0xff] }
 0x84c   : > { %v10269_v33 = vpop.f32.mrb[46].mxu1 }
 0x84d   : > { %v4770_v16 = vpop.f32.mrb[47].mxu1  ;;  %v5419_v39 = vsel %vm1253_vm3, %v10269_v33, -inf }
 0x84e   : > { %5420 = vmax.xlane.f32.xlu1 %v5419_v39  ;;  %v5416_v3 = vsel %vm1253_vm3, %v4770_v16, -inf }
 0x84f   : > { %5417 = vmax.xlane.f32.xlu0 %v5416_v3 }
 0x854   : > { %v10276_v21 = vpop.f32.mrb[48].mxu1 }
 0x855   : > { %v4861_v6 = vpop.f32.mrb[49].mxu1  ;;  %v5425_v60 = vsel %vm1253_vm3, %v10276_v21, -inf }
 0x856   : > { %5426 = vmax.xlane.f32.xlu0 %v5425_v60  ;;  %v5422_v43 = vsel %vm1253_vm3, %v4861_v6, -inf }
 0x85a   : > { %5423 = vmax.xlane.f32.xlu0 %v5422_v43 }
 0x85c   : > { %v13666_v37 = vpop.f32.mrb[50].mxu1 }
 0x85d   : > { %v13668_v30 = vpop.f32.mrb[51].mxu1  ;;  %v5431_v48 = vsel %vm1253_vm3, %v13666_v37, -inf }
 0x85e   : > { %5432 = vmax.xlane.f32.xlu0 %v5431_v48  ;;  %v5428_v1 = vsel %vm1253_vm3, %v13668_v30, -inf }
 0x85f   : > { %5429 = vmax.xlane.f32.xlu1 %v5428_v1 }
 0x864   : > { %v13674_v25 = vpop.f32.mrb[52].mxu1 }
 0x865   : > { %v13676_v17 = vpop.f32.mrb[53].mxu1  ;;  %v5437_v57 = vsel %vm1253_vm3, %v13674_v25, -inf }
 0x866   : > { %5438 = vmax.xlane.f32.xlu0 %v5437_v57  ;;  %v5434_v45 = vsel %vm1253_vm3, %v13676_v17, -inf }
 0x867   : > { %5435 = vmax.xlane.f32.xlu1 %v5434_v45 }
 0x86c   : > { %v13682_v26 = vpop.f32.mrb[54].mxu1 }
 0x86d   : > { %v13684_v56 = vpop.f32.mrb[55].mxu1  ;;  %v5443_v8 = vsel %vm1253_vm3, %v13682_v26, -inf }
 0x86e   : > { %5444 = vmax.xlane.f32.xlu0 %v5443_v8  ;;  %v5440_v23 = vsel %vm1253_vm3, %v13684_v56, -inf }
 0x86f   : > { %5441 = vmax.xlane.f32.xlu1 %v5440_v23 }
 0x874   : > { %v13690_v15 = vpop.f32.mrb[56].mxu1 }
 0x875   : > { %v13692_v29 = vpop.f32.mrb[57].mxu1  ;;  %v5449_v12 = vsel %vm1253_vm3, %v13690_v15, -inf }
 0x876   : > { %5450 = vmax.xlane.f32.xlu0 %v5449_v12  ;;  %v5446_v46 = vsel %vm1253_vm3, %v13692_v29, -inf }
 0x877   : > { %5447 = vmax.xlane.f32.xlu1 %v5446_v46 }
 0x87c   : > { %v13698_v40 = vpop.f32.mrb[58].mxu1 }
 0x87d   : > { %v13700_v20 = vpop.f32.mrb[59].mxu1  ;;  %v5455_v35 = vsel %vm1253_vm3, %v13698_v40, -inf }
 0x87e   : > { %5456 = vmax.xlane.f32.xlu0 %v5455_v35  ;;  %v5452_v50 = vsel %vm1253_vm3, %v13700_v20, -inf }
 0x87f   : > { %5453 = vmax.xlane.f32.xlu1 %v5452_v50 }
 0x884   : > { %v13706_v44 = vpop.f32.mrb[60].mxu1 }
 0x885   : > { %v13708_v36 = vpop.f32.mrb[61].mxu1  ;;  %v5461_v53 = vsel %vm1253_vm3, %v13706_v44, -inf }
 0x886   : > { %5462 = vmax.xlane.f32.xlu0 %v5461_v53  ;;  %v5458_v24 = vsel %vm1253_vm3, %v13708_v36, -inf }
 0x890   : > { %11203 = vrot.lane.b32.xlu1 %v11978_v38, %s11706_s16 }
 0x89c   : > { %11198 = vrot.lane.b32.xlu0 %v15601_v55, %s11706_s16 }
 0x8b4   : > { %5459 = vmax.xlane.f32.xlu1 %v5458_v24 }
 0x8db   : > { %v5421_v47 = vpop.xlane.xlu1 %5420 }
 0x8dc   : > { %v5465_v41 = vsub.f32 %v10269_v33, %v5421_v47  ;;  %v5418_v61 = vpop.xlane.xlu0 %5417 }
 0x8dd   : > { %v5464_v13 = vsub.f32 %v4770_v16, %v5418_v61 }
 0x8de   : > { %v5482_v14 = vmul.f32 1.442695, %v5465_v41 }
 0x8df   : > { %v5480_v39 = vmul.f32 1.442695, %v5464_v13 }
 0x8e0   : > { %11440 = vpow2.f32 %v5482_v14 }
 0x8e1   : > { %11442 = vpow2.f32 %v5480_v39 }
 0x8e3   : > { %v5427_v3 = vpop.xlane.xlu0 %5426 }
 0x8e4   : > { %v5467_v60 = vsub.f32 %v10276_v21, %v5427_v3 }
 0x8e6   : > { %v5486_v43 = vmul.f32 1.442695, %v5467_v60 }
 0x8e7   : > { %v5424_v48 = vpop.xlane.xlu0 %5423 }
 0x8e8   : > { %11444 = vpow2.f32 %v5486_v43  ;;  %v5466_v1 = vsub.f32 %v4861_v6, %v5424_v48 }
 0x8ea   : > { %v13718_v57 = vpop.eup %11440  ;;  %v5484_v45 = vmul.f32 1.442695, %v5466_v1 }
 0x8eb   : > { %v13720_v8 = vpop.eup %11442  ;;  %v5433_v23 = vpop.xlane.xlu0 %5432  ;;  %v5515_v33 = vsel %vm1253_vm3, %v13718_v57, 0.0 }
 0x8ec   : > { %11446 = vpow2.f32 %v5484_v45  ;;  %v5469_v16 = vsub.f32 %v13666_v37, %v5433_v23  ;;  %v5430_v12 = vpop.xlane.xlu1 %5429  ;;  %5516 = vadd.xlane.f32.xlu0 %v5515_v33  ;;  %v5512_v21 = vsel %vm1253_vm3, %v13720_v8, 0.0 }
 0x8ed   : > { %v5468_v46 = vsub.f32 %v13668_v30, %v5430_v12  ;;  %5513 = vadd.xlane.f32.xlu1 %v5512_v21 }
 0x8ee   : > { %v5490_v6 = vmul.f32 1.442695, %v5469_v16 }
 0x8ef   : > { %v5488_v35 = vmul.f32 1.442695, %v5468_v46 }
 0x8f0   : > { %11448 = vpow2.f32 %v5490_v6 }
 0x8f1   : > { %11450 = vpow2.f32 %v5488_v35 }
 0x8f2   : > { %v13728_v50 = vpop.eup %11444 }
 0x8f3   : > { %v5439_v53 = vpop.xlane.xlu0 %5438  ;;  %v5521_v24 = vsel %vm1253_vm3, %v13728_v50, 0.0 }
 0x8f4   : > { %v5471_v37 = vsub.f32 %v13674_v25, %v5439_v53  ;;  %v5436_v47 = vpop.xlane.xlu1 %5435  ;;  %5522 = vadd.xlane.f32.xlu0 %v5521_v24 }
 0x8f5   : > { %v5470_v41 = vsub.f32 %v13676_v17, %v5436_v47 }
 0x8f6   : > { %v13734_v61 = vpop.eup %11446  ;;  %v5494_v30 = vmul.f32 1.442695, %v5471_v37 }
 0x8f7   : > { %v5492_v13 = vmul.f32 1.442695, %v5470_v41  ;;  %v5518_v14 = vsel %vm1253_vm3, %v13734_v61, 0.0 }
 0x8f8   : > { %11452 = vpow2.f32 %v5494_v30  ;;  %5519 = vadd.xlane.f32.xlu1 %v5518_v14 }
 0x8f9   : > { %11454 = vpow2.f32 %v5492_v13 }
 0x8fa   : > { %v13738_v39 = vpop.eup %11448 }
 0x8fb   : > { %v13740_v3 = vpop.eup %11450  ;;  %v5445_v60 = vpop.xlane.xlu0 %5444  ;;  %v5527_v25 = vsel %vm1253_vm3, %v13738_v39, 0.0 }
 0x8fc   : > { %v5473_v17 = vsub.f32 %v13682_v26, %v5445_v60  ;;  %v5442_v43 = vpop.xlane.xlu1 %5441  ;;  %5528 = vadd.xlane.f32.xlu0 %v5527_v25  ;;  %v5524_v48 = vsel %vm1253_vm3, %v13740_v3, 0.0 }
 0x8fd   : > { %v5472_v1 = vsub.f32 %v13684_v56, %v5442_v43  ;;  %5525 = vadd.xlane.f32.xlu1 %v5524_v48 }
 0x8fe   : > { %v5498_v45 = vmul.f32 1.442695, %v5473_v17 }
 0x8ff   : > { %v5496_v23 = vmul.f32 1.442695, %v5472_v1 }
 0x900   : > { %11456 = vpow2.f32 %v5498_v45 }
 0x901   : > { %11458 = vpow2.f32 %v5496_v23 }
 0x902   : > { %v13748_v33 = vpop.eup %11452 }
 0x903   : > { %v13750_v16 = vpop.eup %11454  ;;  %v5451_v12 = vpop.xlane.xlu0 %5450  ;;  %v5533_v26 = vsel %vm1253_vm3, %v13748_v33, 0.0 }
 0x904   : > { %v5475_v21 = vsub.f32 %v13690_v15, %v5451_v12  ;;  %v5448_v46 = vpop.xlane.xlu1 %5447  ;;  %5534 = vadd.xlane.f32.xlu0 %v5533_v26  ;;  %v5530_v56 = vsel %vm1253_vm3, %v13750_v16, 0.0 }
 0x905   : > { %v5474_v6 = vsub.f32 %v13692_v29, %v5448_v46  ;;  %5531 = vadd.xlane.f32.xlu1 %v5530_v56 }
 0x906   : > { %v5502_v35 = vmul.f32 1.442695, %v5475_v21 }
 0x907   : > { %v5500_v53 = vmul.f32 1.442695, %v5474_v6 }
 0x908   : > { %11460 = vpow2.f32 %v5502_v35 }
 0x909   : > { %11462 = vpow2.f32 %v5500_v53 }
 0x90a   : > { %v13758_v24 = vpop.eup %11456 }
 0x90b   : > { %v13760_v37 = vpop.eup %11458  ;;  %v5457_v47 = vpop.xlane.xlu0 %5456  ;;  %v5539_v15 = vsel %vm1253_vm3, %v13758_v24, 0.0 }
 0x90c   : > { %v5477_v41 = vsub.f32 %v13698_v40, %v5457_v47  ;;  %v5454_v30 = vpop.xlane.xlu1 %5453  ;;  %5540 = vadd.xlane.f32.xlu0 %v5539_v15  ;;  %v5536_v29 = vsel %vm1253_vm3, %v13760_v37, 0.0 }
 0x90d   : > { %v5476_v13 = vsub.f32 %v13700_v20, %v5454_v30  ;;  %5537 = vadd.xlane.f32.xlu1 %v5536_v29  ;;  %v15602_v30 = vld [vmem:[#allocation22_spill] sm:$0xff]  ;;  %v15603_v29 = vld [vmem:[#allocation25_spill] sm:$0xff] }
 0x90e   : > { %v5506_v14 = vmul.f32 1.442695, %v5477_v41 }
 0x90f   : > { %v5504_v60 = vmul.f32 1.442695, %v5476_v13  ;;  %v15604_v13 = vld [vmem:[#allocation28_spill] sm:$0xff] }
 0x910   : > { %11464 = vpow2.f32 %v5506_v14  ;;  %v11204_v25 = vpop.permute.xlu1 %11203  ;;  %v15605_v14 = vld [vmem:[#allocation19_spill] sm:$0xff] }
 0x911   : > { %v11206_v17 = vunpack.i.h.bf16 %v11204_v25  ;;  %v11205_v43 = vunpack.i.l.bf16 %v11204_v25  ;;  %11466 = vpow2.f32 %v5504_v60  ;;  %v15606_v60 = vld [vmem:[#allocation11_spill] sm:$0xff] }
 0x912   : > { %v13768_v48 = vpop.eup %11460 }
 0x913   : > { %v13770_v1 = vpop.eup %11462  ;;  %v5463_v40 = vpop.xlane.xlu0 %5462  ;;  %v5545_v45 = vsel %vm1253_vm3, %v13768_v48, 0.0  ;;  %v13774_v23 = vpack.c.bf16 %v11206_v17, %v11205_v43  ;;  %v15607_v43 = vld [vmem:[#allocation10_spill] sm:$0xff] }
 0x914   : > { %v5479_v20 = vsub.f32 %v13706_v44, %v5463_v40  ;;  %5546 = vadd.xlane.f32.xlu0 %v5545_v45  ;;  %v5542_v12 = vsel %vm1253_vm3, %v13770_v1, 0.0  ;;  %v15608_v45 = vld [vmem:[#allocation12_spill] sm:$0xff] }
 0x915   : > { %10764 = vmatprep.subr.bf16.mxu0 %v13774_v23  ;;  %5543 = vadd.xlane.f32.xlu1 %v5542_v12 }
 0x916   : > { %v5510_v26 = vmul.f32 1.442695, %v5479_v20  ;;  %v15609_v20 = vld [vmem:[#allocation16_spill] sm:$0xff] }
 0x917   : > { %v11199_v21 = vpop.permute.xlu0 %11198 }
 0x918   : > { %11468 = vpow2.f32 %v5510_v26  ;;  %v11201_v46 = vunpack.i.h.bf16 %v11199_v21  ;;  %v11200_v56 = vunpack.i.l.bf16 %v11199_v21  ;;  %v15610_v26 = vld [vmem:[#allocation18_spill] sm:$0xff]  ;;  %v15611_v21 = vld [vmem:[#allocation20_spill] sm:$0xff] }
 0x91a   : > { %v13780_v6 = vpop.eup %11464  ;;  %v10759_v35 = vpack.c.bf16 %v11201_v46, %v11200_v56  ;;  %v15612_v46 = vld [vmem:[#allocation24_spill] sm:$0xff]  ;;  %v15613_v56 = vld [vmem:[#allocation31_spill] sm:$0xff] }
 0x91b   : > { %v5551_v53 = vsel %vm1253_vm3, %v13780_v6, 0.0  ;;  %v13784_v47 = vpop.eup %11466 }
 0x91c   : > { %5552 = vadd.xlane.f32.xlu0 %v5551_v53  ;;  %10760 = vmatprep.subr.bf16.mxu1 %v10759_v35  ;;  %v5548_v44 = vsel %vm1253_vm3, %v13784_v47, 0.0  ;;  %v15615_v53 = vld [vmem:[#allocation30_spill] sm:$0xff] }
 0x91d   : > { %10762 = vmatpush3.bf16.msra.mxu1 %v10759_v35  ;;  %v15614_v35 = vld [vmem:[#allocation27_spill] sm:$0xff] }
 0x920   : > { %5549 = vadd.xlane.f32.xlu0 %v5548_v44  ;;  %v15616_v44 = vld [vmem:[#allocation9_spill] sm:$0xff] }
 0x922   : > { %v13788_v15 = vpop.eup %11468 }
 0x923   : > { %v5557_v41 = vsel %vm1253_vm3, %v13788_v15, 0.0 }
 0x924   : > { %5558 = vadd.xlane.f32.xlu0 %v5557_v41  ;;  %v15617_v41 = vld [vmem:[#allocation13_spill] sm:$0xff] }
 0x926   : > { %11213 = vrot.lane.b32.xlu1 %v15602_v30, %s11706_s16 }
 0x92a   : > { %11218 = vrot.lane.b32.xlu1 %v15603_v29, %s11706_s16 }
 0x92e   : > { %11223 = vrot.lane.b32.xlu1 %v15604_v13, %s11706_s16 }
 0x93a   : > { %11208 = vrot.lane.b32.xlu0 %v15605_v14, %s11706_s16 }
 0x93e   : > { %11233 = vrot.lane.b32.xlu0 %v15606_v60, %s11707_s21 }
 0x941   : > { %v5460_v25 = vpop.xlane.xlu1 %5459 }
 0x942   : > { %v5478_v17 = vsub.f32 %v13708_v36, %v5460_v25  ;;  %6779 = vrot.lane.b32.xlu0 %v15607_v43, %s11708_s19  ;;  %v15618_v25 = vld [vmem:[#allocation15_spill] sm:$0xff] }
 0x944   : > { %v5508_v40 = vmul.f32 1.442695, %v5478_v17 }
 0x946   : > { %11470 = vpow2.f32 %v5508_v40  ;;  %11243 = vrot.lane.b32.xlu0 %v11978_v38, %s11707_s21  ;;  %v15619_v40 = vld [vmem:[#allocation17_spill] sm:$0xff] }
 0x94a   : > { %6872 = vrot.lane.b32.xlu0 %v15608_v45, %s11708_s19 }
 0x94e   : > { %6961 = vrot.lane.b32.xlu0 %v15609_v20, %s11708_s19  ;;  %v15620_v20 = vld [vmem:[#allocation21_spill] sm:$0xff] }
 0x950   : > { %v13811_v12 = vpop.eup %11470 }
 0x951   : > { %v5554_v36 = vsel %vm1253_vm3, %v13811_v12, 0.0 }
 0x952   : > { %11253 = vrot.lane.b32.xlu0 %v15602_v30, %s11707_s21  ;;  %5555 = vadd.xlane.f32.xlu1 %v5554_v36 }
 0x956   : > { %7052 = vrot.lane.b32.xlu0 %v15610_v26, %s11708_s19 }
 0x95a   : > { %11263 = vrot.lane.b32.xlu0 %v15604_v13, %s11707_s21 }
 0x95e   : > { %7145 = vrot.lane.b32.xlu0 %v15611_v21, %s11708_s19 }
 0x962   : > { %7234 = vrot.lane.b32.xlu0 %v15612_v46, %s11708_s19 }
 0x963   : > { %11228 = vrot.lane.b32.xlu1 %v15613_v56, %s11706_s16 }
 0x966   : > { %7325 = vrot.lane.b32.xlu0 %v15614_v35, %s11708_s19 }
 0x967   : > { %11238 = vrot.lane.b32.xlu1 %v15601_v55, %s11707_s21 }
 0x96a   : > { %7416 = vrot.lane.b32.xlu0 %v15615_v53, %s11708_s19 }
 0x96b   : > { %6781 = vrot.lane.b32.xlu1 %v15616_v44, %s11708_s19 }
 0x96f   : > { %6870 = vrot.lane.b32.xlu1 %v15617_v41, %s11708_s19 }
 0x973   : > { %11248 = vrot.lane.b32.xlu1 %v15605_v14, %s11707_s21 }
 0x977   : > { %6963 = vrot.lane.b32.xlu1 %v15618_v25, %s11708_s19 }
 0x979   : > { %v5517_v17 = vpop.xlane.xlu0 %5516 }
 0x97a   : > { %11472 = vrcp.f32 %v5517_v17  ;;  %v5514_v43 = vpop.xlane.xlu1 %5513 }
 0x97b   : > { %11258 = vrot.lane.b32.xlu1 %v15603_v29, %s11707_s21  ;;  %11474 = vrcp.f32 %v5514_v43 }
 0x97f   : > { %7054 = vrot.lane.b32.xlu1 %v15619_v40, %s11708_s19 }
 0x981   : > { %v5523_v45 = vpop.xlane.xlu0 %5522 }
 0x982   : > { %11476 = vrcp.f32 %v5523_v45 }
 0x983   : > { %7143 = vrot.lane.b32.xlu1 %v15620_v20, %s11708_s19 }
 0x984   : > { %v11473_v36 = vpop.eup %11472 }
 0x985   : > { %v11475_v26 = vpop.eup %11474  ;;  %v5520_v21 = vpop.xlane.xlu1 %5519  ;;  %v13851_v35 = vmul.f32 %v11473_v36, %v13718_v57 }
 0x986   : > { %v13848_v46 = vmul.f32 %v11475_v26, %v13720_v8  ;;  %11478 = vrcp.f32 %v5520_v21  ;;  %v15621_v8 = vld [vmem:[#allocation23_spill] sm:$0xff] }
 0x987   : > { %11268 = vrot.lane.b32.xlu1 %v15613_v56, %s11707_s21  ;;  %v5757_v57 = vrot.slane %v13851_v35, 1  ;;  %v5774_v41 = vrot.slane %v13851_v35, 2  ;;  %v5791_v40 = vrot.slane %v13851_v35, 3  ;;  %v5808_v45 = vrot.slane %v13851_v35, 4 }
 0x988   : > { %10323 = vmatprep.mubr.msk.f32.mxu0 %vm1253_vm3, %v13848_v46  ;;  %v5615_v17 = vrot.slane %v13848_v46, 1  ;;  %v5632_v43 = vrot.slane %v13848_v46, 2  ;;  %v5649_v20 = vrot.slane %v13848_v46, 3  ;;  %v5666_v36 = vrot.slane %v13848_v46, 4 }
 0x989   : > { %v5529_v53 = vpop.xlane.xlu0 %5528  ;;  %10324 = vmatmul.mubr.msk.f32.vlgmr.msra.gmra.mrb[60].mxu0 %vm1253_vm3, %v13851_v35  ;;  %v5825_v26 = vrot.slane %v13851_v35, 5  ;;  %v5683_v21 = vrot.slane %v13848_v46, 5  ;;  %v5717_v27 = vrot.slane %v13848_v46, 7 }
 0x98a   : > { %11480 = vrcp.f32 %v5529_v53  ;;  %10766 = vmatpush3.bf16.msra.mxu0 %v13774_v23  ;;  %v5526_v44 = vpop.xlane.xlu1 %5525  ;;  %v5842_v53 = vrot.slane %v13851_v35, 6 }
 0x98b   : > { %11482 = vrcp.f32 %v5526_v44  ;;  %7236 = vrot.lane.b32.xlu1 %v15621_v8, %s11708_s19  ;;  %v5700_v44 = vrot.slane %v13848_v46, 6  ;;  %v5859_v8 = vrot.slane %v13851_v35, 7 }
 0x98c   : > { %v11477_v25 = vpop.eup %11476 }
 0x98d   : > { %v13869_v23 = vmul.f32 %v11477_v25, %v13728_v50 }
 0x98f   : > { %7327 = vrot.lane.b32.xlu1 %v15622_v5, %s11708_s19  ;;  %v5758_v50 = vsel %vm1439_vm4, %v13869_v23, %v5757_v57  ;;  %v5775_v25 = vrot.slane %v13869_v23, 1  ;;  %v5792_v0 = vrot.slane %v13869_v23, 2  ;;  %v5809_v9 = vrot.slane %v13869_v23, 3 }
 0x990   : > { %v11479_v62 = vpop.eup %11478  ;;  %v5826_v31 = vrot.slane %v13869_v23, 4  ;;  %v5843_v49 = vrot.slane %v13869_v23, 5  ;;  %v5860_v54 = vrot.slane %v13869_v23, 6 }
 0x991   : > { %v13890_v5 = vmul.f32 %v11479_v62, %v13734_v61  ;;  %v5535_v58 = vpop.xlane.xlu0 %5534  ;;  %v5776_v57 = vsel %vm1439_vm4, %v5775_v25, %v5774_v41  ;;  %v5793_v18 = vsel %vm1439_vm4, %v5792_v0, %v5791_v40  ;;  %v5810_v22 = vsel %vm1439_vm4, %v5809_v9, %v5808_v45 }
 0x992   : > { %11484 = vrcp.f32 %v5535_v58  ;;  %v5532_v28 = vpop.xlane.xlu1 %5531  ;;  %v5827_v32 = vsel %vm1439_vm4, %v5826_v31, %v5825_v26  ;;  %v5844_v59 = vsel %vm1439_vm4, %v5843_v49, %v5842_v53  ;;  %v5861_v51 = vsel %vm1439_vm4, %v5860_v54, %v5859_v8 }
 0x993   : > { %11486 = vrcp.f32 %v5532_v28  ;;  %7418 = vrot.lane.b32.xlu1 %v15623_v7, %s11708_s19  ;;  %10330 = vmatprep.mubr.msk.f32.mxu1 %vm1253_vm3, %v13890_v5  ;;  %v5616_v62 = vsel %vm1439_vm4, %v13890_v5, %v5615_v17  ;;  %v5633_v9 = vrot.slane %v13890_v5, 1  ;;  %v5650_v58 = vrot.slane %v13890_v5, 2 }
 0x994   : > { %v11481_v0 = vpop.eup %11480  ;;  %10331 = vmatmul.mubr.msk.f32.vlgmr.msra.gmra.mrb[62].mxu1 %vm1253_vm3, %v13869_v23  ;;  %v5667_v54 = vrot.slane %v13890_v5, 3  ;;  %v5684_v28 = vrot.slane %v13890_v5, 4  ;;  %v5701_v7 = vrot.slane %v13890_v5, 5  ;;  %v5718_v49 = vrot.slane %v13890_v5, 6 }
 0x995   : > { %v11483_v31 = vpop.eup %11482  ;;  %v13913_v61 = vmul.f32 %v11481_v0, %v13738_v39  ;;  %v5634_v41 = vsel %vm1439_vm4, %v5633_v9, %v5632_v43  ;;  %v5651_v17 = vsel %vm1439_vm4, %v5650_v58, %v5649_v20  ;;  %v5600_v40 = vrot.slane %v13890_v5, 7 }
 0x996   : > { %v13919_v45 = vmul.f32 %v11483_v31, %v13740_v3  ;;  %v5668_v26 = vsel %vm1439_vm4, %v5667_v54, %v5666_v36  ;;  %v5685_v53 = vsel %vm1439_vm4, %v5684_v28, %v5683_v21  ;;  %v5702_v8 = vsel %vm1439_vm4, %v5701_v7, %v5700_v44 }
 0x997   : > { %v5759_v25 = vrot.slane %v13913_v61, 7  ;;  %v5777_v39 = vsel %vm1442_vm5, %v13913_v61, %v5776_v57  ;;  %v5794_v43 = vrot.slane %v13913_v61, 1  ;;  %v5811_v20 = vrot.slane %v13913_v61, 2 }
 0x998   : > { %10337 = vmatprep.mubr.msk.f32.mxu0 %vm1253_vm3, %v13919_v45  ;;  %v5617_v3 = vrot.slane %v13919_v45, 7  ;;  %v5635_v36 = vsel %vm1442_vm5, %v13919_v45, %v5634_v41  ;;  %v5652_v21 = vrot.slane %v13919_v45, 1  ;;  %v5669_v44 = vrot.slane %v13919_v45, 2 }
 0x999   : > { %v5541_v5 = vpop.xlane.xlu0 %5540  ;;  %10338 = vmatmul.mubr.msk.f32.vlgmr.msra.gmra.mrb[62].mxu0 %vm1253_vm3, %v13913_v61  ;;  %v5760_v57 = vsel %vm1442_vm5, %v5759_v25, %v5758_v50  ;;  %v5795_v9 = vsel %vm1442_vm5, %v5794_v43, %v5793_v18  ;;  %v5812_v58 = vsel %vm1442_vm5, %v5811_v20, %v5810_v22  ;;  %v5828_v0 = vrot.slane %v13913_v61, 3 }
 0x99a   : > { %11488 = vrcp.f32 %v5541_v5  ;;  %v5538_v54 = vpop.xlane.xlu1 %5537  ;;  %v5618_v28 = vsel %vm1442_vm5, %v5617_v3, %v5616_v62  ;;  %v5653_v7 = vsel %vm1442_vm5, %v5652_v21, %v5651_v17  ;;  %v5670_v31 = vsel %vm1442_vm5, %v5669_v44, %v5668_v26 }
 0x99b   : > { %11490 = vrcp.f32 %v5538_v54  ;;  %v5829_v41 = vsel %vm1442_vm5, %v5828_v0, %v5827_v32  ;;  %v5686_v34 = vrot.slane %v13919_v45, 3  ;;  %v5845_v50 = vrot.slane %v13913_v61, 4 }
 0x99c   : > { %v11485_v18 = vpop.eup %11484  ;;  %v5703_v22 = vrot.slane %v13919_v45, 4  ;;  %v5862_v25 = vrot.slane %v13913_v61, 5  ;;  %v5719_v43 = vsel %vm1439_vm4, %v5718_v49, %v5717_v27  ;;  %v5720_v62 = vrot.slane %v13919_v45, 5 }
 0x99d   : > { %v11487_v20 = vpop.eup %11486  ;;  %v13953_v17 = vmul.f32 %v11485_v18, %v13748_v33  ;;  %v5687_v26 = vsel %vm1442_vm5, %v5686_v34, %v5685_v53  ;;  %v5846_v32 = vsel %vm1442_vm5, %v5845_v50, %v5844_v59  ;;  %v13959_v3 = vsel %vm1439_vm4, %v5600_v40, %v13848_v46 }
 0x99e   : > { %v13962_v21 = vmul.f32 %v11487_v20, %v13750_v16  ;;  %v5704_v44 = vsel %vm1442_vm5, %v5703_v22, %v5702_v8  ;;  %v5863_v27 = vsel %vm1442_vm5, %v5862_v25, %v5861_v51  ;;  %v5721_v49 = vsel %vm1442_vm5, %v5720_v62, %v5719_v43 }
 0x99f   : > { %v5761_v33 = vrot.slane %v13953_v17, 6  ;;  %v5778_v5 = vrot.slane %v13953_v17, 7  ;;  %v5796_v34 = vsel %vm1445_vm6, %v13953_v17, %v5795_v9  ;;  %v5813_v59 = vrot.slane %v13953_v17, 1 }
 0x9a0   : > { %10344 = vmatprep.mubr.msk.f32.mxu1 %vm1253_vm3, %v13962_v21  ;;  %v5619_v16 = vrot.slane %v13962_v21, 6  ;;  %v5636_v46 = vrot.slane %v13962_v21, 7  ;;  %v5654_v51 = vsel %vm1445_vm6, %v13962_v21, %v5653_v7  ;;  %v5671_v40 = vrot.slane %v13962_v21, 1 }
 0x9a1   : > { %v5547_v53 = vpop.xlane.xlu0 %5546  ;;  %v5762_v8 = vsel %vm1445_vm6, %v5761_v33, %v5760_v57  ;;  %v5779_v0 = vsel %vm1445_vm6, %v5778_v5, %v5777_v39  ;;  %v5814_v9 = vsel %vm1445_vm6, %v5813_v59, %v5812_v58  ;;  %v5830_v54 = vrot.slane %v13953_v17, 2 }
 0x9a2   : > { %11492 = vrcp.f32 %v5547_v53  ;;  %v5544_v50 = vpop.xlane.xlu1 %5543  ;;  %v5620_v18 = vsel %vm1445_vm6, %v5619_v16, %v5618_v28  ;;  %v5637_v22 = vsel %vm1445_vm6, %v5636_v46, %v5635_v36  ;;  %v5672_v25 = vsel %vm1445_vm6, %v5671_v40, %v5670_v31 }
 0x9a3   : > { %11494 = vrcp.f32 %v5544_v50  ;;  %v5831_v7 = vsel %vm1445_vm6, %v5830_v54, %v5829_v41  ;;  %v5688_v43 = vrot.slane %v13962_v21, 2  ;;  %v5847_v57 = vrot.slane %v13953_v17, 3 }
 0x9a4   : > { %v11489_v39 = vpop.eup %11488  ;;  %v5705_v58 = vrot.slane %v13962_v21, 3  ;;  %v5864_v62 = vrot.slane %v13953_v17, 4  ;;  %v5722_v20 = vrot.slane %v13962_v21, 4 }
 0x9a5   : > { %v11491_v33 = vpop.eup %11490  ;;  %v13993_v28 = vmul.f32 %v11489_v39, %v13758_v24  ;;  %v5689_v36 = vsel %vm1445_vm6, %v5688_v43, %v5687_v26  ;;  %v13997_v31 = vsel %vm1445_vm6, %v5847_v57, %v5846_v32 }
 0x9a6   : > { %v14000_v41 = vmul.f32 %v11491_v33, %v13760_v37  ;;  %v11214_v5 = vpop.permute.xlu1 %11213  ;;  %v14003_v59 = vsel %vm1445_vm6, %v5705_v58, %v5704_v44  ;;  %v14006_v16 = vsel %vm1445_vm6, %v5864_v62, %v5863_v27  ;;  %v14009_v46 = vsel %vm1445_vm6, %v5722_v20, %v5721_v49 }
 0x9a7   : > { %v11216_v24 = vunpack.i.h.bf16 %v11214_v5  ;;  %v11215_v40 = vunpack.i.l.bf16 %v11214_v5  ;;  %v5763_v26 = vrot.slane %v13993_v28, 5  ;;  %v5780_v32 = vrot.slane %v13993_v28, 6 }
 0x9a8   : > { %10351 = vmatprep.mubr.msk.f32.mxu0 %vm1253_vm3, %v14000_v41  ;;  %v5621_v37 = vrot.slane %v14000_v41, 5  ;;  %v5638_v44 = vrot.slane %v14000_v41, 6  ;;  %v5797_v53 = vrot.slane %v13993_v28, 7  ;;  %v5655_v27 = vrot.slane %v14000_v41, 7 }
 0x9a9   : > { %v5553_v54 = vpop.xlane.xlu0 %5552  ;;  %v10771_v49 = vpack.c.bf16 %v11216_v24, %v11215_v40  ;;  %v5764_v50 = vsel %vm1448_vm7, %v5763_v26, %v5762_v8  ;;  %v5781_v43 = vsel %vm1448_vm7, %v5780_v32, %v5779_v0  ;;  %v5815_v57 = vsel %vm1448_vm7, %v13993_v28, %v5814_v9  ;;  %v337_v24 = vld [vmem:[#allocation6 + $0x10] sm:$0xff] }
 0x9aa   : > { %11496 = vrcp.f32 %v5553_v54  ;;  %v14023_v39 = vpop.permute.xlu1 %11218  ;;  %v5622_v58 = vsel %vm1448_vm7, %v5621_v37, %v5620_v18  ;;  %v5639_v62 = vsel %vm1448_vm7, %v5638_v44, %v5637_v22  ;;  %v5798_v20 = vsel %vm1448_vm7, %v5797_v53, %v5796_v34 }
 0x9ab   : > { %10772 = vmatprep.subr.bf16.mxu0 %v10771_v49  ;;  %v5656_v33 = vsel %vm1448_vm7, %v5655_v27, %v5654_v51  ;;  %v5673_v8 = vsel %vm1448_vm7, %v14000_v41, %v5672_v25  ;;  %v5832_v18 = vrot.slane %v13993_v28, 1  ;;  %v5690_v34 = vrot.slane %v14000_v41, 1 }
 0x9ac   : > { %v11493_v9 = vpop.eup %11492  ;;  %10774 = vmatpush3.bf16.msra.mxu0 %v10771_v49  ;;  %v5849_v25 = vrot.slane %v13993_v28, 2  ;;  %v5707_v32 = vrot.slane %v14000_v41, 2  ;;  %v5866_v37 = vrot.slane %v13993_v28, 3 }
 0x9ad   : > { %v11495_v22 = vpop.eup %11494  ;;  %v14038_v51 = vmul.f32 %v11493_v9, %v13768_v48  ;;  %v5550_v26 = vpop.xlane.xlu0 %5549  ;;  %v5833_v27 = vsel %vm1448_vm7, %v5832_v18, %v5831_v7  ;;  %v5691_v54 = vsel %vm1448_vm7, %v5690_v34, %v5689_v36 }
 0x9ae   : > { %v14044_v44 = vmul.f32 %v11495_v22, %v13770_v1  ;;  %11498 = vrcp.f32 %v5550_v26  ;;  %v11224_v53 = vpop.permute.xlu1 %11223 }
 0x9af   : > { %v11226_v49 = vunpack.i.h.bf16 %v11224_v53  ;;  %v11225_v5 = vunpack.i.l.bf16 %v11224_v53  ;;  %10352 = vmatmul.mubr.msk.f32.vlgmr.msra.gmra.mrb[64].mxu0 %vm1253_vm3, %v13993_v28  ;;  %v5765_v48 = vrot.slane %v14038_v51, 4  ;;  %v5782_v9 = vrot.slane %v14038_v51, 5 }
 0x9b0   : > { %v5623_v0 = vrot.slane %v14044_v44, 4  ;;  %v5640_v1 = vrot.slane %v14044_v44, 5  ;;  %v5799_v22 = vrot.slane %v14038_v51, 6  ;;  %v5657_v26 = vrot.slane %v14044_v44, 6 }
 0x9b1   : > { %v5559_v7 = vpop.xlane.xlu0 %5558  ;;  %v10779_v18 = vpack.c.bf16 %v11226_v49, %v11225_v5  ;;  %v5766_v36 = vsel %vm1451_vm8, %v5765_v48, %v5764_v50  ;;  %v5783_v34 = vsel %vm1451_vm8, %v5782_v9, %v5781_v43  ;;  %v5816_v53 = vrot.slane %v14038_v51, 7 }
 0x9b2   : > { %11500 = vrcp.f32 %v5559_v7  ;;  %v5624_v40 = vsel %vm1451_vm8, %v5623_v0, %v5622_v58  ;;  %v5641_v11 = vsel %vm1451_vm8, %v5640_v1, %v5639_v62  ;;  %v5800_v19 = vsel %vm1451_vm8, %v5799_v22, %v5798_v20 }
 0x9b3   : > { %10780 = vmatprep.subr.bf16.mxu0 %v10779_v18  ;;  %v5658_v52 = vsel %vm1451_vm8, %v5657_v26, %v5656_v33  ;;  %v5817_v63 = vsel %vm1451_vm8, %v5816_v53, %v5815_v57  ;;  %v5674_v5 = vrot.slane %v14044_v44, 7  ;;  %v5834_v50 = vsel %vm1451_vm8, %v14038_v51, %v5833_v27 }
 0x9b4   : > { %v11497_v43 = vpop.eup %11496  ;;  %10782 = vmatpush3.bf16.msra.mxu0 %v10779_v18  ;;  %v5692_v49 = vsel %vm1451_vm8, %v14044_v44, %v5691_v54  ;;  %v5850_v58 = vsel %vm1448_vm7, %v5849_v25, %v13997_v31  ;;  %v5851_v62 = vrot.slane %v14038_v51, 1  ;;  %v5708_v20 = vsel %vm1448_vm7, %v5707_v32, %v14003_v59 }
 0x9b5   : > { %v14075_v57 = vmul.f32 %v11497_v43, %v13780_v6  ;;  %v11209_v33 = vpop.permute.xlu0 %11208  ;;  %10375 = vmatprep.subr.mxu0 %v337_v24  ;;  %v5675_v0 = vsel %vm1451_vm8, %v5674_v5, %v5673_v8  ;;  %v5709_v27 = vrot.slane %v14044_v44, 1  ;;  %v5867_v54 = vsel %vm1448_vm7, %v5866_v37, %v14006_v16 }
 0x9b6   : > { %v11211_v48 = vunpack.i.h.bf16 %v11209_v33  ;;  %v11210_v9 = vunpack.i.l.bf16 %v11209_v33  ;;  %v5852_v31 = vsel %vm1451_vm8, %v5851_v62, %v5850_v58  ;;  %v5868_v25 = vrot.slane %v14038_v51, 2 }
 0x9b7   : > { %v5767_v59 = vrot.slane %v14075_v57, 3  ;;  %v5784_v6 = vrot.slane %v14075_v57, 4  ;;  %v5801_v32 = vrot.slane %v14075_v57, 5  ;;  %v5818_v1 = vrot.slane %v14075_v57, 6 }
 0x9b8   : > { %v11499_v8 = vpop.eup %11498  ;;  %v10767_v22 = vpack.c.bf16 %v11211_v48, %v11210_v9  ;;  %v5835_v26 = vrot.slane %v14075_v57, 7  ;;  %v5853_v16 = vsel %vm1454_vm9, %v14075_v57, %v5852_v31  ;;  %v5710_v37 = vsel %vm1451_vm8, %v5709_v27, %v5708_v20 }
 0x9b9   : > { %v14092_v7 = vmul.f32 %v11499_v8, %v13784_v47  ;;  %v14094_v18 = vpop.permute.xlu0 %11233  ;;  %v5768_v53 = vsel %vm1454_vm9, %v5767_v59, %v5766_v36  ;;  %v5785_v5 = vsel %vm1454_vm9, %v5784_v6, %v5783_v34  ;;  %v5802_v43 = vsel %vm1454_vm9, %v5801_v32, %v5800_v19 }
 0x9ba   : > { %10768 = vmatprep.subr.bf16.mxu1 %v10767_v22  ;;  %v15624_v58 = vunpack.i.l.bf16 %v14023_v39  ;;  %v15625_v62 = vunpack.i.h.bf16 %v14023_v39  ;;  %v5819_v48 = vsel %vm1454_vm9, %v5818_v1, %v5817_v63  ;;  %v5836_v20 = vsel %vm1454_vm9, %v5835_v26, %v5834_v50 }
 0x9bb   : > { %v5724_v47 = vrot.slane %v14000_v41, 3  ;;  %10770 = vmatpush3.bf16.msra.mxu1 %v10767_v22  ;;  %10365 = vmatprep.mubr.msk.f32.mxu0 %vm1253_vm3, %v14092_v7  ;;  %v5625_v36 = vrot.slane %v14092_v7, 3  ;;  %v5642_v19 = vrot.slane %v14092_v7, 4  ;;  %v5659_v34 = vrot.slane %v14092_v7, 5 }
 0x9bc   : > { %v10775_v33 = vpack.c.bf16 %v15625_v62, %v15624_v58  ;;  %v5676_v27 = vrot.slane %v14092_v7, 6  ;;  %v11501_v39 = vpop.eup %11500  ;;  %10366 = vmatmul.mubr.msk.f32.vlgmr.msra.gmra.mrb[66].mxu0 %vm1253_vm3, %v14075_v57  ;;  %v5693_v63 = vrot.slane %v14092_v7, 7  ;;  %v14117_v50 = vsel %vm1454_vm9, %v14092_v7, %v5710_v37 }
 0x9bd   : > { %v5869_v9 = vsel %vm1451_vm8, %v5868_v25, %v5867_v54  ;;  %v5604_v31 = vrot.slane %v13962_v21, 5  ;;  %v14122_v59 = vmul.f32 %v11501_v39, %v13788_v15  ;;  %v14124_v6 = vpop.permute.xlu0 %6779  ;;  %10376 = vmatpush3.msra.mxu0 %v337_v24  ;;  %v14127_v32 = vsel %vm1454_vm9, %v5625_v36, %v5624_v40 }
 0x9be   : > { %10776 = vmatprep.subr.bf16.mxu1 %v10775_v33  ;;  %v14130_v1 = vsel %vm1454_vm9, %v5642_v19, %v5641_v11  ;;  %v14133_v8 = vsel %vm1454_vm9, %v5659_v34, %v5658_v52  ;;  %10345 = vmatmul.mubr.msk.f32.vlgmr.msra.gmra.mrb[64].mxu1 %vm1253_vm3, %v13953_v17  ;;  %v14138_v21 = vsel %vm1454_vm9, %v5676_v27, %v5675_v0  ;;  %v5870_v24 = vrot.slane %v14075_v57, 1 }
 0x9bf   : > { %v14141_v15 = vsel %vm1454_vm9, %v5693_v63, %v5692_v49  ;;  %v5725_v40 = vsel %vm1448_vm7, %v5724_v47, %v14009_v46  ;;  %10778 = vmatpush3.bf16.msra.mxu1 %v10775_v33  ;;  %10358 = vmatprep.mubr.msk.f32.mxu1 %vm1253_vm3, %v14044_v44  ;;  %v5769_v52 = vrot.slane %v14122_v59, 2  ;;  %v5786_v11 = vrot.slane %v14122_v59, 3 }
 0x9c0   : > { %v5803_v54 = vrot.slane %v14122_v59, 4  ;;  %v5820_v0 = vrot.slane %v14122_v59, 5  ;;  %v5837_v49 = vrot.slane %v14122_v59, 6  ;;  %v5854_v25 = vrot.slane %v14122_v59, 7 }
 0x9c1   : > { %v5871_v22 = vsel %vm1454_vm9, %v5870_v24, %v5869_v9  ;;  %v5726_v46 = vrot.slane %v14044_v44, 2  ;;  %v14156_v26 = vpop.permute.xlu0 %11243  ;;  %v14159_v37 = vsel %vm1457_vm10, %v5769_v52, %v5768_v53  ;;  %v14162_v58 = vsel %vm1457_vm10, %v5786_v11, %v5785_v5 }
 0x9c2   : > { %v14165_v62 = vsel %vm1457_vm10, %v5803_v54, %v5802_v43  ;;  %v14168_v33 = vsel %vm1457_vm10, %v5820_v0, %v5819_v48  ;;  %10359 = vmatmul.mubr.msk.f32.vlgmr.msra.gmra.mrb[66].mxu1 %vm1253_vm3, %v14038_v51  ;;  %v14173_v47 = vsel %vm1457_vm10, %v5837_v49, %v5836_v20  ;;  %v14176_v36 = vsel %vm1457_vm10, %v5854_v25, %v5853_v16 }
 0x9c3   : > { %v14180_v53 = vsel %vm1457_vm10, %v14122_v59, %v5871_v22  ;;  %v5727_v5 = vsel %vm1451_vm8, %v5726_v46, %v5725_v40  ;;  %v5728_v43 = vrot.slane %v14092_v7, 1  ;;  %v15626_v48 = vrot.slane %v13919_v45, 6 }
 0x9c4   : > { %v5606_v20 = vrot.slane %v14000_v41, 4  ;;  %v5608_v16 = vrot.slane %v14044_v44, 3  ;;  %v5610_v63 = vrot.slane %v14092_v7, 2  ;;  %v15627_v9 = vrot.slane %v13869_v23, 7 }
 0x9c5   : > { %v5603_v19 = vsel %vm1442_vm5, %v15626_v48, %v13959_v3  ;;  %v14191_v27 = vpop.permute.xlu0 %6872  ;;  %v5729_v39 = vsel %vm1454_vm9, %v5728_v43, %v5727_v5  ;;  %v5744_v45 = vrot.slane %v13913_v61, 6  ;;  %v5748_v41 = vrot.slane %v13993_v28, 4 }
 0x9c6   : > { %v5605_v34 = vsel %vm1445_vm6, %v5604_v31, %v5603_v19  ;;  %v5743_v24 = vsel %vm1439_vm4, %v15627_v9, %v13851_v35  ;;  %v5746_v31 = vrot.slane %v13953_v17, 5  ;;  %v5750_v44 = vrot.slane %v14038_v51, 3 }
 0x9c7   : > { %v5607_v3 = vsel %vm1448_vm7, %v5606_v20, %v5605_v34  ;;  %v5745_v52 = vsel %vm1442_vm5, %v5744_v45, %v5743_v24  ;;  %v5752_v7 = vrot.slane %v14075_v57, 2  ;;  %v5754_v61 = vrot.slane %v14122_v59, 1 }
 0x9c8   : > { %v5609_v40 = vsel %vm1451_vm8, %v5608_v16, %v5607_v3  ;;  %v5747_v35 = vsel %vm1445_vm6, %v5746_v31, %v5745_v52  ;;  %v11236_v5 = vunpack.i.h.bf16 %v14094_v18  ;;  %v11235_v43 = vunpack.i.l.bf16 %v14094_v18 }
 0x9c9   : > { %v5611_v23 = vsel %vm1454_vm9, %v5610_v63, %v5609_v40  ;;  %v14210_v11 = vpop.permute.xlu0 %6961  ;;  %v5749_v17 = vsel %vm1448_vm7, %v5748_v41, %v5747_v35 }
 0x9ca   : > { %v5751_v28 = vsel %vm1451_vm8, %v5750_v44, %v5749_v17  ;;  %v10787_v16 = vpack.c.bf16 %v11236_v5, %v11235_v43 }
 0x9cb   : > { %v5753_v51 = vsel %vm1454_vm9, %v5752_v7, %v5751_v28 }
 0x9cc   : > { %v14216_v54 = vsel %vm1457_vm10, %v5754_v61, %v5753_v51 }
 0x9cd   : > { %15628 = vst [vmem:[#allocation14_spill] sm:$0xff] %v14216_v54  ;;  %v11254_v0 = vpop.permute.xlu0 %11253 }
 0x9ce   : > { %v11256_v49 = vunpack.i.h.bf16 %v11254_v0  ;;  %v11255_v57 = vunpack.i.l.bf16 %v11254_v0 }
 0x9d0   : > { %v14218_v25 = vpack.c.bf16 %v11256_v49, %v11255_v57 }
 0x9d2   : > { %10813 = vmatprep.subr.msk.bf16.mxu0 %vm12048_vm2, %v14218_v25 }
 0x9df   : > { %v5556_v22 = vpop.xlane.xlu1 %5555 }
 0x9e0   : > { %11502 = vrcp.f32 %v5556_v22 }
 0x9e3   : > { %v11229_v46 = vpop.permute.xlu1 %11228 }
 0x9e4   : > { %v11231_v48 = vunpack.i.h.bf16 %v11229_v46  ;;  %v11230_v19 = vunpack.i.l.bf16 %v11229_v46 }
 0x9e6   : > { %v10783_v34 = vpack.c.bf16 %v11231_v48, %v11230_v19 }
 0x9e7   : > { %v11239_v20 = vpop.permute.xlu1 %11238 }
 0x9e8   : > { %10784 = vmatprep.subr.bf16.mxu1 %v10783_v34  ;;  %v11241_v45 = vunpack.i.h.bf16 %v11239_v20  ;;  %v11240_v3 = vunpack.i.l.bf16 %v11239_v20 }
 0x9e9   : > { %10786 = vmatpush3.bf16.msra.mxu1 %v10783_v34 }
 0x9ea   : > { %v11503_v63 = vpop.eup %11502  ;;  %10789 = vmatprep.subr.msk.bf16.mxu1 %vm12048_vm2, %v10787_v16 }
 0x9eb   : > { %v5590_v9 = vmul.f32 %v11503_v63, %v13811_v12  ;;  %v6782_v24 = vpop.permute.xlu1 %6781 }
 0x9ed   : > { %10372 = vmatprep.mubr.msk.f32.mxu1 %vm1253_vm3, %v5590_v9  ;;  %v5627_v31 = vrot.slane %v5590_v9, 2  ;;  %v5644_v18 = vrot.slane %v5590_v9, 3  ;;  %v5661_v41 = vrot.slane %v5590_v9, 4  ;;  %v5678_v44 = vrot.slane %v5590_v9, 5 }
 0x9ee   : > { %10373 = vmatmul.mubr.msk.f32.vlgmr.msra.gmra.mrb[68].mxu1 %vm1253_vm3, %v14122_v59  ;;  %v5695_v40 = vrot.slane %v5590_v9, 6  ;;  %v5712_v52 = vrot.slane %v5590_v9, 7  ;;  %v14232_v7 = vsel %vm1457_vm10, %v5590_v9, %v5729_v39  ;;  %v5612_v35 = vrot.slane %v5590_v9, 1 }
 0x9ef   : > { %v6871_v61 = vpop.permute.xlu1 %6870  ;;  %10405 = vmatprep.mubr.msk.f32.mxu1 %vm546_vm1, %v14124_v6  ;;  %v14238_v12 = vsel %vm1457_vm10, %v5627_v31, %v14127_v32  ;;  %v14242_v17 = vsel %vm1457_vm10, %v5644_v18, %v14130_v1  ;;  %v14246_v59 = vsel %vm1457_vm10, %v5661_v41, %v14133_v8  ;;  %v14250_v39 = vsel %vm1457_vm10, %v5678_v44, %v14138_v21 }
 0x9f0   : > { %v14254_v28 = vsel %vm1457_vm10, %v5695_v40, %v14141_v15  ;;  %v14258_v6 = vsel %vm1457_vm10, %v5712_v52, %v14117_v50  ;;  %v14261_v32 = vsel %vm1457_vm10, %v5612_v35, %v5611_v23  ;;  %v10793_v1 = vpack.c.bf16 %v11241_v45, %v11240_v3  ;;  %v7053_v50 = vpop.permute.xlu0 %7052 }
 0x9f1   : > { %15629 = vst [vmem:[#allocation22_spill] sm:$0xff] %v14261_v32  ;;  %v11246_v21 = vunpack.i.h.bf16 %v14156_v26  ;;  %v11245_v15 = vunpack.i.l.bf16 %v14156_v26 }
 0x9f2   : > { %10792 = vmatpush3.bf16.xpose.msk.msra.mxu1 %vm12048_vm2, %v10787_v16 }
 0x9f3   : > { %v11249_v8 = vpop.permute.xlu1 %11248  ;;  %10795 = vmatprep.subr.msk.bf16.mxu1 %vm12048_vm2, %v10793_v1  ;;  %v10799_v0 = vpack.c.bf16 %v11246_v21, %v11245_v15 }
 0x9f4   : > { %v11251_v49 = vunpack.i.h.bf16 %v11249_v8  ;;  %v11250_v57 = vunpack.i.l.bf16 %v11249_v8  ;;  %v11264_v46 = vpop.permute.xlu0 %11263 }
 0x9f5   : > { %v11266_v18 = vunpack.i.h.bf16 %v11264_v46  ;;  %v11265_v41 = vunpack.i.l.bf16 %v11264_v46 }
 0x9f6   : > { %v10805_v5 = vpack.c.bf16 %v11251_v49, %v11250_v57 }
 0x9f7   : > { %v6964_v51 = vpop.permute.xlu1 %6963  ;;  %v10823_v52 = vpack.c.bf16 %v11266_v18, %v11265_v41 }
 0x9f8   : > { %v7146_v19 = vpop.permute.xlu0 %7145 }
 0x9f9   : > { %10406 = vmatmul.mubr.msk.f32.vlgmr.msra.gmra.mrb[70].mxu1 %vm546_vm1, %v6782_v24 }
 0x9fa   : > { %10798 = vmatpush3.bf16.xpose.msk.msra.mxu1 %vm12048_vm2, %v10793_v1  ;;  %10412 = vmatprep.mubr.msk.f32.mxu1 %vm546_vm1, %v6871_v61 }
 0x9fb   : > { %v11259_v23 = vpop.permute.xlu1 %11258  ;;  %10801 = vmatprep.subr.msk.bf16.mxu1 %vm12048_vm2, %v10799_v0 }
 0x9fc   : > { %v11261_v43 = vunpack.i.h.bf16 %v11259_v23  ;;  %v11260_v48 = vunpack.i.l.bf16 %v11259_v23 }
 0x9fe   : > { %v10817_v34 = vpack.c.bf16 %v11261_v43, %v11260_v48 }
 0x9ff   : > { %v7055_v22 = vpop.permute.xlu1 %7054 }
 0xa01   : > { %10413 = vmatmul.mubr.msk.f32.vlgmr.msra.gmra.mrb[72].mxu1 %vm546_vm1, %v14191_v27  ;;  %v7235_v27 = vpop.permute.xlu0 %7234 }
 0xa02   : > { %10804 = vmatpush3.bf16.xpose.msk.msra.mxu1 %vm12048_vm2, %v10799_v0  ;;  %10419 = vmatprep.mubr.msk.f32.mxu1 %vm546_vm1, %v14210_v11 }
 0xa03   : > { %10807 = vmatprep.subr.msk.bf16.mxu1 %vm12048_vm2, %v10805_v5  ;;  %v14283_v26 = vpop.permute.xlu1 %7143 }
 0xa05   : > { %v7326_v9 = vpop.permute.xlu0 %7325 }
 0xa07   : > { %v11269_v20 = vpop.permute.xlu1 %11268 }
 0xa08   : > { %v11271_v11 = vunpack.i.h.bf16 %v11269_v20  ;;  %v11270_v16 = vunpack.i.l.bf16 %v11269_v20 }
 0xa09   : > { %10420 = vmatmul.mubr.msk.f32.vlgmr.msra.gmra.mrb[74].mxu1 %vm546_vm1, %v6964_v51  ;;  %v7417_v45 = vpop.permute.xlu0 %7416 }
 0xa0a   : > { %10810 = vmatpush3.bf16.xpose.msk.msra.mxu1 %vm12048_vm2, %v10805_v5  ;;  %10426 = vmatprep.mubr.msk.f32.mxu1 %vm546_vm1, %v7053_v50  ;;  %v10829_v63 = vpack.c.bf16 %v11271_v11, %v11270_v16 }
 0xa0b   : > { %10819 = vmatprep.subr.msk.bf16.mxu1 %vm12048_vm2, %v10817_v34  ;;  %v7237_v24 = vpop.permute.xlu1 %7236 }
 0xa0f   : > { %v7328_v3 = vpop.permute.xlu1 %7327 }
 0xa11   : > { %10427 = vmatmul.mubr.msk.f32.vlgmr.msra.gmra.mrb[76].mxu1 %vm546_vm1, %v7055_v22 }
 0xa12   : > { %10822 = vmatpush3.bf16.xpose.msk.msra.mxu1 %vm12048_vm2, %v10817_v34  ;;  %10440 = vmatprep.mubr.msk.f32.mxu1 %vm546_vm1, %v7235_v27 }
 0xa13   : > { %10831 = vmatprep.subr.msk.bf16.mxu1 %vm12048_vm2, %v10829_v63  ;;  %v7419_v31 = vpop.permute.xlu1 %7418 }
 0xa19   : > { %10441 = vmatmul.mubr.msk.f32.vlgmr.msra.gmra.mrb[78].mxu1 %vm546_vm1, %v7237_v24 }
 0xa1a   : > { %10834 = vmatpush3.bf16.xpose.msk.msra.mxu1 %vm12048_vm2, %v10829_v63  ;;  %10454 = vmatprep.mubr.msk.f32.mxu1 %vm546_vm1, %v7417_v45 }
 0xa21   : > { %10455 = vmatmul.mubr.msk.f32.vlgmr.msra.gmra.mrb[80].mxu1 %vm546_vm1, %v7419_v31 }
 0xa5c   : > { %v10325_v44 = vpop.f32.mrb[60].mxu0 }
 0xa5d   : > { %v5966_v40 = vpop.f32.mrb[61].mxu0 }
 0xa5e   : > { %10377 = vmatprep.mubr.msk.f32.mxu0 %vm546_vm1, %v5966_v40 }
 0xa5f   : > { %10378 = vmatmul.mubr.msk.f32.vlgmr.msra.gmra.mrb[44].mxu0 %vm546_vm1, %v10325_v44 }
 0xa60   : > { %10816 = vmatpush3.bf16.xpose.msk.msra.mxu0 %vm12048_vm2, %v14218_v25 }
 0xa61   : > { %10825 = vmatprep.subr.msk.bf16.mxu0 %vm12048_vm2, %v10823_v52 }
 0xa67   : > { %v10332_v35 = vpop.f32.mrb[62].mxu1 }
 0xa68   : > { %v6051_v61 = vpop.f32.mrb[63].mxu1 }
 0xa69   : > { %10380 = vmatprep.mubr.msk.f32.mxu0 %vm546_vm1, %v6051_v61 }
 0xa6a   : > { %10381 = vmatmul.mubr.msk.f32.gmra.mrb[46].mxu0 %vm546_vm1, %v10332_v35 }
 0xa6c   : > { %v10339_v1 = vpop.f32.mrb[62].mxu0 }
 0xa6d   : > { %v6136_v8 = vpop.f32.mrb[63].mxu0 }
 0xa6e   : > { %10383 = vmatprep.mubr.msk.f32.mxu0 %vm546_vm1, %v6136_v8 }
 0xa6f   : > { %10384 = vmatmul.mubr.msk.f32.gmra.mrb[48].mxu0 %vm546_vm1, %v10339_v1 }
 0xa82   : > { %v10353_v21 = vpop.f32.mrb[64].mxu0 }
 0xa83   : > { %v6306_v15 = vpop.f32.mrb[65].mxu0 }
 0xa8f   : > { %v10367_v51 = vpop.f32.mrb[66].mxu0 }
 0xa90   : > { %v6476_v0 = vpop.f32.mrb[67].mxu0 }
 0xa91   : > { %v10346_v25 = vpop.f32.mrb[64].mxu1 }
 0xa92   : > { %v6221_v50 = vpop.f32.mrb[65].mxu1 }
 0xa93   : > { %10386 = vmatprep.mubr.msk.f32.mxu0 %vm546_vm1, %v6221_v50 }
 0xa94   : > { %10387 = vmatmul.mubr.msk.f32.gmra.mrb[50].mxu0 %vm546_vm1, %v10346_v25 }
 0xa95   : > { %v10360_v23 = vpop.f32.mrb[66].mxu1  ;;  %10389 = vmatprep.mubr.msk.f32.mxu0 %vm546_vm1, %v6306_v15 }
 0xa96   : > { %v6391_v49 = vpop.f32.mrb[67].mxu1 }
 0xa98   : > { %10390 = vmatmul.mubr.msk.f32.gmra.mrb[52].mxu0 %vm546_vm1, %v10353_v21 }
 0xa99   : > { %10392 = vmatprep.mubr.msk.f32.mxu0 %vm546_vm1, %v6391_v49 }
 0xa9c   : > { %10393 = vmatmul.mubr.msk.f32.gmra.mrb[54].mxu0 %vm546_vm1, %v10360_v23 }
 0xa9d   : > { %10395 = vmatprep.mubr.msk.f32.mxu0 %vm546_vm1, %v6476_v0 }
 0xaa0   : > { %10396 = vmatmul.mubr.msk.f32.gmra.mrb[56].mxu0 %vm546_vm1, %v10367_v51 }
 0xac1   : > { %v10374_v57 = vpop.f32.mrb[68].mxu1 }
 0xac2   : > { %v6561_v22 = vpop.f32.mrb[69].mxu1 }
 0xac3   : > { %10398 = vmatprep.mubr.msk.f32.mxu0 %vm546_vm1, %v6561_v22 }
 0xac4   : > { %10399 = vmatmul.mubr.msk.f32.gmra.mrb[58].mxu0 %vm546_vm1, %v10374_v57 }
 0xac5   : > { %10433 = vmatprep.mubr.msk.f32.mxu0 %vm546_vm1, %v14283_v26 }
 0xac8   : > { %10434 = vmatmul.mubr.msk.f32.vlgmr.msra.gmra.mrb[68].mxu0 %vm546_vm1, %v7146_v19 }
 0xac9   : > { %10828 = vmatpush3.bf16.xpose.msk.msra.mxu0 %vm12048_vm2, %v10823_v52  ;;  %10447 = vmatprep.mubr.msk.f32.mxu0 %vm546_vm1, %v7326_v9 }
 0xacc   : > { %v10407_v46 = vpop.f32.mrb[70].mxu1 }
 0xacd   : > { %v6861_v5 = vpop.f32.mrb[71].mxu1  ;;  %v7510_v43 = vsel %vm1253_vm3, %v10407_v46, -inf }
 0xace   : > { %7511 = vmax.xlane.f32.xlu1 %v7510_v43  ;;  %v7507_v48 = vsel %vm1253_vm3, %v6861_v5, -inf }
 0xacf   : > { %7508 = vmax.xlane.f32.xlu0 %v7507_v48 }
 0xad0   : > { %10448 = vmatmul.mubr.msk.f32.vlgmr.msra.gmra.mrb[70].mxu0 %vm546_vm1, %v7328_v3 }
 0xad4   : > { %v10414_v34 = vpop.f32.mrb[72].mxu1 }
 0xad5   : > { %v6952_v20 = vpop.f32.mrb[73].mxu1  ;;  %v7516_v26 = vsel %vm1253_vm3, %v10414_v34, -inf }
 0xad6   : > { %7517 = vmax.xlane.f32.xlu0 %v7516_v26  ;;  %v7513_v2 = vsel %vm1253_vm3, %v6952_v20, -inf }
 0xada   : > { %7514 = vmax.xlane.f32.xlu0 %v7513_v2 }
 0xadc   : > { %v10421_v19 = vpop.f32.mrb[74].mxu1 }
 0xadd   : > { %v7043_v27 = vpop.f32.mrb[75].mxu1  ;;  %v7522_v11 = vsel %vm1253_vm3, %v10421_v19, -inf }
 0xade   : > { %7523 = vmax.xlane.f32.xlu0 %v7522_v11  ;;  %v7519_v16 = vsel %vm1253_vm3, %v7043_v27, -inf }
 0xadf   : > { %7520 = vmax.xlane.f32.xlu1 %v7519_v16 }
 0xae4   : > { %v14336_v63 = vpop.f32.mrb[76].mxu1 }
 0xae5   : > { %v7134_v9 = vpop.f32.mrb[77].mxu1  ;;  %v7528_v24 = vsel %vm1253_vm3, %v14336_v63, -inf }
 0xae6   : > { %7529 = vmax.xlane.f32.xlu0 %v7528_v24  ;;  %v7525_v45 = vsel %vm1253_vm3, %v7134_v9, -inf }
 0xae7   : > { %7526 = vmax.xlane.f32.xlu1 %v7525_v45 }
 0xaec   : > { %v14341_v3 = vpop.f32.mrb[78].mxu1 }
 0xaed   : > { %v7316_v31 = vpop.f32.mrb[79].mxu1  ;;  %v7540_v18 = vsel %vm1253_vm3, %v14341_v3, -inf }
 0xaee   : > { %7541 = vmax.xlane.f32.xlu0 %v7540_v18  ;;  %v7537_v41 = vsel %vm1253_vm3, %v7316_v31, -inf }
 0xaef   : > { %7538 = vmax.xlane.f32.xlu1 %v7537_v41 }
 0xaf4   : > { %v14346_v44 = vpop.f32.mrb[80].mxu1 }
 0xaf5   : > { %v14348_v40 = vpop.f32.mrb[81].mxu1  ;;  %v7552_v52 = vsel %vm1253_vm3, %v14346_v44, -inf }
 0xaf6   : > { %7553 = vmax.xlane.f32.xlu0 %v7552_v52  ;;  %v7549_v35 = vsel %vm1253_vm3, %v14348_v40, -inf }
 0xaf7   : > { %7550 = vmax.xlane.f32.xlu1 %v7549_v35 }
 0xb5b   : > { %v7512_v61 = vpop.xlane.xlu1 %7511 }
 0xb5c   : > { %v7556_v1 = vsub.f32 %v10407_v46, %v7512_v61  ;;  %v7509_v8 = vpop.xlane.xlu0 %7508 }
 0xb5d   : > { %v7555_v21 = vsub.f32 %v6861_v5, %v7509_v8 }
 0xb5e   : > { %v7573_v15 = vmul.f32 1.442695, %v7556_v1 }
 0xb5f   : > { %v7571_v51 = vmul.f32 1.442695, %v7555_v21 }
 0xb60   : > { %11504 = vpow2.f32 %v7573_v15 }
 0xb61   : > { %11506 = vpow2.f32 %v7571_v51 }
 0xb63   : > { %v7518_v0 = vpop.xlane.xlu0 %7517 }
 0xb64   : > { %v7558_v25 = vsub.f32 %v10414_v34, %v7518_v0 }
 0xb66   : > { %v7577_v50 = vmul.f32 1.442695, %v7558_v25 }
 0xb67   : > { %v7515_v23 = vpop.xlane.xlu0 %7514 }
 0xb68   : > { %11508 = vpow2.f32 %v7577_v50  ;;  %v7557_v49 = vsub.f32 %v6952_v20, %v7515_v23 }
 0xb6a   : > { %v14354_v57 = vpop.eup %11504  ;;  %v7575_v22 = vmul.f32 1.442695, %v7557_v49 }
 0xb6b   : > { %v14356_v43 = vpop.eup %11506  ;;  %v7524_v48 = vpop.xlane.xlu0 %7523  ;;  %v7606_v46 = vsel %vm1253_vm3, %v14354_v57, 0.0 }
 0xb6c   : > { %11510 = vpow2.f32 %v7575_v22  ;;  %v7560_v5 = vsub.f32 %v10421_v19, %v7524_v48  ;;  %v7521_v26 = vpop.xlane.xlu1 %7520  ;;  %7607 = vadd.xlane.f32.xlu0 %v7606_v46  ;;  %v7603_v34 = vsel %vm1253_vm3, %v14356_v43, 0.0 }
 0xb6d   : > { %v7559_v2 = vsub.f32 %v7043_v27, %v7521_v26  ;;  %7604 = vadd.xlane.f32.xlu1 %v7603_v34 }
 0xb6e   : > { %v7581_v11 = vmul.f32 1.442695, %v7560_v5 }
 0xb6f   : > { %v7579_v20 = vmul.f32 1.442695, %v7559_v2 }
 0xb70   : > { %11512 = vpow2.f32 %v7581_v11 }
 0xb71   : > { %11514 = vpow2.f32 %v7579_v20 }
 0xb72   : > { %v14362_v16 = vpop.eup %11508 }
 0xb73   : > { %v7612_v24 = vsel %vm1253_vm3, %v14362_v16, 0.0  ;;  %v7530_v0 = vpop.xlane.xlu0 %7529 }
 0xb74   : > { %v7527_v45 = vpop.xlane.xlu1 %7526  ;;  %7613 = vadd.xlane.f32.xlu0 %v7612_v24  ;;  %v7562_v50 = vsub.f32 %v14336_v63, %v7530_v0 }
 0xb75   : > { %v7561_v18 = vsub.f32 %v7134_v9, %v7527_v45 }
 0xb76   : > { %v14366_v19 = vpop.eup %11510  ;;  %v7585_v49 = vmul.f32 1.442695, %v7562_v50 }
 0xb77   : > { %v7583_v41 = vmul.f32 1.442695, %v7561_v18  ;;  %v7609_v52 = vsel %vm1253_vm3, %v14366_v19, 0.0 }
 0xb78   : > { %7610 = vadd.xlane.f32.xlu1 %v7609_v52 }
 0xb79   : > { %11516 = vpow2.f32 %v7583_v41 }
 0xb7a   : > { %v14370_v27 = vpop.eup %11512 }
 0xb7b   : > { %v14372_v35 = vpop.eup %11514  ;;  %v7618_v61 = vsel %vm1253_vm3, %v14370_v27, 0.0 }
 0xb7c   : > { %v7539_v1 = vpop.xlane.xlu1 %7538  ;;  %7619 = vadd.xlane.f32.xlu0 %v7618_v61  ;;  %v7615_v9 = vsel %vm1253_vm3, %v14372_v35, 0.0 }
 0xb7d   : > { %v7565_v8 = vsub.f32 %v7316_v31, %v7539_v1  ;;  %7616 = vadd.xlane.f32.xlu1 %v7615_v9  ;;  %v7542_v31 = vpop.xlane.xlu0 %7541 }
 0xb7e   : > { %v7566_v22 = vsub.f32 %v14341_v3, %v7542_v31 }
 0xb7f   : > { %v7591_v21 = vmul.f32 1.442695, %v7565_v8 }
 0xb80   : > { %v7593_v48 = vmul.f32 1.442695, %v7566_v22 }
 0xb81   : > { %11518 = vpow2.f32 %v7591_v21 }
 0xb82   : > { %11520 = vpow2.f32 %v7585_v49 }
 0xb83   : > { %v14378_v15 = vpop.eup %11516  ;;  %11522 = vpow2.f32 %v7593_v48  ;;  %v7554_v52 = vpop.xlane.xlu0 %7553 }
 0xb84   : > { %v7621_v51 = vsel %vm1253_vm3, %v14378_v15, 0.0  ;;  %v7551_v41 = vpop.xlane.xlu1 %7550  ;;  %v7570_v1 = vsub.f32 %v14346_v44, %v7554_v52 }
 0xb85   : > { %7622 = vadd.xlane.f32.xlu1 %v7621_v51  ;;  %v7569_v61 = vsub.f32 %v14348_v40, %v7551_v41 }
 0xb86   : > { %v7601_v8 = vmul.f32 1.442695, %v7570_v1 }
 0xb87   : > { %v7599_v9 = vmul.f32 1.442695, %v7569_v61 }
 0xb89   : > { %11524 = vpow2.f32 %v7599_v9 }
 0xb8a   : > { %11526 = vpow2.f32 %v7601_v8 }
 0xb8b   : > { %v14382_v25 = vpop.eup %11518 }
 0xb8c   : > { %v7633_v23 = vsel %vm1253_vm3, %v14382_v25, 0.0  ;;  %v14394_v34 = vpop.eup %11520 }
 0xb8d   : > { %7634 = vadd.xlane.f32.xlu1 %v7633_v23  ;;  %v7624_v2 = vsel %vm1253_vm3, %v14394_v34, 0.0  ;;  %v14406_v24 = vpop.eup %11522 }
 0xb8e   : > { %15630 = vst [vmem:[#allocation25_spill] sm:$0xff] %v14406_v24  ;;  %v7636_v18 = vsel %vm1253_vm3, %v14406_v24, 0.0 }
 0xb93   : > { %v14418_v21 = vpop.eup %11524 }
 0xb94   : > { %15631 = vst [vmem:[#allocation28_spill] sm:$0xff] %v14418_v21  ;;  %v14420_v51 = vpop.eup %11526 }
 0xb95   : > { %15632 = vst [vmem:[#allocation19_spill] sm:$0xff] %v14420_v51 }
 0xb9b   : > { %v14388_v46 = vpop.f32.mrb[68].mxu0 }
 0xb9c   : > { %v14390_v5 = vpop.f32.mrb[69].mxu0  ;;  %v7534_v26 = vsel %vm1253_vm3, %v14388_v46, -inf }
 0xb9d   : > { %7535 = vmax.xlane.f32.xlu0 %v7534_v26  ;;  %v7531_v63 = vsel %vm1253_vm3, %v14390_v5, -inf }
 0xb9e   : > { %7532 = vmax.xlane.f32.xlu1 %v7531_v63 }
 0xba1   : > { %7625 = vadd.xlane.f32.xlu0 %v7624_v2 }
 0xba3   : > { %v14400_v3 = vpop.f32.mrb[70].mxu0 }
 0xba4   : > { %v14402_v11 = vpop.f32.mrb[71].mxu0  ;;  %v7546_v20 = vsel %vm1253_vm3, %v14400_v3, -inf }
 0xba5   : > { %7547 = vmax.xlane.f32.xlu0 %v7546_v20  ;;  %v7543_v45 = vsel %vm1253_vm3, %v14402_v11, -inf }
 0xba6   : > { %7544 = vmax.xlane.f32.xlu1 %v7543_v45 }
 0xba9   : > { %7637 = vadd.xlane.f32.xlu0 %v7636_v18 }
 0xbb7   : > { %11273 = vrot.lane.b32.xlu1 %v15606_v60, %s11709_s28  ;;  %v7645_v60 = vsel %vm1253_vm3, %v14418_v21, 0.0 }
 0xbbf   : > { %11278 = vrot.lane.b32.xlu0 %v15601_v55, %s11709_s28  ;;  %v7648_v55 = vsel %vm1253_vm3, %v14420_v51, 0.0 }
 0xbdb   : > { %7646 = vadd.xlane.f32.xlu1 %v7645_v60 }
 0xbde   : > { %7649 = vadd.xlane.f32.xlu0 %v7648_v55 }
 0xbec   : > { %11283 = vrot.lane.b32.xlu1 %v11978_v38, %s11709_s28 }
 0xbf9   : > { %v7608_v44 = vpop.xlane.xlu0 %7607 }
 0xbfa   : > { %11528 = vrcp.f32 %v7608_v44  ;;  %v7605_v40 = vpop.xlane.xlu1 %7604 }
 0xbfb   : > { %11530 = vrcp.f32 %v7605_v40 }
 0xc01   : > { %v7614_v0 = vpop.xlane.xlu0 %7613 }
 0xc02   : > { %11532 = vrcp.f32 %v7614_v0 }
 0xc04   : > { %v11529_v50 = vpop.eup %11528 }
 0xc05   : > { %v11531_v23 = vpop.eup %11530  ;;  %v7611_v49 = vpop.xlane.xlu1 %7610  ;;  %v14432_v22 = vmul.f32 %v11529_v50, %v14354_v57 }
 0xc06   : > { %v14429_v31 = vmul.f32 %v11531_v23, %v14356_v43  ;;  %11534 = vrcp.f32 %v7611_v49 }
 0xc07   : > { %v7933_v48 = vrot.slane %v14432_v22, 6  ;;  %v7848_v63 = vrot.slane %v14432_v22, 1  ;;  %v7865_v20 = vrot.slane %v14432_v22, 2  ;;  %v7882_v43 = vrot.slane %v14432_v22, 3 }
 0xc08   : > { %10461 = vmatprep.mubr.msk.f32.mxu0 %vm1253_vm3, %v14429_v31  ;;  %v7791_v2 = vrot.slane %v14429_v31, 6  ;;  %v7706_v57 = vrot.slane %v14429_v31, 1  ;;  %v7723_v18 = vrot.slane %v14429_v31, 2  ;;  %v7899_v41 = vrot.slane %v14432_v22, 4 }
 0xc09   : > { %v7740_v52 = vrot.slane %v14429_v31, 3  ;;  %v7916_v61 = vrot.slane %v14432_v22, 5  ;;  %v7757_v1 = vrot.slane %v14429_v31, 4  ;;  %v7950_v9 = vrot.slane %v14432_v22, 7 }
 0xc0a   : > { %v7617_v38 = vpop.xlane.xlu1 %7616 }
 0xc0b   : > { %11536 = vrcp.f32 %v7617_v38 }
 0xc0c   : > { %v11533_v26 = vpop.eup %11532 }
 0xc0d   : > { %v14442_v45 = vmul.f32 %v11533_v26, %v14362_v16 }
 0xc0f   : > { %v7934_v8 = vrot.slane %v14442_v45, 5  ;;  %v14454_v16 = vsel %vm1439_vm4, %v14442_v45, %v7848_v63  ;;  %v7866_v60 = vrot.slane %v14442_v45, 1  ;;  %v7883_v55 = vrot.slane %v14442_v45, 2 }
 0xc10   : > { %v11535_v44 = vpop.eup %11534  ;;  %v7900_v40 = vrot.slane %v14442_v45, 3  ;;  %v7917_v0 = vrot.slane %v14442_v45, 4  ;;  %v7951_v50 = vrot.slane %v14442_v45, 6  ;;  %v7833_v23 = vrot.slane %v14442_v45, 7 }
 0xc11   : > { %v14463_v49 = vmul.f32 %v11535_v44, %v14366_v19  ;;  %v14466_v38 = vsel %vm1439_vm4, %v7934_v8, %v7933_v48  ;;  %v14469_v26 = vsel %vm1439_vm4, %v7866_v60, %v7865_v20  ;;  %v14472_v63 = vsel %vm1439_vm4, %v7883_v55, %v7882_v43 }
 0xc12   : > { %v7623_v54 = vpop.xlane.xlu1 %7622  ;;  %v14475_v32 = vsel %vm1439_vm4, %v7900_v40, %v7899_v41  ;;  %v14478_v51 = vsel %vm1439_vm4, %v7917_v0, %v7916_v61  ;;  %v14481_v21 = vsel %vm1439_vm4, %v7951_v50, %v7950_v9  ;;  %v14485_v19 = vsel %vm1439_vm4, %v7833_v23, %v14432_v22 }
 0xc13   : > { %15633 = vst [vmem:[#allocation11_spill] sm:$0xff] %v14481_v21  ;;  %15634 = vst [vmem:[#allocation10_spill] sm:$0xff] %v14485_v19  ;;  %11538 = vrcp.f32 %v7623_v54  ;;  %v7792_v48 = vrot.slane %v14463_v49, 5  ;;  %v7707_v20 = vsel %vm1439_vm4, %v14463_v49, %v7706_v57  ;;  %v7724_v43 = vrot.slane %v14463_v49, 1 }
 0xc14   : > { %v7741_v41 = vrot.slane %v14463_v49, 2  ;;  %v7758_v61 = vrot.slane %v14463_v49, 3  ;;  %v7774_v8 = vrot.slane %v14429_v31, 5  ;;  %v7775_v9 = vrot.slane %v14463_v49, 4 }
 0xc15   : > { %v11537_v60 = vpop.eup %11536  ;;  %v7793_v55 = vsel %vm1439_vm4, %v7792_v48, %v7791_v2  ;;  %v7725_v54 = vsel %vm1439_vm4, %v7724_v43, %v7723_v18  ;;  %v7809_v19 = vrot.slane %v14463_v49, 6  ;;  %v7691_v2 = vrot.slane %v14463_v49, 7 }
 0xc16   : > { %v7671_v44 = vmul.f32 %v11537_v60, %v14372_v35  ;;  %v7742_v40 = vsel %vm1439_vm4, %v7741_v41, %v7740_v52  ;;  %v7759_v57 = vsel %vm1439_vm4, %v7758_v61, %v7757_v1  ;;  %v7776_v0 = vsel %vm1439_vm4, %v7775_v9, %v7774_v8 }
 0xc17   : > { %v7808_v52 = vrot.slane %v14429_v31, 7  ;;  %v7692_v60 = vsel %vm1439_vm4, %v7691_v2, %v14429_v31 }
 0xc18   : > { %10475 = vmatprep.mubr.msk.f32.mxu1 %vm1253_vm3, %v7671_v44  ;;  %v7794_v50 = vrot.slane %v7671_v44, 4  ;;  %v7708_v23 = vrot.slane %v7671_v44, 7  ;;  %v7726_v24 = vsel %vm1442_vm5, %v7671_v44, %v7725_v54  ;;  %v7743_v21 = vrot.slane %v7671_v44, 1 }
 0xc19   : > { %v7760_v48 = vrot.slane %v7671_v44, 2  ;;  %v7777_v43 = vrot.slane %v7671_v44, 3  ;;  %v7810_v41 = vsel %vm1439_vm4, %v7809_v19, %v7808_v52  ;;  %v7811_v61 = vrot.slane %v7671_v44, 5 }
 0xc1a   : > { %v7795_v18 = vsel %vm1442_vm5, %v7794_v50, %v7793_v55  ;;  %v7709_v35 = vsel %vm1442_vm5, %v7708_v23, %v7707_v20  ;;  %v7744_v1 = vsel %vm1442_vm5, %v7743_v21, %v7742_v40  ;;  %v7693_v50 = vrot.slane %v7671_v44, 6 }
 0xc1b   : > { %v7761_v9 = vsel %vm1442_vm5, %v7760_v48, %v7759_v57  ;;  %v7778_v20 = vsel %vm1442_vm5, %v7777_v43, %v7776_v0  ;;  %v7812_v55 = vsel %vm1442_vm5, %v7811_v61, %v7810_v41  ;;  %v7620_v61 = vpop.xlane.xlu0 %7619 }
 0xc1c   : > { %v7694_v0 = vsel %vm1442_vm5, %v7693_v50, %v7692_v60 }
 0xc1d   : > { %v11539_v8 = vpop.eup %11538 }
 0xc1e   : > { %v14514_v54 = vmul.f32 %v11539_v8, %v14378_v15 }
 0xc20   : > { %v7796_v21 = vrot.slane %v14514_v54, 3  ;;  %v7710_v40 = vrot.slane %v14514_v54, 6  ;;  %v7727_v19 = vrot.slane %v14514_v54, 7  ;;  %v14523_v57 = vsel %vm1445_vm6, %v14514_v54, %v7744_v1 }
 0xc21   : > { %v7762_v31 = vrot.slane %v14514_v54, 1  ;;  %v7779_v15 = vrot.slane %v14514_v54, 2  ;;  %v7813_v23 = vrot.slane %v14514_v54, 4  ;;  %v7695_v1 = vrot.slane %v14514_v54, 5 }
 0xc22   : > { %v14530_v44 = vsel %vm1445_vm6, %v7796_v21, %v7795_v18  ;;  %v14533_v2 = vsel %vm1445_vm6, %v7710_v40, %v7709_v35  ;;  %v14536_v52 = vsel %vm1445_vm6, %v7727_v19, %v7726_v24  ;;  %v14551_v35 = vpop.xlane.xlu1 %7634 }
 0xc23   : > { %v14540_v48 = vsel %vm1445_vm6, %v7762_v31, %v7761_v9  ;;  %v14543_v43 = vsel %vm1445_vm6, %v7779_v15, %v7778_v20  ;;  %v14546_v41 = vsel %vm1445_vm6, %v7813_v23, %v7812_v55  ;;  %v14549_v18 = vsel %vm1445_vm6, %v7695_v1, %v7694_v0 }
 0xc2a   : > { %v7536_v8 = vpop.xlane.xlu0 %7535 }
 0xc2b   : > { %v7564_v24 = vsub.f32 %v14388_v46, %v7536_v8  ;;  %v7533_v60 = vpop.xlane.xlu1 %7532 }
 0xc2c   : > { %v7563_v50 = vsub.f32 %v14390_v5, %v7533_v60 }
 0xc2d   : > { %v7589_v9 = vmul.f32 1.442695, %v7564_v24 }
 0xc2e   : > { %v7587_v21 = vmul.f32 1.442695, %v7563_v50  ;;  %v14555_v40 = vpop.xlane.xlu0 %7625 }
 0xc2f   : > { %11540 = vpow2.f32 %v7589_v9 }
 0xc30   : > { %11542 = vpow2.f32 %v7587_v21 }
 0xc32   : > { %v7548_v20 = vpop.xlane.xlu0 %7547 }
 0xc33   : > { %v7568_v55 = vsub.f32 %v14400_v3, %v7548_v20  ;;  %v7545_v19 = vpop.xlane.xlu1 %7544 }
 0xc34   : > { %v7567_v31 = vsub.f32 %v14402_v11, %v7545_v19 }
 0xc35   : > { %v7597_v15 = vmul.f32 1.442695, %v7568_v55 }
 0xc36   : > { %v7595_v23 = vmul.f32 1.442695, %v7567_v31  ;;  %v14559_v0 = vpop.xlane.xlu0 %7637 }
 0xc37   : > { %11544 = vpow2.f32 %v7597_v15  ;;  %v11274_v46 = vpop.permute.xlu1 %11273  ;;  %v15644_v15 = vld [vmem:[#allocation35_spill] sm:$0xff] }
 0xc38   : > { %v11276_v1 = vunpack.i.h.bf16 %v11274_v46  ;;  %v11275_v5 = vunpack.i.l.bf16 %v11274_v46  ;;  %11546 = vpow2.f32 %v7595_v23  ;;  %v15646_v23 = vld [vmem:[#allocation44_spill] sm:$0xff] }
 0xc39   : > { %v14561_v8 = vpop.eup %11540  ;;  %11548 = vrcp.f32 %v7620_v61  ;;  %v15641_v61 = vld [vmem:[#allocation49_spill] sm:$0xff]  ;;  %v15648_v46 = vld [vmem:[#allocation36_spill] sm:$0xff] }
 0xc3a   : > { %v14563_v24 = vpop.eup %11542  ;;  %v10835_v60 = vpack.c.bf16 %v11276_v1, %v11275_v5  ;;  %v11279_v50 = vpop.permute.xlu0 %11278  ;;  %v7630_v3 = vsel %vm1253_vm3, %v14561_v8, 0.0  ;;  %v15650_v1 = vld [vmem:[#allocation45_spill] sm:$0xff]  ;;  %11550 = vrcp.f32 %v14551_v35 }
 0xc3b   : > { %v11281_v9 = vunpack.i.h.bf16 %v11279_v50  ;;  %v11280_v11 = vunpack.i.l.bf16 %v11279_v50  ;;  %7631 = vadd.xlane.f32.xlu0 %v7630_v3  ;;  %v7627_v21 = vsel %vm1253_vm3, %v14563_v24, 0.0  ;;  %v15652_v5 = vld [vmem:[#allocation37_spill] sm:$0xff]  ;;  %v15656_v50 = vld [vmem:[#allocation38_spill] sm:$0xff]  ;;  %v15658_v3 = vld [vmem:[#allocation40_spill] sm:$0xff]  ;;  %11552 = vrcp.f32 %v14555_v40 }
 0xc3c   : > { %10836 = vmatprep.subr.bf16.mxu0 %v10835_v60  ;;  %7628 = vadd.xlane.f32.xlu1 %v7627_v21  ;;  %11554 = vrcp.f32 %v14559_v0 }
 0xc3d   : > { %v10839_v20 = vpack.c.bf16 %v11281_v9, %v11280_v11  ;;  %10838 = vmatpush3.bf16.msra.mxu0 %v10835_v60  ;;  %v15654_v60 = vld [vmem:[#allocation46_spill] sm:$0xff] }
 0xc3f   : > { %10840 = vmatprep.subr.bf16.mxu0 %v10839_v20 }
 0xc40   : > { %10462 = vmatmul.mubr.msk.f32.vlgmr.msra.gmra.mrb[72].mxu0 %vm1253_vm3, %v14432_v22 }
 0xc41   : > { %v14571_v55 = vpop.eup %11544  ;;  %10842 = vmatpush3.bf16.msra.mxu0 %v10839_v20  ;;  %10468 = vmatprep.mubr.msk.f32.mxu0 %vm1253_vm3, %v14463_v49 }
 0xc42   : > { %v7642_v19 = vsel %vm1253_vm3, %v14571_v55, 0.0  ;;  %v14577_v31 = vpop.eup %11546 }
 0xc43   : > { %7643 = vadd.xlane.f32.xlu0 %v7642_v19  ;;  %v7639_v22 = vsel %vm1253_vm3, %v14577_v31, 0.0 }
 0xc44   : > { %10469 = vmatmul.mubr.msk.f32.vlgmr.msra.gmra.mrb[74].mxu0 %vm1253_vm3, %v14442_v45  ;;  %v15635_v45 = vld [vmem:[#allocation32_spill] sm:$0xff] }
 0xc45   : > { %10482 = vmatprep.mubr.msk.f32.mxu0 %vm1253_vm3, %v14514_v54  ;;  %v15639_v54 = vld [vmem:[#allocation48_spill] sm:$0xff] }
 0xc47   : > { %7640 = vadd.xlane.f32.xlu0 %v7639_v22 }
 0xc4d   : > { %11293 = vrot.lane.b32.xlu1 %v15602_v30, %s11709_s28  ;;  %v15636_v30 = vld [vmem:[#allocation41_spill] sm:$0xff] }
 0xc51   : > { %11298 = vrot.lane.b32.xlu1 %v15603_v29, %s11709_s28 }
 0xc55   : > { %11303 = vrot.lane.b32.xlu1 %v15604_v13, %s11709_s28  ;;  %v15637_v13 = vld [vmem:[#allocation33_spill] sm:$0xff] }
 0xc59   : > { %11308 = vrot.lane.b32.xlu1 %v15613_v56, %s11709_s28 }
 0xc5d   : > { %1616 = vrot.lane.b32.xlu1 %v15635_v45, %s11710_s7  ;;  %11288 = vrot.lane.b32.xlu0 %v15605_v14, %s11709_s28 }
 0xc61   : > { %3503 = vrot.lane.b32.xlu1 %v13329_v42, %s11710_s7  ;;  %1474 = vrot.lane.b32.xlu0 %v15636_v30, %s11710_s7 }
 0xc65   : > { %5771 = vrot.lane.b32.xlu1 %v14159_v37, %s11710_s7  ;;  %3361 = vrot.lane.b32.xlu0 %v13304_v10, %s11710_s7  ;;  %v15638_v37 = vld [vmem:[#allocation42_spill] sm:$0xff]  ;;  %v11549_v10 = vpop.eup %11548 }
 0xc66   : > { %v11551_v9 = vpop.eup %11550 }
 0xc67   : > { %v11553_v11 = vpop.eup %11552  ;;  %v14694_v22 = vmul.f32 %v11551_v9, %v14382_v25 }
 0xc68   : > { %v7647_v29 = vpop.xlane.xlu1 %7646  ;;  %v14698_v30 = vmul.f32 %v11553_v11, %v14394_v34 }
 0xc69   : > { %1633 = vrot.lane.b32.xlu1 %v15637_v13, %s11711_s9  ;;  %5629 = vrot.lane.b32.xlu0 %v14238_v12, %s11710_s7  ;;  %v14618_v12 = vmul.f32 %v11549_v10, %v14370_v27  ;;  %v15643_v27 = vld [vmem:[#allocation50_spill] sm:$0xff]  ;;  %11556 = vrcp.f32 %v7647_v29 }
 0xc6b   : > { %v7850_v20 = vrot.slane %v14618_v12, 7  ;;  %v7885_v19 = vrot.slane %v14618_v12, 1  ;;  %v7902_v35 = vrot.slane %v14618_v12, 2  ;;  %v7919_v40 = vrot.slane %v14618_v12, 3 }
 0xc6c   : > { %v11284_v14 = vpop.permute.xlu1 %11283  ;;  %v7953_v0 = vrot.slane %v14618_v12, 5  ;;  %v7835_v45 = vrot.slane %v14618_v12, 6 }
 0xc6d   : > { %v11286_v42 = vunpack.i.h.bf16 %v11284_v14  ;;  %v11285_v56 = vunpack.i.l.bf16 %v11284_v14  ;;  %3520 = vrot.lane.b32.xlu1 %v13332_v4, %s11711_s9  ;;  %1491 = vrot.lane.b32.xlu0 %v15638_v37, %s11711_s9  ;;  %v15640_v4 = vld [vmem:[#allocation34_spill] sm:$0xff]  ;;  %v7851_v13 = vsel %vm1442_vm5, %v7850_v20, %v14454_v16  ;;  %v7868_v14 = vsel %vm1442_vm5, %v14618_v12, %v14469_v26  ;;  %v15660_v37 = vld [vmem:[#allocation11_spill] sm:$0xff] }
 0xc6e   : > { %v7886_v25 = vsel %vm1442_vm5, %v7885_v19, %v14472_v63  ;;  %v7920_v34 = vsel %vm1442_vm5, %v7919_v40, %v14478_v51  ;;  %v7852_v63 = vrot.slane %v14698_v30, 6 }
 0xc6f   : > { %v10843_v49 = vpack.c.bf16 %v11286_v42, %v11285_v56  ;;  %v7903_v56 = vsel %vm1442_vm5, %v7902_v35, %v14475_v32  ;;  %v7869_v32 = vrot.slane %v14698_v30, 7 }
 0xc71   : > { %10844 = vmatprep.subr.bf16.mxu1 %v10843_v49  ;;  %5788 = vrot.lane.b32.xlu1 %v14162_v58, %s11711_s9  ;;  %v15642_v58 = vld [vmem:[#allocation43_spill] sm:$0xff] }
 0xc72   : > { %3378 = vrot.lane.b32.xlu0 %v15639_v54, %s11711_s9  ;;  %10846 = vmatpush3.bf16.msra.mxu1 %v10843_v49  ;;  %v11555_v49 = vpop.eup %11554  ;;  %v7800_v54 = vrot.slane %v14694_v22, 1 }
 0xc75   : > { %10476 = vmatmul.mubr.msk.f32.vlgmr.msra.gmra.mrb[82].mxu1 %vm1253_vm3, %v14618_v12  ;;  %1650 = vrot.lane.b32.xlu1 %v15640_v4, %s11706_s16  ;;  %v15661_v4 = vld [vmem:[#allocation10_spill] sm:$0xff] }
 0xc76   : > { %5646 = vrot.lane.b32.xlu0 %v14242_v17, %s11711_s9  ;;  %v15645_v17 = vld [vmem:[#allocation51_spill] sm:$0xff]  ;;  %v7836_v26 = vsel %vm1442_vm5, %v7835_v45, %v15661_v4  ;;  %v15663_v45 = vld [vmem:[#allocation28_spill] sm:$0xff] }
 0xc79   : > { %3537 = vrot.lane.b32.xlu1 %v15641_v61, %s11706_s16  ;;  %v7904_v61 = vrot.slane %v14698_v30, 1 }
 0xc7a   : > { %1508 = vrot.lane.b32.xlu0 %v15642_v58, %s11706_s16 }
 0xc7b   : > { %v14743_v9 = vsel %vm1445_vm6, %v7904_v61, %v7903_v56 }
 0xc7d   : > { %5805 = vrot.lane.b32.xlu1 %v14165_v62, %s11706_s16  ;;  %v15647_v62 = vld [vmem:[#allocation52_spill] sm:$0xff] }
 0xc7e   : > { %3395 = vrot.lane.b32.xlu0 %v15643_v27, %s11706_s16  ;;  %v7921_v27 = vrot.slane %v14698_v30, 2 }
 0xc80   : > { %v14749_v20 = vsel %vm1445_vm6, %v7921_v27, %v7920_v34 }
 0xc81   : > { %1667 = vrot.lane.b32.xlu1 %v15644_v15, %s11700_s18  ;;  %v7955_v15 = vrot.slane %v14698_v30, 4 }
 0xc82   : > { %5663 = vrot.lane.b32.xlu0 %v14246_v59, %s11706_s16  ;;  %v15649_v59 = vld [vmem:[#allocation53_spill] sm:$0xff] }
 0xc85   : > { %3554 = vrot.lane.b32.xlu1 %v15645_v17, %s11700_s18  ;;  %v7837_v17 = vrot.slane %v14698_v30, 5 }
 0xc86   : > { %1525 = vrot.lane.b32.xlu0 %v15646_v23, %s11700_s18  ;;  %v11557_v23 = vpop.eup %11556 }
 0xc89   : > { %5822 = vrot.lane.b32.xlu1 %v14168_v33, %s11700_s18  ;;  %v15651_v33 = vld [vmem:[#allocation54_spill] sm:$0xff] }
 0xc8a   : > { %3412 = vrot.lane.b32.xlu0 %v15647_v62, %s11700_s18  ;;  %v15662_v62 = vld [vmem:[#allocation25_spill] sm:$0xff] }
 0xc8d   : > { %1684 = vrot.lane.b32.xlu1 %v15648_v46, %s11704_s24  ;;  %v14726_v46 = vmul.f32 %v11555_v49, %v15662_v62 }
 0xc8e   : > { %5680 = vrot.lane.b32.xlu0 %v14250_v39, %s11700_s18  ;;  %v15653_v39 = vld [vmem:[#allocation55_spill] sm:$0xff] }
 0xc8f   : > { %v7907_v4 = vrot.slane %v14726_v46, 7  ;;  %v7841_v61 = vrot.slane %v14726_v46, 3 }
 0xc91   : > { %3571 = vrot.lane.b32.xlu1 %v15649_v59, %s11704_s24 }
 0xc92   : > { %1542 = vrot.lane.b32.xlu0 %v15650_v1, %s11704_s24  ;;  %v7714_v1 = vrot.slane %v14694_v22, 4 }
 0xc95   : > { %5839 = vrot.lane.b32.xlu1 %v14173_v47, %s11704_s24  ;;  %v15655_v47 = vld [vmem:[#allocation56_spill] sm:$0xff] }
 0xc96   : > { %3429 = vrot.lane.b32.xlu0 %v15651_v33, %s11704_s24  ;;  %v7731_v33 = vrot.slane %v14694_v22, 5 }
 0xc99   : > { %1701 = vrot.lane.b32.xlu1 %v15652_v5, %s11699_s17 }
 0xc9a   : > { %5697 = vrot.lane.b32.xlu0 %v14254_v28, %s11704_s24  ;;  %v15657_v28 = vld [vmem:[#allocation57_spill] sm:$0xff] }
 0xc9d   : > { %3588 = vrot.lane.b32.xlu1 %v15653_v39, %s11699_s17  ;;  %v14732_v39 = vsel %vm1445_vm6, %v14698_v30, %v7886_v25  ;;  %v15664_v25 = vld [vmem:[#allocation19_spill] sm:$0xff] }
 0xc9e   : > { %1559 = vrot.lane.b32.xlu0 %v15654_v60, %s11699_s17  ;;  %v7748_v60 = vrot.slane %v14694_v22, 6 }
 0xca1   : > { %5856 = vrot.lane.b32.xlu1 %v14176_v36, %s11699_s17  ;;  %v15659_v36 = vld [vmem:[#allocation58_spill] sm:$0xff] }
 0xca2   : > { %3446 = vrot.lane.b32.xlu0 %v15655_v47, %s11699_s17  ;;  %v7765_v47 = vrot.slane %v14694_v22, 7 }
 0xca5   : > { %1718 = vrot.lane.b32.xlu1 %v15656_v50, %s11705_s30  ;;  %v7699_v50 = vrot.slane %v14694_v22, 3 }
 0xca6   : > { %5714 = vrot.lane.b32.xlu0 %v14258_v6, %s11699_s17  ;;  %v7650_v6 = vpop.xlane.xlu0 %7649 }
 0xca7   : > { %11558 = vrcp.f32 %v7650_v6  ;;  %v14740_v6 = vsel %vm1445_vm6, %v7869_v32, %v7868_v14  ;;  %v7959_v32 = vrot.slane %v14726_v46, 2 }
 0xca9   : > { %3605 = vrot.lane.b32.xlu1 %v15657_v28, %s11705_s30 }
 0xcaa   : > { %1576 = vrot.lane.b32.xlu0 %v15658_v3, %s11705_s30 }
 0xcad   : > { %5873 = vrot.lane.b32.xlu1 %v14180_v53, %s11705_s30  ;;  %v7936_v53 = vrot.slane %v14618_v12, 4  ;;  %v7938_v12 = vrot.slane %v14698_v30, 3 }
 0xcae   : > { %3463 = vrot.lane.b32.xlu0 %v15659_v36, %s11705_s30  ;;  %v7853_v36 = vsel %vm1445_vm6, %v7852_v63, %v7851_v13 }
 0xcaf   : > { %v7937_v29 = vsel %vm1442_vm5, %v7936_v53, %v14466_v38  ;;  %v7954_v38 = vsel %vm1442_vm5, %v7953_v0, %v15660_v37  ;;  %v7942_v0 = vrot.slane %v14726_v46, 1 }
 0xcb0   : > { %v7939_v3 = vsel %vm1445_vm6, %v7938_v12, %v7937_v29  ;;  %v14752_v19 = vsel %vm1445_vm6, %v7955_v15, %v7954_v38  ;;  %v14763_v29 = vmul.f32 %v11557_v23, %v15663_v45 }
 0xcb1   : > { %v11559_v5 = vpop.eup %11558 }
 0xcb2   : > { %5731 = vrot.lane.b32.xlu0 %v14232_v7, %s11705_s30  ;;  %v14767_v56 = vmul.f32 %v11559_v5, %v15664_v25  ;;  %v7803_v27 = vrot.slane %v14763_v29, 7  ;;  %v7718_v15 = vrot.slane %v14763_v29, 2 }
 0xcb4   : > { %v7860_v5 = vrot.slane %v14767_v56, 2 }
 0xcc8   : > { %v7632_v21 = vpop.xlane.xlu0 %7631 }
 0xcc9   : > { %11560 = vrcp.f32 %v7632_v21  ;;  %v7629_v7 = vpop.xlane.xlu1 %7628 }
 0xcca   : > { %11562 = vrcp.f32 %v7629_v7  ;;  %v14755_v7 = vsel %vm1445_vm6, %v7837_v17, %v7836_v26 }
 0xccd   : > { %v11294_v42 = vpop.permute.xlu1 %11293 }
 0xcce   : > { %v11296_v10 = vunpack.i.h.bf16 %v11294_v42  ;;  %v11295_v16 = vunpack.i.l.bf16 %v11294_v42 }
 0xcd0   : > { %v10851_v51 = vpack.c.bf16 %v11296_v10, %v11295_v16  ;;  %v7644_v58 = vpop.xlane.xlu0 %7643  ;;  %v7890_v16 = vrot.slane %v14726_v46, 6 }
 0xcd1   : > { %11564 = vrcp.f32 %v7644_v58  ;;  %v11299_v59 = vpop.permute.xlu1 %11298 }
 0xcd2   : > { %10852 = vmatprep.subr.bf16.mxu1 %v10851_v51  ;;  %v11301_v34 = vunpack.i.h.bf16 %v11299_v59  ;;  %v11300_v37 = vunpack.i.l.bf16 %v11299_v59  ;;  %v7945_v59 = vrot.slane %v14767_v56, 7 }
 0xcd3   : > { %v11561_v28 = vpop.eup %11560  ;;  %10854 = vmatpush3.bf16.msra.mxu1 %v10851_v51 }
 0xcd4   : > { %v11563_v11 = vpop.eup %11562  ;;  %v14746_v21 = vmul.f32 %v11561_v28, %v14561_v8  ;;  %v7641_v53 = vpop.xlane.xlu0 %7640  ;;  %v7856_v8 = vrot.slane %v14726_v46, 4  ;;  %v10855_v23 = vpack.c.bf16 %v11301_v34, %v11300_v37  ;;  %v15666_v37 = vld [vmem:[#allocation39_spill] sm:$0xff] }
 0xcd5   : > { %v14758_v35 = vmul.f32 %v11563_v11, %v14563_v24  ;;  %11566 = vrcp.f32 %v7641_v53  ;;  %v11304_v40 = vpop.permute.xlu1 %11303  ;;  %v7873_v24 = vrot.slane %v14726_v46, 5 }
 0xcd6   : > { %v11306_v13 = vunpack.i.h.bf16 %v11304_v40  ;;  %v11305_v14 = vunpack.i.l.bf16 %v11304_v40  ;;  %v7940_v42 = vrot.slane %v14746_v21, 2  ;;  %v7854_v10 = vrot.slane %v14746_v21, 5 }
 0xcd7   : > { %10489 = vmatprep.mubr.msk.f32.mxu1 %vm1253_vm3, %v14758_v35  ;;  %v7798_v58 = vrot.slane %v14758_v35, 2  ;;  %v7871_v53 = vrot.slane %v14746_v21, 6  ;;  %v7712_v40 = vrot.slane %v14758_v35, 5 }
 0xcd8   : > { %v10859_v38 = vpack.c.bf16 %v11306_v13, %v11305_v14  ;;  %v11289_v49 = vpop.permute.xlu0 %11288  ;;  %10490 = vmatmul.mubr.msk.f32.vlgmr.msra.gmra.mrb[84].mxu1 %vm1253_vm3, %v14746_v21  ;;  %v7941_v51 = vsel %vm1448_vm7, %v7940_v42, %v7939_v3  ;;  %v7855_v3 = vsel %vm1448_vm7, %v7854_v10, %v7853_v36  ;;  %v15665_v14 = vld [vmem:[#allocation47_spill] sm:$0xff] }
 0xcd9   : > { %v11291_v26 = vunpack.i.h.bf16 %v11289_v49  ;;  %v11290_v12 = vunpack.i.l.bf16 %v11289_v49  ;;  %v11309_v63 = vpop.permute.xlu1 %11308  ;;  %v7943_v34 = vsel %vm1451_vm8, %v7942_v0, %v7941_v51  ;;  %v7799_v49 = vsel %vm1448_vm7, %v7798_v58, %v14530_v44 }
 0xcda   : > { %10860 = vmatprep.subr.bf16.mxu1 %v10859_v38  ;;  %v11311_v45 = vunpack.i.h.bf16 %v11309_v63  ;;  %v11310_v13 = vunpack.i.l.bf16 %v11309_v63  ;;  %v7888_v0 = vrot.slane %v14746_v21, 7  ;;  %v7729_v63 = vrot.slane %v14758_v35, 6 }
 0xcdb   : > { %v11565_v17 = vpop.eup %11564  ;;  %v10847_v62 = vpack.c.bf16 %v11291_v26, %v11290_v12  ;;  %10862 = vmatpush3.bf16.msra.mxu1 %v10859_v38  ;;  %v7857_v12 = vsel %vm1451_vm8, %v7856_v8, %v7855_v3  ;;  %v7872_v44 = vsel %vm1448_vm7, %v7871_v53, %v14740_v6 }
 0xcdc   : > { %v14786_v28 = vmul.f32 %v11565_v17, %v14571_v55  ;;  %v1475_v11 = vpop.permute.xlu0 %1474 }
 0xcdd   : > { %v14793_v42 = vsel %vm1253_vm3, %v15665_v14, %v1475_v11  ;;  %v1617_v25 = vpop.permute.xlu1 %1616  ;;  %10848 = vmatprep.subr.bf16.mxu0 %v10847_v62  ;;  %v15667_v11 = vld [vmem:[#allocation59_spill] sm:$0xff]  ;;  %v7713_v14 = vsel %vm1448_vm7, %v7712_v40, %v14533_v2  ;;  %v7746_v40 = vrot.slane %v14758_v35, 7 }
 0xcde   : > { %v14798_v55 = vsel %vm1253_vm3, %v15666_v37, %v1617_v25  ;;  %10850 = vmatpush3.bf16.msra.mxu0 %v10847_v62  ;;  %v7944_v36 = vsel %vm1454_vm9, %v14786_v28, %v7943_v34  ;;  %v7858_v38 = vrot.slane %v14786_v28, 3  ;;  %v7875_v58 = vrot.slane %v14786_v28, 4  ;;  %v15668_v25 = vld [vmem:[#allocation60_spill] sm:$0xff] }
 0xcdf   : > { %v11567_v10 = vpop.eup %11566  ;;  %10856 = vmatprep.subr.bf16.mxu0 %v10855_v23  ;;  %v7946_v26 = vsel %vm1457_vm10, %v7945_v59, %v7944_v36  ;;  %v10863_v59 = vpack.c.bf16 %v11311_v45, %v11310_v13  ;;  %v7892_v37 = vrot.slane %v14786_v28, 5  ;;  %v15669_v36 = vld [vmem:[#allocation22_spill] sm:$0xff] }
 0xce0   : > { %v14810_v51 = vmul.f32 %v11567_v10, %v14577_v31  ;;  %7947 = vrot.lane.b32.xlu1 %v7946_v26, %s11699_s17  ;;  %v3362_v17 = vpop.permute.xlu0 %3361  ;;  %v7859_v62 = vsel %vm1454_vm9, %v7858_v38, %v7857_v12  ;;  %v7801_v31 = vsel %vm1451_vm8, %v7800_v54, %v7799_v49  ;;  %v15670_v26 = vld [vmem:[#allocation14_spill] sm:$0xff] }
 0xce1   : > { %v14819_v8 = vsel %vm1253_vm3, %v15667_v11, %v3362_v17  ;;  %v3504_v3 = vpop.permute.xlu1 %3503  ;;  %10483 = vmatmul.mubr.msk.f32.vlgmr.msra.gmra.mrb[76].mxu0 %vm1253_vm3, %v14698_v30  ;;  %v7877_v30 = vrot.slane %v14767_v56, 3  ;;  %v7861_v2 = vsel %vm1457_vm10, %v7860_v5, %v7859_v62  ;;  %v7715_v5 = vsel %vm1451_vm8, %v7714_v1, %v7713_v14 }
 0xce2   : > { %v14830_v6 = vsel %vm1253_vm3, %v15668_v25, %v3504_v3  ;;  %10858 = vmatpush3.bf16.msra.mxu0 %v10855_v23  ;;  %10496 = vmatprep.mubr.msk.f32.mxu0 %vm1253_vm3, %v14694_v22  ;;  %v7802_v53 = vsel %vm1454_vm9, %v14810_v51, %v7801_v31  ;;  %v7716_v45 = vrot.slane %v14810_v51, 3  ;;  %v7874_v23 = vsel %vm1451_vm8, %v7873_v24, %v7872_v44  ;;  %v338_v24 = vld [vmem:[#allocation6 + $0x18] sm:$0xff] }
 0xce3   : > { %10503 = vmatprep.mubr.msk.f32.mxu1 %vm1253_vm3, %v14810_v51  ;;  %10864 = vmatprep.subr.bf16.mxu0 %v10863_v59  ;;  %v7804_v54 = vsel %vm1457_vm10, %v7803_v27, %v7802_v53  ;;  %v7876_v34 = vsel %vm1454_vm9, %v7875_v58, %v7874_v23  ;;  %v7889_v27 = vsel %vm1448_vm7, %v7888_v0, %v14732_v39  ;;  %v7733_v39 = vrot.slane %v14810_v51, 4 }
 0xce4   : > { %10504 = vmatmul.mubr.msk.f32.vlgmr.msra.gmra.mrb[86].mxu1 %vm1253_vm3, %v14786_v28  ;;  %7862 = vrot.lane.b32.xlu1 %v7861_v2, %s11710_s7  ;;  %v5630_v13 = vpop.permute.xlu0 %5629  ;;  %v7717_v10 = vsel %vm1454_vm9, %v7716_v45, %v7715_v5  ;;  %v7730_v1 = vsel %vm1448_vm7, %v7729_v63, %v14536_v52  ;;  %v7906_v0 = vsel %vm1448_vm7, %v14746_v21, %v14743_v9  ;;  %v7909_v17 = vrot.slane %v14786_v28, 6 }
 0xce5   : > { %v14858_v38 = vsel %vm1253_vm3, %v15669_v36, %v5630_v13  ;;  %7805 = vrot.lane.b32.xlu0 %v7804_v54, %s11699_s17  ;;  %v5772_v49 = vpop.permute.xlu1 %5771  ;;  %10497 = vmatmul.mubr.msk.f32.vlgmr.msra.gmra.mrb[78].mxu0 %vm1253_vm3, %v14726_v46  ;;  %v7923_v62 = vrot.slane %v14746_v21, 1  ;;  %v7878_v52 = vsel %vm1457_vm10, %v7877_v30, %v7876_v34  ;;  %v7891_v63 = vsel %vm1451_vm8, %v7890_v16, %v7889_v27 }
 0xce6   : > { %v14869_v12 = vsel %vm1253_vm3, %v15670_v26, %v5772_v49  ;;  %10866 = vmatpush3.bf16.msra.mxu0 %v10863_v59  ;;  %10510 = vmatprep.mubr.msk.f32.mxu0 %vm1253_vm3, %v14763_v29  ;;  %v7747_v44 = vsel %vm1448_vm7, %v7746_v40, %v14523_v57  ;;  %v7750_v58 = vrot.slane %v14810_v51, 5  ;;  %v7719_v9 = vsel %vm1457_vm10, %v7718_v15, %v7717_v10 }
 0xce7   : > { %10513 = vmatprep.subr.mxu0 %v338_v24  ;;  %v7893_v11 = vsel %vm1454_vm9, %v7892_v37, %v7891_v63  ;;  %v7732_v16 = vsel %vm1451_vm8, %v7731_v33, %v7730_v1  ;;  %v7735_v3 = vrot.slane %v14763_v29, 3  ;;  %v7894_v31 = vrot.slane %v14767_v56, 4 }
 0xce8   : > { %7879 = vrot.lane.b32.xlu1 %v7878_v52, %s11711_s9  ;;  %v14886_v59 = vpop.permute.xlu0 %1491  ;;  %v7734_v14 = vsel %vm1454_vm9, %v7733_v39, %v7732_v16  ;;  %v7908_v15 = vsel %vm1451_vm8, %v7907_v4, %v7906_v0  ;;  %v7752_v25 = vrot.slane %v14763_v29, 4  ;;  %v7911_v53 = vrot.slane %v14767_v56, 5 }
 0xce9   : > { %7720 = vrot.lane.b32.xlu0 %v7719_v9, %s11710_s7  ;;  %v14897_v57 = vpop.permute.xlu1 %1633  ;;  %10511 = vmatmul.mubr.msk.f32.vlgmr.msra.gmra.mrb[80].mxu0 %vm1253_vm3, %v14767_v56  ;;  %v7910_v33 = vsel %vm1454_vm9, %v7909_v17, %v7908_v15  ;;  %v7749_v30 = vsel %vm1451_vm8, %v7748_v60, %v7747_v44  ;;  %v7924_v45 = vsel %vm1448_vm7, %v7923_v62, %v14749_v20  ;;  %v7926_v4 = vrot.slane %v14786_v28, 7 }
 0xcea   : > { %10514 = vmatpush3.msra.mxu0 %v338_v24  ;;  %v7895_v2 = vsel %vm1457_vm10, %v7894_v31, %v7893_v11  ;;  %v7751_v54 = vsel %vm1454_vm9, %v7750_v58, %v7749_v30  ;;  %v7764_v23 = vsel %vm1448_vm7, %v14758_v35, %v14540_v48  ;;  %v7736_v60 = vsel %vm1457_vm10, %v7735_v3, %v7734_v14 }
 0xceb   : > { %v7767_v13 = vrot.slane %v14810_v51, 6  ;;  %v7957_v20 = vrot.slane %v14746_v21, 3  ;;  %v7781_v34 = vrot.slane %v14758_v35, 1  ;;  %v7912_v27 = vsel %vm1457_vm10, %v7911_v53, %v7910_v33 }
 0xcec   : > { %7896 = vrot.lane.b32.xlu1 %v7895_v2, %s11706_s16  ;;  %v14921_v40 = vpop.permute.xlu0 %3378  ;;  %v7925_v48 = vsel %vm1451_vm8, %v14726_v46, %v7924_v45  ;;  %v7928_v37 = vrot.slane %v14767_v56, 6  ;;  %v7839_v24 = vrot.slane %v14746_v21, 4  ;;  %v7753_v36 = vsel %vm1457_vm10, %v7752_v25, %v7751_v54 }
 0xced   : > { %7737 = vrot.lane.b32.xlu0 %v7736_v60, %s11711_s9  ;;  %v14928_v5 = vpop.permute.xlu1 %3520  ;;  %v7766_v49 = vsel %vm1451_vm8, %v7765_v47, %v7764_v23  ;;  %v7961_v10 = vrot.slane %v14786_v28, 1  ;;  %v7843_v1 = vrot.slane %v14786_v28, 2  ;;  %v7927_v39 = vsel %vm1454_vm9, %v7926_v4, %v7925_v48 }
 0xcee   : > { %v7840_v26 = vsel %vm1448_vm7, %v7839_v24, %v14755_v7  ;;  %v7701_v0 = vrot.slane %v14810_v51, 2  ;;  %v7697_v17 = vrot.slane %v14758_v35, 4  ;;  %v7768_v62 = vsel %vm1454_vm9, %v7767_v13, %v7766_v49 }
 0xcef   : > { %v7958_v47 = vsel %vm1448_vm7, %v7957_v20, %v14752_v19  ;;  %v7782_v28 = vsel %vm1448_vm7, %v7781_v34, %v14543_v43  ;;  %v7842_v7 = vsel %vm1451_vm8, %v7841_v61, %v7840_v26  ;;  %v7784_v63 = vrot.slane %v14810_v51, 7 }
 0xcf0   : > { %7913 = vrot.lane.b32.xlu1 %v7912_v27, %s11700_s18  ;;  %v14947_v21 = vpop.permute.xlu0 %5646  ;;  %v7815_v44 = vrot.slane %v14758_v35, 3  ;;  %v14963_v58 = vsel %vm1454_vm9, %v7843_v1, %v7842_v7  ;;  %v7698_v19 = vsel %vm1448_vm7, %v7697_v17, %v14549_v18  ;;  %v7769_v43 = vrot.slane %v14763_v29, 5 }
 0xcf1   : > { %7754 = vrot.lane.b32.xlu0 %v7753_v36, %s11706_s16  ;;  %v14958_v52 = vpop.permute.xlu1 %5788  ;;  %v7700_v61 = vsel %vm1451_vm8, %v7699_v50, %v7698_v19  ;;  %v7929_v9 = vsel %vm1457_vm10, %v7928_v37, %v7927_v39  ;;  %v7960_v11 = vsel %vm1451_vm8, %v7959_v32, %v7958_v47  ;;  %v7783_v31 = vsel %vm1451_vm8, %v14694_v22, %v7782_v28 }
 0xcf2   : > { %v14976_v35 = vsel %vm1454_vm9, %v7701_v0, %v7700_v61  ;;  %v7770_v18 = vsel %vm1457_vm10, %v7769_v43, %v7768_v62  ;;  %v7962_v3 = vsel %vm1454_vm9, %v7961_v10, %v7960_v11  ;;  %v7785_v46 = vsel %vm1454_vm9, %v7784_v63, %v7783_v31 }
 0xcf3   : > { %v7816_v32 = vsel %vm1448_vm7, %v7815_v44, %v14546_v41  ;;  %v7819_v14 = vrot.slane %v14810_v51, 1  ;;  %v7786_v15 = vrot.slane %v14763_v29, 6  ;;  %v7817_v25 = vrot.slane %v14694_v22, 2 }
 0xcf4   : > { %7930 = vrot.lane.b32.xlu1 %v7929_v9, %s11704_s24  ;;  %v1509_v16 = vpop.permute.xlu0 %1508  ;;  %v7963_v33 = vsel %vm1457_vm10, %v14767_v56, %v7962_v3  ;;  %v1722_v28 = vsel %vm346_vm0, %v14793_v42, %v14886_v59  ;;  %v1734_v63 = vsel %vm346_vm0, %v14798_v55, %v14897_v57  ;;  %v3609_v55 = vsel %vm346_vm0, %v14819_v8, %v14921_v40 }
 0xcf5   : > { %7771 = vrot.lane.b32.xlu0 %v7770_v18, %s11700_s18  ;;  %v1651_v50 = vpop.permute.xlu1 %1650  ;;  %v7787_v30 = vsel %vm1457_vm10, %v7786_v15, %v7785_v46  ;;  %v7818_v45 = vsel %vm1451_vm8, %v7817_v25, %v7816_v32  ;;  %v1724_v44 = vsel %vm1723_vm11, %v1722_v28, %v1509_v16  ;;  %v3616_v16 = vsel %vm346_vm0, %v14830_v6, %v14928_v5 }
 0xcf6   : > { %v7820_v41 = vsel %vm1454_vm9, %v7819_v14, %v7818_v45  ;;  %v1735_v43 = vsel %vm1723_vm11, %v1734_v63, %v1651_v50  ;;  %v5877_v6 = vsel %vm346_vm0, %v14858_v38, %v14947_v21 }
 0xcf7   : > { %v7821_v22 = vsel %vm1457_vm10, %v14763_v29, %v7820_v41 }
 0xcf8   : > { %7964 = vrot.lane.b32.xlu1 %v7963_v33, %s11705_s30  ;;  %v3396_v53 = vpop.permute.xlu0 %3395  ;;  %v5884_v33 = vsel %vm346_vm0, %v14869_v12, %v14958_v52 }
 0xcf9   : > { %7788 = vrot.lane.b32.xlu0 %v7787_v30, %s11704_s24  ;;  %v3538_v2 = vpop.permute.xlu1 %3537  ;;  %v3610_v18 = vsel %vm1723_vm11, %v3609_v55, %v3396_v53 }
 0xcfa   : > { %v3617_v46 = vsel %vm1723_vm11, %v3616_v16, %v3538_v2 }
 0xcfc   : > { %v14997_v51 = vpop.permute.xlu0 %5663 }
 0xcfd   : > { %7822 = vrot.lane.b32.xlu0 %v7821_v22, %s11705_s30  ;;  %v15002_v54 = vpop.permute.xlu1 %5805  ;;  %v5878_v53 = vsel %vm1723_vm11, %v5877_v6, %v14997_v51 }
 0xcfe   : > { %v5885_v38 = vsel %vm1723_vm11, %v5884_v33, %v15002_v54 }
 0xd00   : > { %v1526_v4 = vpop.permute.xlu0 %1525 }
 0xd01   : > { %v1668_v23 = vpop.permute.xlu1 %1667  ;;  %v1726_v61 = vsel %vm1725_vm12, %v1724_v44, %v1526_v4 }
 0xd02   : > { %v1736_v9 = vsel %vm1725_vm12, %v1735_v43, %v1668_v23 }
 0xd04   : > { %v3413_v60 = vpop.permute.xlu0 %3412 }
 0xd05   : > { %v3555_v13 = vpop.permute.xlu1 %3554  ;;  %v3611_v8 = vsel %vm1725_vm12, %v3610_v18, %v3413_v60 }
 0xd06   : > { %v3618_v32 = vsel %vm1725_vm12, %v3617_v46, %v3555_v13 }
 0xd08   : > { %v15004_v20 = vpop.permute.xlu0 %5680 }
 0xd09   : > { %v15006_v34 = vpop.permute.xlu1 %5822  ;;  %v5879_v21 = vsel %vm1725_vm12, %v5878_v53, %v15004_v20 }
 0xd0a   : > { %v5886_v12 = vsel %vm1725_vm12, %v5885_v38, %v15006_v34 }
 0xd0c   : > { %v1543_v27 = vpop.permute.xlu0 %1542 }
 0xd0d   : > { %v1685_v48 = vpop.permute.xlu1 %1684  ;;  %v1728_v42 = vsel %vm1727_vm13, %v1726_v61, %v1543_v27 }
 0xd0e   : > { %v1737_v59 = vsel %vm1727_vm13, %v1736_v9, %v1685_v48 }
 0xd10   : > { %v3430_v37 = vpop.permute.xlu0 %3429 }
 0xd11   : > { %v3572_v24 = vpop.permute.xlu1 %3571  ;;  %v3612_v14 = vsel %vm1727_vm13, %v3611_v8, %v3430_v37 }
 0xd12   : > { %v3619_v5 = vsel %vm1727_vm13, %v3618_v32, %v3572_v24 }
 0xd13   : > { %v10463_v36 = vpop.f32.mrb[72].mxu0 }
 0xd14   : > { %v8057_v49 = vpop.f32.mrb[73].mxu0  ;;  %v5698_v10 = vpop.permute.xlu0 %5697 }
 0xd15   : > { %10515 = vmatprep.mubr.msk.f32.mxu0 %vm546_vm1, %v8057_v49  ;;  %v5840_v1 = vpop.permute.xlu1 %5839  ;;  %v5880_v52 = vsel %vm1727_vm13, %v5879_v21, %v5698_v10 }
 0xd16   : > { %10516 = vmatmul.mubr.msk.f32.vlgmr.msra.gmra.mrb[44].mxu0 %vm546_vm1, %v10463_v36  ;;  %v5887_v51 = vsel %vm1727_vm13, %v5886_v12, %v5840_v1  ;;  %v7845_v1 = vrot.slane %v14767_v56, 1 }
 0xd17   : > { %v10470_v39 = vpop.f32.mrb[74].mxu0 }
 0xd18   : > { %v8142_v26 = vpop.f32.mrb[75].mxu0  ;;  %v1560_v0 = vpop.permute.xlu0 %1559 }
 0xd19   : > { %10518 = vmatprep.mubr.msk.f32.mxu0 %vm546_vm1, %v8142_v26  ;;  %v1702_v17 = vpop.permute.xlu1 %1701  ;;  %v1730_v57 = vsel %vm1729_vm14, %v1728_v42, %v1560_v0 }
 0xd1a   : > { %10519 = vmatmul.mubr.msk.f32.gmra.mrb[46].mxu0 %vm546_vm1, %v10470_v39  ;;  %v1738_v3 = vsel %vm1729_vm14, %v1737_v59, %v1702_v17  ;;  %v7846_v39 = vsel %vm1457_vm10, %v7845_v1, %v14963_v58 }
 0xd1c   : > { %v3447_v62 = vpop.permute.xlu0 %3446 }
 0xd1d   : > { %v3589_v47 = vpop.permute.xlu1 %3588  ;;  %v3613_v15 = vsel %vm1729_vm14, %v3612_v14, %v3447_v62 }
 0xd1e   : > { %v3620_v30 = vsel %vm1729_vm14, %v3619_v5, %v3589_v47  ;;  %v7703_v47 = vrot.slane %v14763_v29, 1  ;;  %v15117_v5 = vld [vmem:[%s15432_s4] ss:$0 sm:$0xff] }
 0xd20   : > { %v5715_v7 = vpop.permute.xlu0 %5714  ;;  %v7704_v56 = vsel %vm1457_vm10, %v7703_v47, %v14976_v35 }
 0xd21   : > { %v5857_v19 = vpop.permute.xlu1 %5856  ;;  %v5881_v22 = vsel %vm1729_vm14, %v5880_v52, %v5715_v7 }
 0xd22   : > { %v5888_v23 = vsel %vm1729_vm14, %v5887_v51, %v5857_v19 }
 0xd24   : > { %v1577_v11 = vpop.permute.xlu0 %1576 }
 0xd25   : > { %v1732_v31 = vsel %vm1731_vm15, %v1730_v57, %v1577_v11  ;;  %v1719_v50 = vpop.permute.xlu1 %1718 }
 0xd26   : > { %8870 = vst [vmem:[%s15031_s14] sm:$0xff] %v1732_v31  ;;  %v1739_v40 = vsel %vm1731_vm15, %v1738_v3, %v1719_v50 }
 0xd27   : > { %8871 = vst [vmem:[%s15031_s14 + $0x8] sm:$0xff] %v1739_v40 }
 0xd28   : > { %v3464_v25 = vpop.permute.xlu0 %3463 }
 0xd29   : > { %v3614_v45 = vsel %vm1731_vm15, %v3613_v15, %v3464_v25  ;;  %v3606_v2 = vpop.permute.xlu1 %3605 }
 0xd2a   : > { %8872 = vst [vmem:[%s15031_s14 + $0x10] sm:$0xff] %v3614_v45  ;;  %v3621_v41 = vsel %vm1731_vm15, %v3620_v30, %v3606_v2 }
 0xd2b   : > { %8873 = vst [vmem:[%s15031_s14 + $0x18] sm:$0xff] %v3621_v41 }
 0xd2c   : > { %v5732_v4 = vpop.permute.xlu0 %5731 }
 0xd2d   : > { %v5882_v54 = vsel %vm1731_vm15, %v5881_v22, %v5732_v4  ;;  %v5874_v60 = vpop.permute.xlu1 %5873 }
 0xd2e   : > { %8874 = vst [vmem:[%s15031_s14 + $0x20] sm:$0xff] %v5882_v54  ;;  %v5889_v13 = vsel %vm1731_vm15, %v5888_v23, %v5874_v60 }
 0xd2f   : > { %8875 = vst [vmem:[%s15031_s14 + $0x28] sm:$0xff] %v5889_v13 }
 0xd48   : > { %v10477_v20 = vpop.f32.mrb[82].mxu1 }
 0xd49   : > { %v8227_v27 = vpop.f32.mrb[83].mxu1 }
 0xd4a   : > { %10521 = vmatprep.mubr.msk.f32.mxu0 %vm546_vm1, %v8227_v27 }
 0xd4b   : > { %10522 = vmatmul.mubr.msk.f32.gmra.mrb[48].mxu0 %vm546_vm1, %v10477_v20 }
 0xd52   : > { %v7948_v34 = vpop.permute.xlu1 %7947 }
 0xd56   : > { %v7863_v48 = vpop.permute.xlu1 %7862 }
 0xd57   : > { %v7806_v37 = vpop.permute.xlu0 %7805  ;;  %v7974_v0 = vsel %vm1253_vm3, %v7846_v39, %v7863_v48 }
 0xd5a   : > { %v7880_v24 = vpop.permute.xlu1 %7879 }
 0xd5b   : > { %v7721_v36 = vpop.permute.xlu0 %7720  ;;  %v7975_v62 = vsel %vm346_vm0, %v7974_v0, %v7880_v24 }
 0xd5c   : > { %v7967_v19 = vsel %vm1253_vm3, %v7704_v56, %v7721_v36 }
 0xd5e   : > { %v7897_v49 = vpop.permute.xlu1 %7896 }
 0xd5f   : > { %v7738_v10 = vpop.permute.xlu0 %7737  ;;  %v7976_v28 = vsel %vm1723_vm11, %v7975_v62, %v7897_v49 }
 0xd60   : > { %v7968_v43 = vsel %vm346_vm0, %v7967_v19, %v7738_v10 }
 0xd62   : > { %v7914_v26 = vpop.permute.xlu1 %7913 }
 0xd63   : > { %v7755_v17 = vpop.permute.xlu0 %7754  ;;  %v7977_v7 = vsel %vm1725_vm12, %v7976_v28, %v7914_v26 }
 0xd64   : > { %v7969_v61 = vsel %vm1723_vm11, %v7968_v43, %v7755_v17 }
 0xd66   : > { %v7931_v63 = vpop.permute.xlu1 %7930 }
 0xd67   : > { %v7772_v44 = vpop.permute.xlu0 %7771  ;;  %v7978_v58 = vsel %vm1727_vm13, %v7977_v7, %v7931_v63 }
 0xd68   : > { %v7979_v29 = vsel %vm1729_vm14, %v7978_v58, %v7948_v34  ;;  %v7970_v42 = vsel %vm1725_vm12, %v7969_v61, %v7772_v44 }
 0xd6a   : > { %v7965_v9 = vpop.permute.xlu1 %7964 }
 0xd6b   : > { %v7789_v55 = vpop.permute.xlu0 %7788  ;;  %v7980_v59 = vsel %vm1731_vm15, %v7979_v29, %v7965_v9 }
 0xd6c   : > { %v7971_v35 = vsel %vm1727_vm13, %v7970_v42, %v7789_v55  ;;  %8877 = vst [vmem:[%s15031_s14 + $0x38] sm:$0xff] %v7980_v59 }
 0xd6d   : > { %v7972_v11 = vsel %vm1729_vm14, %v7971_v35, %v7806_v37 }
 0xd6f   : > { %v7823_v57 = vpop.permute.xlu0 %7822 }
 0xd70   : > { %v7973_v16 = vsel %vm1731_vm15, %v7972_v11, %v7823_v57 }
 0xd71   : > { %8876 = vst [vmem:[%s15031_s14 + $0x30] sm:$0xff] %v7973_v16 }
 0xdab   : > { %v10491_v18 = vpop.f32.mrb[84].mxu1 }
 0xdac   : > { %v8397_v3 = vpop.f32.mrb[85].mxu1 }
 0xdb4   : > { %v10484_v31 = vpop.f32.mrb[76].mxu0 }
 0xdb5   : > { %v8312_v50 = vpop.f32.mrb[77].mxu0 }
 0xdb6   : > { %10524 = vmatprep.mubr.msk.f32.mxu0 %vm546_vm1, %v8312_v50 }
 0xdb7   : > { %v10505_v46 = vpop.f32.mrb[86].mxu1  ;;  %10525 = vmatmul.mubr.msk.f32.gmra.mrb[50].mxu0 %vm546_vm1, %v10484_v31 }
 0xdb8   : > { %v8567_v8 = vpop.f32.mrb[87].mxu1  ;;  %v10498_v40 = vpop.f32.mrb[78].mxu0  ;;  %10527 = vmatprep.mubr.msk.f32.mxu0 %vm546_vm1, %v8397_v3 }
 0xdb9   : > { %v8482_v32 = vpop.f32.mrb[79].mxu0 }
 0xdbb   : > { %10528 = vmatmul.mubr.msk.f32.gmra.mrb[52].mxu0 %vm546_vm1, %v10491_v18 }
 0xdbc   : > { %v10512_v14 = vpop.f32.mrb[80].mxu0  ;;  %10530 = vmatprep.mubr.msk.f32.mxu0 %vm546_vm1, %v8482_v32 }
 0xdbd   : > { %v8652_v6 = vpop.f32.mrb[81].mxu0 }
 0xdbf   : > { %10531 = vmatmul.mubr.msk.f32.gmra.mrb[54].mxu0 %vm546_vm1, %v10498_v40 }
 0xdc0   : > { %10533 = vmatprep.mubr.msk.f32.mxu0 %vm546_vm1, %v8567_v8 }
 0xdc3   : > { %10534 = vmatmul.mubr.msk.f32.gmra.mrb[56].mxu0 %vm546_vm1, %v10505_v46 }
 0xdc4   : > { %10536 = vmatprep.mubr.msk.f32.mxu0 %vm546_vm1, %v8652_v6 }
 0xdc7   : > { %10537 = vmatmul.mubr.msk.f32.gmra.mrb[58].mxu0 %vm546_vm1, %v10512_v14 }
 0xde9   : > { %v10517_v15 = vpop.f32.mrb[44].mxu0 }
 0xdea   : > { %v8886_v25 = vadd.f32 %v10517_v15, %v15117_v5  ;;  %v8775_v33 = vpop.f32.mrb[45].mxu0 }
 0xdeb   : > { %v8885_v53 = vadd.f32 %v15117_v5, %v8775_v33 }
 0xdec   : > { %v9064_v30 = vrot.slane %v8886_v25, 1  ;;  %v9130_v45 = vrot.slane %v8886_v25, 5  ;;  %v9081_v2 = vrot.slane %v8886_v25, 2  ;;  %v9147_v38 = vrot.slane %v8886_v25, 6 }
 0xded   : > { %v10520_v21 = vpop.f32.mrb[46].mxu0  ;;  %v9024_v41 = vrot.slane %v8885_v53, 7  ;;  %v8924_v12 = vrot.slane %v8885_v53, 1  ;;  %v8990_v52 = vrot.slane %v8885_v53, 5  ;;  %v8941_v51 = vrot.slane %v8885_v53, 2 }
 0xdee   : > { %v8888_v22 = vadd.f32 %v10520_v21, %v15117_v5  ;;  %v8785_v4 = vpop.f32.mrb[47].mxu0  ;;  %v9007_v23 = vrot.slane %v8885_v53, 6  ;;  %v8958_v54 = vrot.slane %v8885_v53, 3  ;;  %v9164_v60 = vrot.slane %v8886_v25, 7 }
 0xdef   : > { %v8887_v13 = vadd.f32 %v15117_v5, %v8785_v4  ;;  %v9098_v20 = vrot.slane %v8886_v25, 3  ;;  %v9115_v27 = vrot.slane %v8886_v25, 4  ;;  %v8975_v34 = vrot.slane %v8885_v53, 4 }
 0xdf0   : > { %v9065_v48 = vsel %vm1439_vm4, %v8888_v22, %v9064_v30  ;;  %v9131_v37 = vrot.slane %v8888_v22, 4  ;;  %v9082_v24 = vrot.slane %v8888_v22, 1  ;;  %v9148_v36 = vrot.slane %v8888_v22, 5 }
 0xdf1   : > { %v9025_v49 = vrot.slane %v8887_v13, 6  ;;  %v8925_v10 = vsel %vm1439_vm4, %v8887_v13, %v8924_v12  ;;  %v8991_v1 = vrot.slane %v8887_v13, 4  ;;  %v8942_v39 = vrot.slane %v8887_v13, 1 }
 0xdf2   : > { %v9132_v26 = vsel %vm1439_vm4, %v9131_v37, %v9130_v45  ;;  %v9083_v0 = vsel %vm1439_vm4, %v9082_v24, %v9081_v2  ;;  %v9149_v17 = vsel %vm1439_vm4, %v9148_v36, %v9147_v38  ;;  %v9008_v62 = vrot.slane %v8887_v13, 5  ;;  %v15671_v24 = vld [vmem:[#allocation61_spill] sm:$0xff] }
 0xdf3   : > { %v9026_v47 = vsel %vm1439_vm4, %v9025_v49, %v9024_v41  ;;  %v8992_v28 = vsel %vm1439_vm4, %v8991_v1, %v8990_v52  ;;  %v8943_v7 = vsel %vm1439_vm4, %v8942_v39, %v8941_v51  ;;  %v8959_v63 = vrot.slane %v8887_v13, 2 }
 0xdf4   : > { %v9009_v56 = vsel %vm1439_vm4, %v9008_v62, %v9007_v23  ;;  %v9165_v44 = vrot.slane %v8888_v22, 6  ;;  %v9099_v58 = vrot.slane %v8888_v22, 2  ;;  %v9049_v19 = vrot.slane %v8888_v22, 7 }
 0xdf5   : > { %v8960_v43 = vsel %vm1439_vm4, %v8959_v63, %v8958_v54  ;;  %v9116_v61 = vrot.slane %v8888_v22, 3  ;;  %v8909_v29 = vrot.slane %v8887_v13, 7  ;;  %v8976_v9 = vrot.slane %v8887_v13, 3 }
 0xdf6   : > { %v9166_v42 = vsel %vm1439_vm4, %v9165_v44, %v9164_v60  ;;  %v9100_v55 = vsel %vm1439_vm4, %v9099_v58, %v9098_v20  ;;  %v9050_v59 = vsel %vm1439_vm4, %v9049_v19, %v8886_v25 }
 0xdf7   : > { %v9117_v35 = vsel %vm1439_vm4, %v9116_v61, %v9115_v27  ;;  %v8910_v57 = vsel %vm1439_vm4, %v8909_v29, %v8885_v53  ;;  %v8977_v11 = vsel %vm1439_vm4, %v8976_v9, %v8975_v34 }
 0xe1e   : > { %v10523_v16 = vpop.f32.mrb[48].mxu0 }
 0xe1f   : > { %v8890_v18 = vadd.f32 %v10523_v16, %v15117_v5  ;;  %v8795_v3 = vpop.f32.mrb[49].mxu0  ;;  %v15675_v16 = vld [vmem:[#allocation65_spill] sm:$0xff] }
 0xe20   : > { %v8889_v31 = vadd.f32 %v15117_v5, %v8795_v3 }
 0xe21   : > { %v9066_v50 = vrot.slane %v8890_v18, 7  ;;  %v9133_v46 = vrot.slane %v8890_v18, 3  ;;  %v9084_v8 = vsel %vm1442_vm5, %v8890_v18, %v9083_v0  ;;  %v9150_v40 = vrot.slane %v8890_v18, 4 }
 0xe22   : > { %v9027_v32 = vrot.slane %v8889_v31, 5  ;;  %v8926_v14 = vrot.slane %v8889_v31, 7  ;;  %v8993_v6 = vrot.slane %v8889_v31, 3  ;;  %v15143_v15 = vsel %vm1442_vm5, %v8889_v31, %v8943_v7 }
 0xe23   : > { %v9067_v25 = vsel %vm1442_vm5, %v9066_v50, %v9065_v48  ;;  %v9134_v33 = vsel %vm1442_vm5, %v9133_v46, %v9132_v26  ;;  %v9151_v53 = vsel %vm1442_vm5, %v9150_v40, %v9149_v17  ;;  %v9010_v30 = vrot.slane %v8889_v31, 4  ;;  %v15673_v17 = vld [vmem:[#allocation63_spill] sm:$0xff] }
 0xe24   : > { %v9028_v45 = vsel %vm1442_vm5, %v9027_v32, %v9026_v47  ;;  %v8927_v2 = vsel %vm1442_vm5, %v8926_v14, %v8925_v10  ;;  %v15151_v38 = vsel %vm1442_vm5, %v8993_v6, %v8992_v28  ;;  %v8961_v21 = vrot.slane %v8889_v31, 1  ;;  %v15672_v10 = vld [vmem:[#allocation62_spill] sm:$0xff] }
 0xe25   : > { %v15154_v41 = vsel %vm1442_vm5, %v9010_v30, %v9009_v56  ;;  %v9167_v12 = vrot.slane %v8890_v18, 5  ;;  %v9101_v52 = vrot.slane %v8890_v18, 1  ;;  %v9051_v51 = vrot.slane %v8890_v18, 6  ;;  %v15674_v56 = vld [vmem:[#allocation64_spill] sm:$0xff] }
 0xe26   : > { %v15157_v22 = vsel %vm1442_vm5, %v8961_v21, %v8960_v43  ;;  %v9118_v4 = vrot.slane %v8890_v18, 2  ;;  %v8911_v23 = vrot.slane %v8889_v31, 6  ;;  %v8978_v54 = vrot.slane %v8889_v31, 2 }
 0xe27   : > { %v15160_v60 = vsel %vm1442_vm5, %v9167_v12, %v9166_v42  ;;  %v15163_v13 = vsel %vm1442_vm5, %v9101_v52, %v9100_v55  ;;  %v15166_v20 = vsel %vm1442_vm5, %v9051_v51, %v9050_v59  ;;  %v15677_v51 = vld [vmem:[#allocation67_spill] sm:$0xff] }
 0xe28   : > { %v15169_v27 = vsel %vm1442_vm5, %v9118_v4, %v9117_v35  ;;  %v15172_v34 = vsel %vm1442_vm5, %v8911_v23, %v8910_v57  ;;  %v15175_v48 = vsel %vm1442_vm5, %v8978_v54, %v8977_v11 }
 0xe8a   : > { %v10526_v37 = vpop.f32.mrb[50].mxu0 }
 0xe8b   : > { %v10869_v36 = vadd.f32 %v10526_v37, %v15671_v24  ;;  %v8805_v49 = vpop.f32.mrb[51].mxu0 }
 0xe8c   : > { %v10870_v1 = vadd.f32 %v8805_v49, %v15672_v10 }
 0xe8d   : > { %v15180_v39 = vadd.f32 %v10869_v36, %v15117_v5  ;;  %v15678_v36 = vld [vmem:[#allocation68_spill] sm:$0xff] }
 0xe8e   : > { %v15183_v26 = vadd.f32 %v10870_v1, %v15117_v5  ;;  %v10529_v0 = vpop.f32.mrb[52].mxu0 }
 0xe8f   : > { %v10871_v62 = vadd.f32 %v10529_v0, %v15673_v17  ;;  %v8815_v47 = vpop.f32.mrb[53].mxu0  ;;  %v9068_v28 = vrot.slane %v15180_v39, 6  ;;  %v9135_v7 = vrot.slane %v15180_v39, 2  ;;  %v9085_v63 = vrot.slane %v15180_v39, 7 }
 0xe90   : > { %v10872_v44 = vadd.f32 %v8815_v47, %v15674_v56  ;;  %v9029_v58 = vrot.slane %v15183_v26, 4  ;;  %v9152_v19 = vrot.slane %v15180_v39, 3  ;;  %v8928_v43 = vrot.slane %v15183_v26, 6 }
 0xe91   : > { %v15194_v61 = vadd.f32 %v10871_v62, %v15117_v5  ;;  %v9069_v29 = vsel %vm1445_vm6, %v9068_v28, %v9067_v25  ;;  %v9136_v9 = vsel %vm1445_vm6, %v9135_v7, %v9134_v33  ;;  %v9086_v42 = vsel %vm1445_vm6, %v9085_v63, %v9084_v8  ;;  %v15676_v8 = vld [vmem:[#allocation66_spill] sm:$0xff] }
 0xe92   : > { %v15200_v55 = vadd.f32 %v10872_v44, %v15117_v5  ;;  %v10532_v59 = vpop.f32.mrb[54].mxu0  ;;  %v9030_v35 = vsel %vm1445_vm6, %v9029_v58, %v9028_v45  ;;  %v9153_v57 = vsel %vm1445_vm6, %v9152_v19, %v9151_v53  ;;  %v8929_v11 = vsel %vm1445_vm6, %v8928_v43, %v8927_v2  ;;  %v15679_v19 = vld [vmem:[#allocation69_spill] sm:$0xff] }
 0xe93   : > { %v10873_v18 = vadd.f32 %v10532_v59, %v15675_v16  ;;  %v8825_v3 = vpop.f32.mrb[55].mxu0  ;;  %v9070_v31 = vrot.slane %v15194_v61, 5  ;;  %v9137_v50 = vrot.slane %v15194_v61, 1  ;;  %v9087_v46 = vrot.slane %v15194_v61, 6 }
 0xe94   : > { %v10874_v40 = vadd.f32 %v8825_v3, %v15676_v8  ;;  %v9031_v32 = vrot.slane %v15200_v55, 3  ;;  %v9154_v14 = vrot.slane %v15194_v61, 2  ;;  %v8930_v6 = vrot.slane %v15200_v55, 5 }
 0xe95   : > { %v15214_v25 = vadd.f32 %v10873_v18, %v15117_v5  ;;  %v9071_v33 = vsel %vm1448_vm7, %v9070_v31, %v9069_v29  ;;  %v9138_v53 = vsel %vm1448_vm7, %v9137_v50, %v9136_v9  ;;  %v9088_v30 = vsel %vm1448_vm7, %v9087_v46, %v9086_v42 }
 0xe96   : > { %v15220_v45 = vadd.f32 %v10874_v40, %v15117_v5  ;;  %v10535_v2 = vpop.f32.mrb[56].mxu0  ;;  %v9032_v21 = vsel %vm1448_vm7, %v9031_v32, %v9030_v35  ;;  %v9155_v12 = vsel %vm1448_vm7, %v9154_v14, %v9153_v57  ;;  %v8931_v52 = vsel %vm1448_vm7, %v8930_v6, %v8929_v11  ;;  %v15680_v35 = vld [vmem:[#allocation70_spill] sm:$0xff] }
 0xe97   : > { %v10875_v4 = vadd.f32 %v10535_v2, %v15677_v51  ;;  %v8835_v23 = vpop.f32.mrb[57].mxu0  ;;  %v9072_v54 = vrot.slane %v15214_v25, 4  ;;  %v9139_v37 = vsel %vm1451_vm8, %v15214_v25, %v9138_v53  ;;  %v9089_v24 = vrot.slane %v15214_v25, 5 }
 0xe98   : > { %v10876_v49 = vadd.f32 %v8835_v23, %v15678_v36  ;;  %v9033_v10 = vrot.slane %v15220_v45, 2  ;;  %v9156_v1 = vrot.slane %v15214_v25, 1  ;;  %v8932_v0 = vrot.slane %v15220_v45, 4 }
 0xe99   : > { %v15235_v17 = vadd.f32 %v10875_v4, %v15117_v5  ;;  %v9073_v62 = vsel %vm1451_vm8, %v9072_v54, %v9071_v33  ;;  %v9090_v47 = vsel %vm1451_vm8, %v9089_v24, %v9088_v30  ;;  %v8995_v28 = vrot.slane %v15183_v26, 2 }
 0xe9a   : > { %v15241_v7 = vadd.f32 %v10876_v49, %v15117_v5  ;;  %v10538_v63 = vpop.f32.mrb[58].mxu0  ;;  %v9034_v56 = vsel %vm1451_vm8, %v9033_v10, %v9032_v21  ;;  %v9157_v44 = vsel %vm1451_vm8, %v9156_v1, %v9155_v12  ;;  %v8933_v58 = vsel %vm1451_vm8, %v8932_v0, %v8931_v52 }
 0xe9b   : > { %v10877_v43 = vadd.f32 %v10538_v63, %v15679_v19  ;;  %v8845_v29 = vpop.f32.mrb[59].mxu0  ;;  %v9074_v9 = vrot.slane %v15235_v17, 3  ;;  %v9140_v42 = vrot.slane %v15235_v17, 7  ;;  %v9091_v59 = vrot.slane %v15235_v17, 4 }
 0xe9c   : > { %v10878_v57 = vadd.f32 %v8845_v29, %v15680_v35  ;;  %v9035_v11 = vrot.slane %v15241_v7, 1  ;;  %v9158_v16 = vsel %vm1454_vm9, %v15235_v17, %v9157_v44  ;;  %v8934_v18 = vrot.slane %v15241_v7, 3 }
 0xe9d   : > { %v15256_v3 = vadd.f32 %v10877_v43, %v15117_v5  ;;  %v9075_v31 = vsel %vm1454_vm9, %v9074_v9, %v9073_v62  ;;  %v9141_v50 = vsel %vm1454_vm9, %v9140_v42, %v9139_v37  ;;  %v9092_v46 = vsel %vm1454_vm9, %v9091_v59, %v9090_v47 }
 0xe9e   : > { %v15262_v8 = vadd.f32 %v10878_v57, %v15117_v5  ;;  %v9036_v40 = vsel %vm1454_vm9, %v9035_v11, %v9034_v56  ;;  %v8935_v32 = vsel %vm1454_vm9, %v8934_v18, %v8933_v58  ;;  %v8996_v14 = vsel %vm1445_vm6, %v8995_v28, %v15151_v38 }
 0xe9f   : > { %v9076_v6 = vrot.slane %v15256_v3, 2  ;;  %v9142_v33 = vrot.slane %v15256_v3, 6  ;;  %v9093_v53 = vrot.slane %v15256_v3, 3  ;;  %v9159_v30 = vrot.slane %v15256_v3, 7 }
 0xea0   : > { %v9037_v2 = vsel %vm1457_vm10, %v15262_v8, %v9036_v40  ;;  %v8936_v5 = vrot.slane %v15262_v8, 2  ;;  %v8997_v21 = vrot.slane %v15200_v55, 1  ;;  %v9000_v12 = vrot.slane %v15241_v7, 7 }
 0xea1   : > { %9038 = vrot.lane.b32.xlu1 %v9037_v2, %s11699_s17  ;;  %v9077_v38 = vsel %vm1457_vm10, %v9076_v6, %v9075_v31  ;;  %v9143_v52 = vsel %vm1457_vm10, %v9142_v33, %v9141_v50  ;;  %v9094_v51 = vsel %vm1457_vm10, %v9093_v53, %v9092_v46  ;;  %v9160_v4 = vsel %vm1457_vm10, %v9159_v30, %v9158_v16 }
 0xea2   : > { %9078 = vrot.lane.b32.xlu0 %v9077_v38, %s11711_s9  ;;  %v8937_v23 = vsel %vm1457_vm10, %v8936_v5, %v8935_v32  ;;  %v8998_v54 = vsel %vm1448_vm7, %v8997_v21, %v8996_v14  ;;  %v9002_v37 = vrot.slane %v15262_v8, 6  ;;  %v8945_v24 = vrot.slane %v15183_v26, 7 }
 0xea3   : > { %v8999_v36 = vsel %vm1451_vm8, %v15220_v45, %v8998_v54  ;;  %v8947_v49 = vrot.slane %v15200_v55, 6  ;;  %v8949_v10 = vrot.slane %v15220_v45, 5  ;;  %v8951_v1 = vrot.slane %v15241_v7, 4 }
 0xea4   : > { %v9001_v0 = vsel %vm1454_vm9, %v9000_v12, %v8999_v36  ;;  %v8946_v62 = vsel %vm1445_vm6, %v8945_v24, %v15143_v15  ;;  %v8953_v47 = vrot.slane %v15262_v8, 3  ;;  %v9012_v28 = vrot.slane %v15183_v26, 3 }
 0xea5   : > { %9144 = vrot.lane.b32.xlu1 %v9143_v52, %s11711_s9  ;;  %v9003_v63 = vsel %vm1457_vm10, %v9002_v37, %v9001_v0  ;;  %v8948_v56 = vsel %vm1448_vm7, %v8947_v49, %v8946_v62  ;;  %v9014_v44 = vrot.slane %v15200_v55, 2  ;;  %v9016_v58 = vrot.slane %v15220_v45, 1 }
 0xea6   : > { %9095 = vrot.lane.b32.xlu0 %v9094_v51, %s11700_s18  ;;  %v8950_v19 = vsel %vm1451_vm8, %v8949_v10, %v8948_v56  ;;  %v9013_v15 = vsel %vm1445_vm6, %v9012_v28, %v15154_v41  ;;  %v9019_v43 = vrot.slane %v15262_v8, 7  ;;  %v8963_v29 = vsel %vm1445_vm6, %v15183_v26, %v15157_v22 }
 0xea7   : > { %v8952_v9 = vsel %vm1454_vm9, %v8951_v1, %v8950_v19  ;;  %v9015_v42 = vsel %vm1448_vm7, %v9014_v44, %v9013_v15  ;;  %v8964_v59 = vrot.slane %v15200_v55, 7  ;;  %v8966_v35 = vrot.slane %v15220_v45, 6 }
 0xea8   : > { %v8954_v57 = vsel %vm1457_vm10, %v8953_v47, %v8952_v9  ;;  %v9017_v11 = vsel %vm1451_vm8, %v9016_v58, %v9015_v42  ;;  %v8968_v41 = vrot.slane %v15241_v7, 5  ;;  %v8970_v16 = vrot.slane %v15262_v8, 4 }
 0xea9   : > { %9161 = vrot.lane.b32.xlu1 %v9160_v4, %s11700_s18  ;;  %v9018_v22 = vsel %vm1454_vm9, %v15241_v7, %v9017_v11  ;;  %v8965_v18 = vsel %vm1448_vm7, %v8964_v59, %v8963_v29  ;;  %v9169_v31 = vrot.slane %v15180_v39, 4  ;;  %v9171_v50 = vrot.slane %v15194_v61, 3 }
 0xeaa   : > { %8938 = vrot.lane.b32.xlu0 %v8937_v23, %s11711_s9  ;;  %v9020_v46 = vsel %vm1457_vm10, %v9019_v43, %v9018_v22  ;;  %v8967_v40 = vsel %vm1451_vm8, %v8966_v35, %v8965_v18  ;;  %v9173_v32 = vrot.slane %v15214_v25, 2  ;;  %v9175_v14 = vrot.slane %v15235_v17, 1 }
 0xeab   : > { %v8969_v6 = vsel %vm1454_vm9, %v8968_v41, %v8967_v40  ;;  %v9170_v33 = vsel %vm1445_vm6, %v9169_v31, %v15160_v60  ;;  %v9103_v53 = vsel %vm1445_vm6, %v15180_v39, %v15163_v13  ;;  %v9104_v30 = vrot.slane %v15194_v61, 7 }
 0xeac   : > { %v8971_v2 = vsel %vm1457_vm10, %v8970_v16, %v8969_v6  ;;  %v9172_v5 = vsel %vm1448_vm7, %v9171_v50, %v9170_v33  ;;  %v9106_v21 = vrot.slane %v15214_v25, 6  ;;  %v9108_v12 = vrot.slane %v15235_v17, 5 }
 0xead   : > { %9004 = vrot.lane.b32.xlu1 %v9003_v63, %s11711_s9  ;;  %v9174_v38 = vsel %vm1451_vm8, %v9173_v32, %v9172_v5  ;;  %v9105_v60 = vsel %vm1448_vm7, %v9104_v30, %v9103_v53  ;;  %v9110_v52 = vrot.slane %v15256_v3, 4  ;;  %v9053_v13 = vrot.slane %v15180_v39, 5 }
 0xeae   : > { %8955 = vrot.lane.b32.xlu0 %v8954_v57, %s11700_s18  ;;  %v9176_v51 = vsel %vm1454_vm9, %v9175_v14, %v9174_v38  ;;  %v9107_v4 = vsel %vm1451_vm8, %v9106_v21, %v9105_v60  ;;  %v9055_v23 = vrot.slane %v15194_v61, 4  ;;  %v9057_v54 = vrot.slane %v15214_v25, 3 }
 0xeaf   : > { %v9177_v37 = vsel %vm1457_vm10, %v15256_v3, %v9176_v51  ;;  %v9109_v24 = vsel %vm1454_vm9, %v9108_v12, %v9107_v4  ;;  %v9054_v36 = vsel %vm1445_vm6, %v9053_v13, %v15166_v20  ;;  %v9059_v49 = vrot.slane %v15235_v17, 2 }
 0xeb0   : > { %v9111_v10 = vsel %vm1457_vm10, %v9110_v52, %v9109_v24  ;;  %v9056_v1 = vsel %vm1448_vm7, %v9055_v23, %v9054_v36  ;;  %v9061_v0 = vrot.slane %v15256_v3, 1  ;;  %v9120_v62 = vrot.slane %v15180_v39, 1 }
 0xeb1   : > { %9021 = vrot.lane.b32.xlu1 %v9020_v46, %s11700_s18  ;;  %v9058_v47 = vsel %vm1451_vm8, %v9057_v54, %v9056_v1  ;;  %v9123_v28 = vrot.slane %v15214_v25, 7  ;;  %v9125_v63 = vrot.slane %v15235_v17, 6  ;;  %v9127_v20 = vrot.slane %v15256_v3, 5 }
 0xeb2   : > { %8972 = vrot.lane.b32.xlu0 %v8971_v2, %s11699_s17  ;;  %v9060_v56 = vsel %vm1454_vm9, %v9059_v49, %v9058_v47  ;;  %v9121_v44 = vsel %vm1445_vm6, %v9120_v62, %v15169_v27  ;;  %v8913_v58 = vrot.slane %v15183_v26, 5  ;;  %v8915_v39 = vrot.slane %v15200_v55, 4 }
 0xeb3   : > { %v9062_v19 = vsel %vm1457_vm10, %v9061_v0, %v9060_v56  ;;  %v9122_v25 = vsel %vm1448_vm7, %v15194_v61, %v9121_v44  ;;  %v8917_v17 = vrot.slane %v15220_v45, 3  ;;  %v8919_v3 = vrot.slane %v15241_v7, 2 }
 0xeb4   : > { %v9124_v15 = vsel %vm1451_vm8, %v9123_v28, %v9122_v25  ;;  %v8914_v43 = vsel %vm1445_vm6, %v8913_v58, %v15172_v34  ;;  %v8921_v27 = vrot.slane %v15262_v8, 1  ;;  %v8980_v29 = vrot.slane %v15183_v26, 1 }
 0xeb5   : > { %9178 = vrot.lane.b32.xlu1 %v9177_v37, %s11699_s17  ;;  %v9126_v9 = vsel %vm1454_vm9, %v9125_v63, %v9124_v15  ;;  %v8916_v42 = vsel %vm1448_vm7, %v8915_v39, %v8914_v43  ;;  %v8983_v61 = vrot.slane %v15220_v45, 7  ;;  %v8985_v59 = vrot.slane %v15241_v7, 6 }
 0xeb6   : > { %9112 = vrot.lane.b32.xlu0 %v9111_v10, %s11699_s17  ;;  %v9128_v35 = vsel %vm1457_vm10, %v9127_v20, %v9126_v9  ;;  %v8918_v34 = vsel %vm1451_vm8, %v8917_v17, %v8916_v42  ;;  %v8981_v57 = vsel %vm1445_vm6, %v8980_v29, %v15175_v48  ;;  %v8987_v26 = vrot.slane %v15262_v8, 5  ;;  %s9609_s17 = sshll.u32 %s15686_s25, 5 }
 0xeb7   : > { %v8920_v11 = vsel %vm1454_vm9, %v8919_v3, %v8918_v34  ;;  %v8982_v41 = vsel %vm1448_vm7, %v15200_v55, %v8981_v57  ;;  %s309_s11 = scalar_lea.vmem %s15433_s5, %s9609_s17 }
 0xeb8   : > { %v8922_v45 = vsel %vm1457_vm10, %v8921_v27, %v8920_v11  ;;  %v8984_v7 = vsel %vm1451_vm8, %v8983_v61, %v8982_v41 }
 0xeb9   : > { %v8986_v16 = vsel %vm1454_vm9, %v8985_v59, %v8984_v7 }
 0xeba   : > { %v8988_v22 = vsel %vm1457_vm10, %v8987_v26, %v8986_v16 }
 0xf13   : > { %v9039_v18 = vpop.permute.xlu1 %9038 }
 0xf14   : > { %v9079_v31 = vpop.permute.xlu0 %9078 }
 0xf15   : > { %v9187_v12 = vsel %vm346_vm0, %v9062_v19, %v9079_v31 }
 0xf17   : > { %v9145_v50 = vpop.permute.xlu1 %9144 }
 0xf18   : > { %v9096_v48 = vpop.permute.xlu0 %9095  ;;  %v9190_v21 = vsel %vm346_vm0, %v9128_v35, %v9145_v50 }
 0xf19   : > { %v9188_v52 = vsel %vm1725_vm12, %v9187_v12, %v9096_v48 }
 0xf1b   : > { %v9162_v46 = vpop.permute.xlu1 %9161 }
 0xf1c   : > { %v8939_v40 = vpop.permute.xlu0 %8938  ;;  %v9191_v38 = vsel %vm1725_vm12, %v9190_v21, %v9162_v46 }
 0xf1d   : > { %v9181_v14 = vsel %vm346_vm0, %v8922_v45, %v8939_v40 }
 0xf1f   : > { %v9005_v8 = vpop.permute.xlu1 %9004 }
 0xf20   : > { %v8956_v32 = vpop.permute.xlu0 %8955  ;;  %v9184_v55 = vsel %vm346_vm0, %v8988_v22, %v9005_v8 }
 0xf21   : > { %v9182_v33 = vsel %vm1725_vm12, %v9181_v14, %v8956_v32 }
 0xf23   : > { %v9022_v6 = vpop.permute.xlu1 %9021 }
 0xf24   : > { %v9185_v53 = vsel %vm1725_vm12, %v9184_v55, %v9022_v6  ;;  %v8973_v30 = vpop.permute.xlu0 %8972 }
 0xf25   : > { %v9186_v2 = vsel %vm1729_vm14, %v9185_v53, %v9039_v18  ;;  %v9183_v5 = vsel %vm1729_vm14, %v9182_v33, %v8973_v30 }
 0xf26   : > { %9194 = vst [vmem:[%s309_s11 + $0x8] sm:$0xff] %v9186_v2  ;;  %9193 = vst [vmem:[%s309_s11] sm:$0xff] %v9183_v5 }
 0xf27   : > { %v9179_v60 = vpop.permute.xlu1 %9178 }
 0xf28   : > { %v9192_v13 = vsel %vm1729_vm14, %v9191_v38, %v9179_v60  ;;  %v9113_v51 = vpop.permute.xlu0 %9112 }
 0xf29   : > { %9196 = vst [vmem:[%s309_s11 + $0x18] sm:$0xff] %v9192_v13  ;;  %v9189_v4 = vsel %vm1729_vm14, %v9188_v52, %v9113_v51 }
 0xf2a   : > { %9195 = vst [vmem:[%s309_s11 + $0x10] sm:$0xff] %v9189_v4 }
 0xf2b PF: > { %p18_p9 = scmp.ge.s32.totalorder %s11846_s15, 4   ;;  %s15681_s21 = smov %s11684_s22 }
 0xf2c   : > { %s15682_s22 = smov %s11688_s23  ;;  %s15683_s23 = smov %s11857_s20 }
 0xf2d   : > { %s15684_s24 = smov %s11846_s15  ;;  %20 = sbr.rel (!%p18_p9) target bundleno = 4 (0x4), region = 100 }
 0xf34   :  { %9234 = vsyncpa [#allocation3], 1 }
 0xf35   :  { %9236 = vsyncpa [#allocation3 + $0x1], 1 }
 0xf36   :  { %9237 = vsyncpa [#allocation5], 1 }

</bundles_post_ra>
